<compile_context>
chip_gen: v5e
topology: v5e:2x2
jax: 0.10.0
libtpu: 0.0.40
codegen_flags: <defaults>
</compile_context>

<pallas_src>
import functools

import jax
import jax.numpy as jnp
from jax.experimental import pallas as pl
from jax.experimental.pallas import tpu as pltpu


def cvap_kernel(img_hbm, aud_ref, w_ref, b_ref, scale_ref,
                loss_ref, acc_ref, img_vmem, img_sem, *,
                actual_b, prefetch_step):
    """Fused CVAP forward, gridded over the audio-feature (K) dimension.

    img_hbm:   [Bp, Dp]  image embeddings, f32, left in HBM (pl.ANY), manual DMA
    aud_ref:   [Bp, tk]  current K-slice of flattened audio inputs, bf16
    w_ref:     [tk, Dp]  current K-slice of audio projection weight, bf16
    b_ref:     [1, Dp]   audio projection bias, f32
    scale_ref: [1, 1]    logit_scale (log space), SMEM scalar
    loss_ref:  [1, 1]    output scalar loss
    acc_ref:   [Bp, Dp]  f32 scratch accumulator for the audio projection
    img_vmem:  [Bp, Dp]  f32 staging buffer for the image block (epilogue only)
    img_sem:   DMA semaphore for the image copy
    actual_b, prefetch_step: static Python ints baked via functools.partial
    """
    f32 = jnp.float32
    k = pl.program_id(0)
    nk = pl.num_programs(0)

    @pl.when(k == 0)
    def _():
        acc_ref[...] = jnp.zeros_like(acc_ref)

    # Late image DMA: frees Bp*Dp*4 bytes of VMEM during (most of) the K loop
    # and overlaps the HBM->VMEM copy with the last projection step(s).
    @pl.when(k == prefetch_step)
    def _():
        pltpu.make_async_copy(img_hbm, img_vmem, img_sem).start()

    # Projection matmul K-slice: bf16 operands on the MXU, f32 accumulation.
    acc_ref[...] += jnp.dot(aud_ref[...], w_ref[...], preferred_element_type=f32)

    @pl.when(k == nk - 1)
    def _():
        eps = 1e-12
        big_neg = jnp.float32(-1e30)
        bp = acc_ref.shape[0]

        pltpu.make_async_copy(img_hbm, img_vmem, img_sem).wait()

        # ---- image branch: L2 normalize (rsqrt on EUP + one multiply) --------
        img = img_vmem[...]
        img = img * jax.lax.rsqrt(jnp.sum(img * img, axis=-1, keepdims=True) + eps)

        # ---- audio branch: bias + L2 normalize --------------------------------
        aud = acc_ref[...] + b_ref[...]
        aud = aud * jax.lax.rsqrt(jnp.sum(aud * aud, axis=-1, keepdims=True) + eps)

        # Fold exp(logit_scale) into the [B, D] image rows (O(B*D) not O(B*B));
        # clamp at 100 as in the CLIP loss head.
        scale = jnp.minimum(jnp.exp(scale_ref[0, 0]), 100.0)
        img_s = img * scale

        # ---- CLIP symmetric contrastive loss ----------------------------------
        # Single [B, B] logits matmul; both operands contract their last dim so
        # the MXU consumes the transposed RHS natively (no materialized transpose
        # of the [B, Dp] operand).
        dims = (((1,), (1,)), ((), ()))
        img_b = img_s.astype(jnp.bfloat16)
        aud_b = aud.astype(jnp.bfloat16)
        logits = jax.lax.dot_general(img_b, aud_b, dims,
                                     preferred_element_type=f32)      # [Bp, Bp]

        # Padded-batch masks (actual_b is static): additive -1e30 biases for the
        # LSEs, multiplicative 0/1 masks for the final sums.
        row_ids = jax.lax.broadcasted_iota(jnp.int32, (bp, 1), 0)     # [Bp, 1]
        col_ids = jax.lax.broadcasted_iota(jnp.int32, (1, bp), 1)     # [1, Bp]
        row_bias = jnp.where(row_ids < actual_b, 0.0, big_neg)        # [Bp, 1]
        col_bias = jnp.where(col_ids < actual_b, 0.0, big_neg)        # [1, Bp]
        row_mask = (row_ids < actual_b).astype(f32)                   # [Bp, 1]
        col_mask = (col_ids < actual_b).astype(f32)                   # [1, Bp]

        # image -> audio: lane-wise LSE over valid columns.
        l_i = logits + col_bias
        m_i = jnp.max(l_i, axis=-1, keepdims=True)
        lse_i = jnp.log(jnp.sum(jnp.exp(l_i - m_i), axis=-1, keepdims=True)) + m_i

        # audio -> image: cross-sublane (axis-0) LSE over valid rows of the SAME
        # logits — replaces the former second B*B*D MXU matmul; the XLU/VPU
        # reduction slots are otherwise idle during this stage.
        l_a = logits + row_bias
        m_a = jnp.max(l_a, axis=0, keepdims=True)
        lse_a = jnp.log(jnp.sum(jnp.exp(l_a - m_a), axis=0, keepdims=True)) + m_a

        # Positive-pair diagonal directly from the [B, D] features (f32).
        diag = jnp.sum(img_s * aud, axis=-1, keepdims=True)           # [Bp, 1]

        loss = (jnp.sum(lse_i * row_mask) + jnp.sum(lse_a * col_mask)
                - 2.0 * jnp.sum(diag * row_mask)) / (2.0 * actual_b)
        loss_ref[...] = jnp.reshape(loss, (1, 1))


def _pad_axis(x, axis, mult):
    pad = (-x.shape[axis]) % mult
    if pad == 0:
        return x
    widths = [(0, 0)] * x.ndim
    widths[axis] = (0, pad)
    return jnp.pad(x, widths)


def _vmem_limit_bytes(bp, dp, tk, nbuf):
    """Derive the scoped-VMEM limit from the actual buffer footprint."""
    need = (
        bp * dp * 4            # f32 projection accumulator (scratch)
        + bp * dp * 4          # image staging buffer (scratch)
        + nbuf * bp * tk * 2   # streamed audio K-slices (bf16)
        + nbuf * tk * dp * 2   # streamed weight K-slices (bf16)
        + 2 * dp * 4           # bias (double-buffered)
        + 4 * bp * bp * 4      # epilogue: logits + exp/select temporaries
        + 4 * bp * dp * 4      # epilogue: f32 feature temporaries
    )
    try:
        cap = int(getattr(pltpu.get_tpu_info(), "vmem_capacity_bytes", 64 << 20))
    except Exception:
        cap = 64 << 20
    # Generous headroom for Mosaic internal scratch, capped at physical VMEM.
    return int(min(cap, max(2 * need + (8 << 20), 32 << 20)))


def cvap_forward(images, audios, w_audio, b_audio, logit_scale):
    """Flattens / pads inputs and invokes the fused Pallas CVAP kernel."""
    LANE = 128      # lane-dense feature dims
    B_ALIGN = 256   # MXU/lane-dense batch for the [B,B] logits (masked in-kernel)
    K_ALIGN = 512   # K tile is always >= 512 (fewer grid steps)

    bsz = images.shape[0]
    audios_flat = audios.reshape(bsz, -1)            # plain-JAX glue

    # Zero padding is exact for the norms, the projection and the inner
    # products; padded batch rows/cols are masked inside the kernel.
    images_p = _pad_axis(_pad_axis(images.astype(jnp.float32), 1, LANE), 0, B_ALIGN)
    audios_p = _pad_axis(_pad_axis(audios_flat, 1, K_ALIGN), 0, B_ALIGN).astype(jnp.bfloat16)
    w_p = _pad_axis(_pad_axis(w_audio, 0, K_ALIGN), 1, LANE).astype(jnp.bfloat16)
    b_p = _pad_axis(b_audio.reshape(1, -1).astype(jnp.float32), 1, LANE)
    scale_2d = jnp.asarray(logit_scale, jnp.float32).reshape(1, 1)

    bp, d_pad = images_p.shape
    a_pad = audios_p.shape[1]

    # Largest K tile that divides the (512-aligned) padded audio dim.
    tk = next(t for t in (2048, 1024, 512) if a_pad % t == 0)
    nk = a_pad // tk
    nbuf = 3 if nk >= 3 else 2
    # Start the image HBM->VMEM copy so it overlaps the last projection steps.
    prefetch_step = max(nk - 2, 0)

    # Deeper buffering on the streamed K-slices (the K loop is HBM-DMA bound on
    # the weight stream at modest B); default double-buffering otherwise.
    stream_mode = {"pipeline_mode": pl.Buffered(3)} if nk >= 3 else {}

    kernel = functools.partial(cvap_kernel, actual_b=bsz, prefetch_step=prefetch_step)

    loss = pl.pallas_call(
        kernel,
        out_shape=jax.ShapeDtypeStruct((1, 1), jnp.float32),
        grid=(nk,),
        in_specs=[
            pl.BlockSpec(memory_space=pl.ANY),                           # images (manual DMA)
            pl.BlockSpec((bp, tk), lambda k: (0, k), **stream_mode),     # audio K-slice
            pl.BlockSpec((tk, d_pad), lambda k: (k, 0), **stream_mode),  # weight K-slice
            pl.BlockSpec((1, d_pad), lambda k: (0, 0)),                  # bias (resident)
            pl.BlockSpec(memory_space=pltpu.MemorySpace.SMEM),           # logit_scale
        ],
        out_specs=pl.BlockSpec((1, 1), lambda k: (0, 0)),
        scratch_shapes=[
            pltpu.VMEM((bp, d_pad), jnp.float32),   # projection accumulator
            pltpu.VMEM((bp, d_pad), jnp.float32),   # image staging buffer
            pltpu.SemaphoreType.DMA,                # image copy semaphore
        ],
        compiler_params=pltpu.CompilerParams(
            dimension_semantics=("arbitrary",),     # K is a reduction axis
            vmem_limit_bytes=_vmem_limit_bytes(bp, d_pad, tk, nbuf)),
    )(images_p, audios_p, w_p, b_p, scale_2d)
    return loss[0, 0]


def cvap_reference(images, audios, w_audio, b_audio, logit_scale):
    """Pure-JAX f32 reference mirroring the PyTorch forward semantics."""
    img = images / jnp.linalg.norm(images, axis=-1, keepdims=True)
    aud = audios.reshape(audios.shape[0], -1) @ w_audio + b_audio
    aud = aud / jnp.linalg.norm(aud, axis=-1, keepdims=True)
    scale = jnp.minimum(jnp.exp(logit_scale), 100.0)
    logits = scale * (img @ aud.T)
    b = images.shape[0]
    lse_i = jax.nn.logsumexp(logits, axis=-1)
    lse_a = jax.nn.logsumexp(logits, axis=0)
    diag = jnp.diagonal(logits)
    return (jnp.sum(lse_i) + jnp.sum(lse_a) - 2.0 * jnp.sum(diag)) / (2.0 * b)


if __name__ == "__main__":
    # Small shapes consistent with the forward pass:
    #   images: [B, D] precomputed frame embeddings (image_head=None path)
    #   audios: [B, A] flattened audio inputs for the synthetic audio head
    B, D, A = 8, 32, 64

    key = jax.random.PRNGKey(0)
    k_img, k_aud, k_w, k_b = jax.random.split(key, 4)

    images = jax.random.normal(k_img, (B, D), dtype=jnp.float32)
    audios = jax.random.normal(k_aud, (B, A), dtype=jnp.float32)

    # Deterministic synthetic parameters (audio head + loss head).
    w_audio = jax.random.normal(k_w, (A, D), dtype=jnp.float32) * 0.02
    b_audio = jax.random.normal(k_b, (D,), dtype=jnp.float32) * 0.01
    logit_scale = jnp.log(jnp.float32(1.0 / 0.07))    # CLIP init for loss_head

    loss = cvap_forward(images, audios, w_audio, b_audio, logit_scale)
    jax.block_until_ready(loss)

    # sanity: finite scalar, close to the pure-f32 reference (bf16 MXU operands
    # in the kernel -> loose tolerance).
    ref = cvap_reference(images, audios, w_audio, b_audio, logit_scale)
    assert loss.shape == () and bool(jnp.isfinite(loss))
    assert abs(float(loss) - float(ref)) < 0.2, (float(loss), float(ref))
    print("KERNEL_OK")
</pallas_src>

<mosaic_0001>
module attributes {stable_mosaic.version = 11 : i64} {
  func.func @cvap_kernel(%arg0: i32, %arg1: memref<256x128xf32, #tpu.memory_space<any>>, %arg2: memref<256x512xbf16, #tpu.memory_space<vmem>>, %arg3: memref<512x128xbf16, #tpu.memory_space<vmem>>, %arg4: memref<1x128xf32, #tpu.memory_space<vmem>>, %arg5: memref<1x1xf32, #tpu.memory_space<smem>>, %arg6: memref<1x1xf32, #tpu.memory_space<vmem>>, %arg7: memref<256x128xf32, #tpu.memory_space<vmem>>, %arg8: memref<256x128xf32, #tpu.memory_space<vmem>>, %arg9: memref<!tpu.dma_semaphore, #tpu.memory_space<semaphore_mem>>) attributes {dimension_semantics = [#tpu.dimension_semantics<arbitrary>], iteration_bounds = array<i64: 1>, scalar_prefetch = 0 : i64, scratch_operands = 3 : i64, tpu.core_type = #tpu.core_type<tc>, window_params = [{}, {transform_indices = @transform_1, window_bounds = array<i64: 256, 512>}, {transform_indices = @transform_2, window_bounds = array<i64: 512, 128>}, {pipeline_mode = #tpu.pipeline_mode<synchronous>, transform_indices = @transform_3, window_bounds = array<i64: 1, 128>}, {transform_indices = @transform_4, window_bounds = array<i64: 1, 1>}, {pipeline_mode = #tpu.pipeline_mode<synchronous>, transform_indices = @transform_5, window_bounds = array<i64: 1, 1>}]} {
    %c0_i32 = arith.constant 0 : i32
    %0 = arith.cmpi eq, %arg0, %c0_i32 : i32
    %1 = arith.extui %0 : i1 to i32
    %c0_i32_0 = arith.constant 0 : i32
    %2 = arith.cmpi ne, %1, %c0_i32_0 : i32
    scf.if %2 {
      %cst_12 = arith.constant 0.000000e+00 : f32
      %15 = vector.broadcast %cst_12 : f32 to vector<256x128xf32>
      %c0_13 = arith.constant 0 : index
      %c0_14 = arith.constant 0 : index
      %16 = vector.load %arg7[%c0_13, %c0_14] : memref<256x128xf32, #tpu.memory_space<vmem>>, vector<256x128xf32>
      tpu.vector_store %arg7[%c0_13, %c0_14], %15 {strides = array<i32>} : memref<256x128xf32, #tpu.memory_space<vmem>>, vector<256x128xf32>,
    } else {
    }
    %c0_i32_1 = arith.constant 0 : i32
    %3 = arith.cmpi eq, %arg0, %c0_i32_1 : i32
    %4 = arith.extui %3 : i1 to i32
    %c0_i32_2 = arith.constant 0 : i32
    %5 = arith.cmpi ne, %4, %c0_i32_2 : i32
    scf.if %5 {
      tpu.enqueue_dma source(%arg1 : memref<256x128xf32, #tpu.memory_space<any>>) target(%arg8 : memref<256x128xf32, #tpu.memory_space<vmem>>) target_semaphore(%arg9 : memref<!tpu.dma_semaphore, #tpu.memory_space<semaphore_mem>>)
    } else {
    }
    %c0 = arith.constant 0 : index
    %c0_3 = arith.constant 0 : index
    %6 = vector.load %arg7[%c0, %c0_3] : memref<256x128xf32, #tpu.memory_space<vmem>>, vector<256x128xf32>
    %c0_4 = arith.constant 0 : index
    %c0_5 = arith.constant 0 : index
    %7 = vector.load %arg2[%c0_4, %c0_5] : memref<256x512xbf16, #tpu.memory_space<vmem>>, vector<256x512xbf16>
    %c0_6 = arith.constant 0 : index
    %c0_7 = arith.constant 0 : index
    %8 = vector.load %arg3[%c0_6, %c0_7] : memref<512x128xbf16, #tpu.memory_space<vmem>>, vector<512x128xbf16>
    %cst = arith.constant dense<0.000000e+00> : vector<256x128xf32>
    %9 = tpu.matmul %7, %8, %cst {dimension_numbers = #tpu.dot_dimension_numbers<[1], [0], [0], [1], [0, 0, 1, 1], [], []>} : vector<256x512xbf16>, vector<512x128xbf16>, vector<256x128xf32> -> vector<256x128xf32>
    %10 = arith.addf %6, %9 : vector<256x128xf32>
    %c0_8 = arith.constant 0 : index
    %c0_9 = arith.constant 0 : index
    %11 = vector.load %arg7[%c0_8, %c0_9] : memref<256x128xf32, #tpu.memory_space<vmem>>, vector<256x128xf32>
    tpu.vector_store %arg7[%c0_8, %c0_9], %10 {strides = array<i32>} : memref<256x128xf32, #tpu.memory_space<vmem>>, vector<256x128xf32>,
    %c0_i32_10 = arith.constant 0 : i32
    %12 = arith.cmpi eq, %arg0, %c0_i32_10 : i32
    %13 = arith.extui %12 : i1 to i32
    %c0_i32_11 = arith.constant 0 : i32
    %14 = arith.cmpi ne, %13, %c0_i32_11 : i32
    scf.if %14 {
      tpu.wait_dma2 semaphore(%arg9 : memref<!tpu.dma_semaphore, #tpu.memory_space<semaphore_mem>>) src(%arg1 : memref<256x128xf32, #tpu.memory_space<any>>) dst(%arg8 : memref<256x128xf32, #tpu.memory_space<vmem>>)
      %c0_12 = arith.constant 0 : index
      %c0_13 = arith.constant 0 : index
      %15 = vector.load %arg8[%c0_12, %c0_13] : memref<256x128xf32, #tpu.memory_space<vmem>>, vector<256x128xf32>
      %16 = arith.mulf %15, %15 : vector<256x128xf32>
      %cst_14 = arith.constant dense<0.000000e+00> : vector<256xf32>
      %17 = vector.multi_reduction <add>, %16, %cst_14 [1] : vector<256x128xf32> to vector<256xf32>
      %18 = vector.shape_cast %17 : vector<256xf32> to vector<256x1xf32>
      %cst_15 = arith.constant 9.99999996E-13 : f32
      %19 = vector.broadcast %cst_15 : f32 to vector<256x1xf32>
      %20 = arith.addf %18, %19 : vector<256x1xf32>
      %21 = math.rsqrt %20 : vector<256x1xf32>
      %22 = vector.broadcast %21 : vector<256x1xf32> to vector<256x128xf32>
      %23 = arith.mulf %15, %22 : vector<256x128xf32>
      %c0_16 = arith.constant 0 : index
      %c0_17 = arith.constant 0 : index
      %24 = vector.load %arg7[%c0_16, %c0_17] : memref<256x128xf32, #tpu.memory_space<vmem>>, vector<256x128xf32>
      %c0_18 = arith.constant 0 : index
      %c0_19 = arith.constant 0 : index
      %25 = vector.load %arg4[%c0_18, %c0_19] : memref<1x128xf32, #tpu.memory_space<vmem>>, vector<1x128xf32>
      %26 = vector.broadcast %25 : vector<1x128xf32> to vector<256x128xf32>
      %27 = arith.addf %24, %26 : vector<256x128xf32>
      %28 = arith.mulf %27, %27 : vector<256x128xf32>
      %cst_20 = arith.constant dense<0.000000e+00> : vector<256xf32>
      %29 = vector.multi_reduction <add>, %28, %cst_20 [1] : vector<256x128xf32> to vector<256xf32>
      %30 = vector.shape_cast %29 : vector<256xf32> to vector<256x1xf32>
      %cst_21 = arith.constant 9.99999996E-13 : f32
      %31 = vector.broadcast %cst_21 : f32 to vector<256x1xf32>
      %32 = arith.addf %30, %31 : vector<256x1xf32>
      %33 = math.rsqrt %32 : vector<256x1xf32>
      %34 = vector.broadcast %33 : vector<256x1xf32> to vector<256x128xf32>
      %35 = arith.mulf %27, %34 : vector<256x128xf32>
      %c0_22 = arith.constant 0 : index
      %c0_23 = arith.constant 0 : index
      %36 = memref.load %arg5[%c0_22, %c0_23] : memref<1x1xf32, #tpu.memory_space<smem>>
      %37 = math.exp %36 : f32
      %cst_24 = arith.constant 1.000000e+02 : f32
      %38 = arith.minimumf %37, %cst_24 : f32
      %39 = vector.broadcast %38 : f32 to vector<256x128xf32>
      %40 = arith.mulf %23, %39 : vector<256x128xf32>
      %41 = arith.truncf %40 : vector<256x128xf32> to vector<256x128xbf16>
      %42 = arith.truncf %35 : vector<256x128xf32> to vector<256x128xbf16>
      %cst_25 = arith.constant dense<0.000000e+00> : vector<256x256xf32>
      %43 = tpu.matmul %41, %42, %cst_25 {dimension_numbers = #tpu.dot_dimension_numbers<[1], [1], [0], [0], [0, 0, 1, 0], [], []>} : vector<256x128xbf16>, vector<256x128xbf16>, vector<256x256xf32> -> vector<256x256xf32>
      %44 = tpu.iota {dimensions = array<i32: 0>} : vector<256x1xi32>
      %45 = tpu.iota {dimensions = array<i32: 1>} : vector<1x256xi32>
      %c8_i32 = arith.constant 8 : i32
      %46 = vector.broadcast %c8_i32 : i32 to vector<256x1xi32>
      %47 = arith.cmpi slt, %44, %46 : vector<256x1xi32>
      %cst_26 = arith.constant 0.000000e+00 : f32
      %cst_27 = arith.constant -1.000000e+30 : f32
      %48 = vector.broadcast %cst_26 : f32 to vector<256x1xf32>
      %49 = vector.broadcast %cst_27 : f32 to vector<256x1xf32>
      %50 = arith.select %47, %48, %49 : vector<256x1xi1>, vector<256x1xf32>
      %c8_i32_28 = arith.constant 8 : i32
      %51 = vector.broadcast %c8_i32_28 : i32 to vector<1x256xi32>
      %52 = arith.cmpi slt, %45, %51 : vector<1x256xi32>
      %cst_29 = arith.constant 0.000000e+00 : f32
      %cst_30 = arith.constant -1.000000e+30 : f32
      %53 = vector.broadcast %cst_29 : f32 to vector<1x256xf32>
      %54 = vector.broadcast %cst_30 : f32 to vector<1x256xf32>
      %55 = arith.select %52, %53, %54 : vector<1x256xi1>, vector<1x256xf32>
      %c8_i32_31 = arith.constant 8 : i32
      %56 = vector.broadcast %c8_i32_31 : i32 to vector<256x1xi32>
      %57 = arith.cmpi slt, %44, %56 : vector<256x1xi32>
      %58 = arith.extui %57 : vector<256x1xi1> to vector<256x1xi32>
      %59 = arith.sitofp %58 : vector<256x1xi32> to vector<256x1xf32>
      %c8_i32_32 = arith.constant 8 : i32
      %60 = vector.broadcast %c8_i32_32 : i32 to vector<1x256xi32>
      %61 = arith.cmpi slt, %45, %60 : vector<1x256xi32>
      %62 = arith.extui %61 : vector<1x256xi1> to vector<1x256xi32>
      %63 = arith.sitofp %62 : vector<1x256xi32> to vector<1x256xf32>
      %64 = vector.broadcast %55 : vector<1x256xf32> to vector<256x256xf32>
      %65 = arith.addf %43, %64 : vector<256x256xf32>
      %cst_33 = arith.constant dense<0xFF800000> : vector<256xf32>
      %66 = vector.multi_reduction <maximumf>, %65, %cst_33 [1] : vector<256x256xf32> to vector<256xf32>
      %67 = vector.shape_cast %66 : vector<256xf32> to vector<256x1xf32>
      %68 = vector.broadcast %67 : vector<256x1xf32> to vector<256x256xf32>
      %69 = arith.subf %65, %68 : vector<256x256xf32>
      %70 = math.exp %69 : vector<256x256xf32>
      %cst_34 = arith.constant dense<0.000000e+00> : vector<256xf32>
      %71 = vector.multi_reduction <add>, %70, %cst_34 [1] : vector<256x256xf32> to vector<256xf32>
      %72 = vector.shape_cast %71 : vector<256xf32> to vector<256x1xf32>
      %73 = math.log %72 : vector<256x1xf32>
      %74 = arith.addf %73, %67 : vector<256x1xf32>
      %75 = vector.broadcast %50 : vector<256x1xf32> to vector<256x256xf32>
      %76 = arith.addf %43, %75 : vector<256x256xf32>
      %cst_35 = arith.constant dense<0xFF800000> : vector<256xf32>
      %77 = vector.multi_reduction <maximumf>, %76, %cst_35 [0] : vector<256x256xf32> to vector<256xf32>
      %78 = vector.shape_cast %77 : vector<256xf32> to vector<1x256xf32>
      %79 = vector.broadcast %78 : vector<1x256xf32> to vector<256x256xf32>
      %80 = arith.subf %76, %79 : vector<256x256xf32>
      %81 = math.exp %80 : vector<256x256xf32>
      %cst_36 = arith.constant dense<0.000000e+00> : vector<256xf32>
      %82 = vector.multi_reduction <add>, %81, %cst_36 [0] : vector<256x256xf32> to vector<256xf32>
      %83 = vector.shape_cast %82 : vector<256xf32> to vector<1x256xf32>
      %84 = math.log %83 : vector<1x256xf32>
      %85 = arith.addf %84, %78 : vector<1x256xf32>
      %86 = arith.mulf %40, %35 : vector<256x128xf32>
      %cst_37 = arith.constant dense<0.000000e+00> : vector<256xf32>
      %87 = vector.multi_reduction <add>, %86, %cst_37 [1] : vector<256x128xf32> to vector<256xf32>
      %88 = vector.shape_cast %87 : vector<256xf32> to vector<256x1xf32>
      %89 = arith.mulf %74, %59 : vector<256x1xf32>
      %90 = vector.shape_cast %89 : vector<256x1xf32> to vector<1x256x1xf32>
      %cst_38 = arith.constant dense<0.000000e+00> : vector<1xf32>
      %91 = vector.multi_reduction <add>, %90, %cst_38 [1, 2] : vector<1x256x1xf32> to vector<1xf32>
      %92 = vector.shape_cast %91 : vector<1xf32> to vector<1x1x1xf32>
      %93 = vector.extract %92[0, 0, 0] : f32 from vector<1x1x1xf32>
      %94 = arith.mulf %85, %63 : vector<1x256xf32>
      %95 = vector.shape_cast %94 : vector<1x256xf32> to vector<1x1x256xf32>
      %cst_39 = arith.constant dense<0.000000e+00> : vector<1xf32>
      %96 = vector.multi_reduction <add>, %95, %cst_39 [1, 2] : vector<1x1x256xf32> to vector<1xf32>
      %97 = vector.shape_cast %96 : vector<1xf32> to vector<1x1x1xf32>
      %98 = vector.extract %97[0, 0, 0] : f32 from vector<1x1x1xf32>
      %99 = arith.addf %93, %98 : f32
      %100 = arith.mulf %88, %59 : vector<256x1xf32>
      %101 = vector.shape_cast %100 : vector<256x1xf32> to vector<1x256x1xf32>
      %cst_40 = arith.constant dense<0.000000e+00> : vector<1xf32>
      %102 = vector.multi_reduction <add>, %101, %cst_40 [1, 2] : vector<1x256x1xf32> to vector<1xf32>
      %103 = vector.shape_cast %102 : vector<1xf32> to vector<1x1x1xf32>
      %104 = vector.extract %103[0, 0, 0] : f32 from vector<1x1x1xf32>
      %cst_41 = arith.constant 2.000000e+00 : f32
      %105 = arith.mulf %cst_41, %104 : f32
      %106 = arith.subf %99, %105 : f32
      %cst_42 = arith.constant 1.600000e+01 : f32
      %107 = arith.divf %106, %cst_42 : f32
      %108 = vector.broadcast %107 : f32 to vector<1x1xf32>
      %c0_43 = arith.constant 0 : index
      %c0_44 = arith.constant 0 : index
      %109 = vector.load %arg6[%c0_43, %c0_44] : memref<1x1xf32, #tpu.memory_space<vmem>>, vector<1x1xf32>
      tpu.vector_store %arg6[%c0_43, %c0_44], %108 {strides = array<i32>} : memref<1x1xf32, #tpu.memory_space<vmem>>, vector<1x1xf32>,
    } else {
    }
    return
  }
  func.func @transform_1(%arg0: i32) -> (i32, i32) {
    %c0_i32 = arith.constant 0 : i32
    %c0_i32_0 = arith.constant 0 : i32
    return %c0_i32, %arg0 : i32, i32
  }
  func.func @transform_2(%arg0: i32) -> (i32, i32) {
    %c0_i32 = arith.constant 0 : i32
    %c0_i32_0 = arith.constant 0 : i32
    return %arg0, %c0_i32 : i32, i32
  }
  func.func @transform_3(%arg0: i32) -> (i32, i32) {
    %c0_i32 = arith.constant 0 : i32
    %c0_i32_0 = arith.constant 0 : i32
    %c0_i32_1 = arith.constant 0 : i32
    return %c0_i32, %c0_i32_0 : i32, i32
  }
  func.func @transform_4(%arg0: i32) -> (i32, i32) {
    %c0_i32 = arith.constant 0 : i32
    %c0_i32_0 = arith.constant 0 : i32
    %c0_i32_1 = arith.constant 0 : i32
    return %c0_i32, %c0_i32_0 : i32, i32
  }
  func.func @transform_5(%arg0: i32) -> (i32, i32) {
    %c0_i32 = arith.constant 0 : i32
    %c0_i32_0 = arith.constant 0 : i32
    %c0_i32_1 = arith.constant 0 : i32
    return %c0_i32, %c0_i32_0 : i32, i32
  }
}

</mosaic_0001>

<bundles_post_ra>
// kernel: tpu_custom_call.1
= control target key start
LH: loop header
LB: loop body
LE: loop exit
PB: predicated region body
PF: predicated region fallthrough
CT: control target
= control target key end

     0   :  { %11 = vsyncpa [#allocation7], 0  ;;  %s7926_s0 = inlined_call_operand.hbm [shape: f32[256,128], index: 0, kind: input, shape index: {}]   ;;  %s7927_s1 = inlined_call_operand.hbm [shape: bf16[256,512], index: 1, kind: input, shape index: {}]   ;;  %s7928_s2 = inlined_call_operand.hbm [shape: bf16[512,128], index: 2, kind: input, shape index: {}]   ;;  %s7929_s3 = inlined_call_operand.vmem [shape: f32[1,128], index: 3, kind: input, shape index: {}]   ;;  %s7930_s4 = inlined_call_operand.<no memory space> [shape: f32[1,1], index: 4, kind: input, shape index: {}]   ;;  %s7931_s5 = inlined_call_operand.hbm [shape: f32[1,1], index: 5, kind: output, shape index: {}]  }
   0x1   :  { %12 = vsyncpa [#allocation10], 0 }
   0x2   :  { %13 = vsyncpa [#allocation8], 0  ;;  %s18_s20 = sshll.u32 %s7927_s1, 4  ;;  %s5106_s21 = smov [#allocation6]   ;;  %s19_s20 = int_to_ptr.hbm [resolvable:$true] %s18_s20 }
   0x3   :  { %s20_s22 = sshll.u32 %s5106_s21, 4  ;;  %s31_s25 = sshll.u32 %s7928_s2, 4  ;;  %s21_s22 = int_to_ptr.vmem [resolvable:$true] %s20_s22  ;;  %s32_s25 = int_to_ptr.hbm [resolvable:$true] %s31_s25 }
   0x4   :  { %s5107_s26 = smov 256   ;;  %s5108_s27 = smov 16  }
   0x5   :  { %26 = dma.hbm_to_vmem [thread:$0]  %s19_s20, 8192, %s21_s22, [#allocation7], %s5107_s26, %s5107_s26, %s5108_s27  }
   0x6   :  { %s5109_s28 = smov [#allocation9]   ;;  %s5110_s30 = smov 64  }
   0x7   :  { %s33_s29 = sshll.u32 %s5109_s28, 4  ;;  %s5111_s6 = smov 4   ;;  %s34_s29 = int_to_ptr.vmem [resolvable:$true] %s33_s29 }
   0x8   :  { %39 = dma.hbm_to_vmem [thread:$0]  %s32_s25, 4096, %s34_s29, [#allocation10], %s5110_s30, %s5110_s30, %s5111_s6  }
   0x9   :  { %5098 = dma.done.wait [#allocation7], 8192  }
   0xa   :  { %5099 = vsyncadd [#allocation7], 4294959104 }
   0xb   :  { %5100 = dma.done.wait [#allocation10], 4096  }
   0xc   :  { %5101 = vsyncadd [#allocation10], 4294963200  ;;  %v4450_v0 = vld [vmem:[#allocation9 + $0x38] sm:$0xff]  ;;  %v4449_v2 = vld [vmem:[#allocation9 + $0x30] sm:$0xff]  ;;  %s95_s7 = sshll.u32 %s7926_s0, 4  ;;  %s5112_s8 = smov [#allocation3]   ;;  %s96_s7 = int_to_ptr.hbm [resolvable:$true] %s95_s7 }
   0xd   :  { %v4458_v1 = vld [vmem:[#allocation9 + $0x78] sm:$0xff]  ;;  %4475 = vmatpush.bf16.msra.mxu2 %v4450_v0  ;;  %v4457_v3 = vld [vmem:[#allocation9 + $0x70] sm:$0xff]  ;;  %773 = vmatpush.bf16.msra.mxu0 %v4450_v0  ;;  %v4448_v4 = vld [vmem:[#allocation9 + $0x28] sm:$0xff]  ;;  %s97_s9 = sshll.u32 %s5112_s8, 4  ;;  %s98_s9 = int_to_ptr.vmem [resolvable:$true] %s97_s9 }
   0xe   :  { %4483 = vmatpush.bf16.msra.mxu3 %v4458_v1  ;;  %862 = vmatpush.bf16.msra.mxu1 %v4458_v1  ;;  %v4456_v5 = vld [vmem:[#allocation9 + $0x68] sm:$0xff]  ;;  %v4447_v6 = vld [vmem:[#allocation9 + $0x20] sm:$0xff]  ;;  %v4446_v8 = vld [vmem:[#allocation9 + $0x18] sm:$0xff]  ;;  %100 = dma.hbm_to_vmem [thread:$0]  %s96_s7, 4096, %s98_s9, [#allocation4] }
   0xf   :  { %v4455_v7 = vld [vmem:[#allocation9 + $0x60] sm:$0xff]  ;;  %v4454_v9 = vld [vmem:[#allocation9 + $0x58] sm:$0xff]  ;;  %v4445_v10 = vld [vmem:[#allocation9 + $0x10] sm:$0xff] }
  0x10   :  { %v4453_v11 = vld [vmem:[#allocation9 + $0x50] sm:$0xff]  ;;  %v4444_v12 = vld [vmem:[#allocation9 + $0x8] sm:$0xff]  ;;  %v4443_v14 = vld [vmem:[#allocation9] sm:$0xff] }
  0x11   :  { %4476 = vmatpush.bf16.msra.mxu2 %v4449_v2  ;;  %774 = vmatpush.bf16.msra.mxu0 %v4449_v2  ;;  %v4452_v13 = vld [vmem:[#allocation9 + $0x48] sm:$0xff]  ;;  %v4451_v15 = vld [vmem:[#allocation9 + $0x40] sm:$0xff]  ;;  %v4413_v17 = vld [vmem:[#allocation6 + $0x10c] sm:$0xf0] }
  0x12   :  { %4484 = vmatpush.bf16.msra.mxu3 %v4457_v3  ;;  %863 = vmatpush.bf16.msra.mxu1 %v4457_v3  ;;  %v4123_v16 = vld [vmem:[#allocation6 + $0x100] sm:$0xf]  ;;  %v4411_v18 = vld [vmem:[#allocation6 + $0x104] sm:$0xf]  ;;  %v4125_v19 = vld [vmem:[#allocation6 + $0x110] sm:$0xf0] }
  0x13   :  { %v4466_v20 = vld [vmem:[#allocation9 + $0xb8] sm:$0xff]  ;;  %v4124_v22 = vor.u32 %v4413_v17, %v4123_v16  ;;  %v4128_v23 = vor.u32 %v4411_v18, %v4125_v19  ;;  %v4465_v24 = vld [vmem:[#allocation9 + $0xb0] sm:$0xff]  ;;  %v4464_v26 = vld [vmem:[#allocation9 + $0xa8] sm:$0xff] }
  0x14   :  { %v4474_v21 = vld [vmem:[#allocation9 + $0xf8] sm:$0xff]  ;;  %v4473_v25 = vld [vmem:[#allocation9 + $0xf0] sm:$0xff]  ;;  %v4472_v27 = vld [vmem:[#allocation9 + $0xe8] sm:$0xff] }
  0x15   :  { %4477 = vmatpush.bf16.msra.mxu2 %v4448_v4  ;;  %775 = vmatpush.bf16.msra.mxu0 %v4448_v4  ;;  %v4139_v28 = vld [vmem:[#allocation6 + $0x120] sm:$0xf]  ;;  %v4417_v29 = vld [vmem:[#allocation6 + $0x12c] sm:$0xf0]  ;;  %v4415_v30 = vld [vmem:[#allocation6 + $0x124] sm:$0xf] }
  0x16   :  { %4485 = vmatpush.bf16.msra.mxu3 %v4456_v5  ;;  %864 = vmatpush.bf16.msra.mxu1 %v4456_v5  ;;  %v4141_v31 = vld [vmem:[#allocation6 + $0x130] sm:$0xf0]  ;;  %v4140_v32 = vor.u32 %v4417_v29, %v4139_v28  ;;  %v4463_v34 = vld [vmem:[#allocation9 + $0xa0] sm:$0xff]  ;;  %v4421_v37 = vld [vmem:[#allocation6 + $0x14c] sm:$0xf0] }
  0x17   :  { %v4144_v33 = vor.u32 %v4415_v30, %v4141_v31  ;;  %v4471_v35 = vld [vmem:[#allocation9 + $0xe0] sm:$0xff]  ;;  %v4157_v39 = vld [vmem:[#allocation6 + $0x150] sm:$0xf0]  ;;  %v4462_v42 = vld [vmem:[#allocation9 + $0x98] sm:$0xff] }
  0x18   :  { %v4155_v36 = vld [vmem:[#allocation6 + $0x140] sm:$0xf]  ;;  %v4419_v38 = vld [vmem:[#allocation6 + $0x144] sm:$0xf]  ;;  %v4470_v43 = vld [vmem:[#allocation9 + $0xd8] sm:$0xff] }
  0x19   :  { %4478 = vmatpush.bf16.msra.mxu2 %v4447_v6  ;;  %776 = vmatpush.bf16.msra.mxu0 %v4447_v6  ;;  %v4156_v40 = vor.u32 %v4421_v37, %v4155_v36  ;;  %v4160_v41 = vor.u32 %v4419_v38, %v4157_v39  ;;  %v4171_v44 = vld [vmem:[#allocation6 + $0x160] sm:$0xf]  ;;  %v4425_v45 = vld [vmem:[#allocation6 + $0x16c] sm:$0xf0]  ;;  %v4423_v46 = vld [vmem:[#allocation6 + $0x164] sm:$0xf] }
  0x1a   :  { %4486 = vmatpush.bf16.msra.mxu3 %v4455_v7  ;;  %865 = vmatpush.bf16.msra.mxu1 %v4455_v7  ;;  %v4173_v47 = vld [vmem:[#allocation6 + $0x170] sm:$0xf0]  ;;  %v4172_v48 = vor.u32 %v4425_v45, %v4171_v44  ;;  %v4187_v52 = vld [vmem:[#allocation6 + $0x180] sm:$0xf]  ;;  %v4429_v53 = vld [vmem:[#allocation6 + $0x18c] sm:$0xf0] }
  0x1b   :  { %v4176_v49 = vor.u32 %v4423_v46, %v4173_v47  ;;  %v4461_v50 = vld [vmem:[#allocation9 + $0x90] sm:$0xff]  ;;  %v4427_v54 = vld [vmem:[#allocation6 + $0x184] sm:$0xf]  ;;  %v4188_v56 = vor.u32 %v4429_v53, %v4187_v52  ;;  %v4460_v58 = vld [vmem:[#allocation9 + $0x88] sm:$0xff] }
  0x1c   :  { %v4469_v51 = vld [vmem:[#allocation9 + $0xd0] sm:$0xff]  ;;  %v4468_v59 = vld [vmem:[#allocation9 + $0xc8] sm:$0xff]  ;;  %v4203_v60 = vld [vmem:[#allocation6 + $0x1a0] sm:$0xf] }
  0x1d   :  { %4479 = vmatpush.bf16.msra.mxu2 %v4446_v8  ;;  %777 = vmatpush.bf16.msra.mxu0 %v4446_v8  ;;  %v4189_v55 = vld [vmem:[#allocation6 + $0x190] sm:$0xf0]  ;;  %v4433_v61 = vld [vmem:[#allocation6 + $0x1ac] sm:$0xf0]  ;;  %v4431_v62 = vld [vmem:[#allocation6 + $0x1a4] sm:$0xf] }
  0x1e   :  { %4487 = vmatpush.bf16.msra.mxu3 %v4454_v9  ;;  %866 = vmatpush.bf16.msra.mxu1 %v4454_v9  ;;  %v4192_v57 = vor.u32 %v4427_v54, %v4189_v55  ;;  %v4205_v63 = vld [vmem:[#allocation6 + $0x1b0] sm:$0xf0]  ;;  %v4204_v0 = vor.u32 %v4433_v61, %v4203_v60  ;;  %v4459_v2 = vld [vmem:[#allocation9 + $0x80] sm:$0xff]  ;;  %v4437_v5 = vld [vmem:[#allocation6 + $0x1cc] sm:$0xf0] }
  0x1f   :  { %v4208_v1 = vor.u32 %v4431_v62, %v4205_v63  ;;  %v4467_v3 = vld [vmem:[#allocation9 + $0xc0] sm:$0xff]  ;;  %v4221_v7 = vld [vmem:[#allocation6 + $0x1d0] sm:$0xf0]  ;;  %v4441_v17 = vld [vmem:[#allocation6 + $0x1ec] sm:$0xf0] }
  0x20   :  { %v4219_v4 = vld [vmem:[#allocation6 + $0x1c0] sm:$0xf]  ;;  %v4435_v6 = vld [vmem:[#allocation6 + $0x1c4] sm:$0xf]  ;;  %v4237_v19 = vld [vmem:[#allocation6 + $0x1f0] sm:$0xf0] }
  0x21   :  { %4480 = vmatpush.bf16.msra.mxu2 %v4445_v10  ;;  %778 = vmatpush.bf16.msra.mxu0 %v4445_v10  ;;  %v4220_v8 = vor.u32 %v4437_v5, %v4219_v4  ;;  %v4224_v9 = vor.u32 %v4435_v6, %v4221_v7  ;;  %v3995_v10 = vld [vmem:[#allocation6] sm:$0xf]  ;;  %v4439_v18 = vld [vmem:[#allocation6 + $0x1e4] sm:$0xf]  ;;  %v4003_v28 = vld [vmem:[#allocation6 + $0x8] sm:$0xf] }
  0x22   :  { %4488 = vmatpush.bf16.msra.mxu3 %v4453_v11  ;;  %867 = vmatpush.bf16.msra.mxu1 %v4453_v11  ;;  %v4381_v11 = vld [vmem:[#allocation6 + $0xc] sm:$0xf0]  ;;  %v4235_v16 = vld [vmem:[#allocation6 + $0x1e0] sm:$0xf]  ;;  %v4382_v29 = vld [vmem:[#allocation6 + $0x14] sm:$0xf0] }
  0x23   :  { %v4380_v30 = vld [vmem:[#allocation6 + $0xc] sm:$0xf]  ;;  %v4005_v31 = vld [vmem:[#allocation6 + $0x18] sm:$0xf0]  ;;  %v4387_v36 = vld [vmem:[#allocation6 + $0x44] sm:$0xf] }
  0x24   :  { %v4029_v38 = vld [vmem:[#allocation6 + $0x50] sm:$0xf0]  ;;  %v4386_v44 = vld [vmem:[#allocation6 + $0x34] sm:$0xf0]  ;;  %v4384_v45 = vld [vmem:[#allocation6 + $0x2c] sm:$0xf] }
  0x25   :  { %4481 = vmatpush.bf16.msra.mxu2 %v4444_v12  ;;  %779 = vmatpush.bf16.msra.mxu0 %v4444_v12  ;;  %v4379_v12 = vld [vmem:[#allocation6 + $0x4] sm:$0xf]  ;;  %v4021_v46 = vld [vmem:[#allocation6 + $0x38] sm:$0xf0]  ;;  %v4043_v52 = vld [vmem:[#allocation6 + $0x60] sm:$0xf] }
  0x26   :  { %4489 = vmatpush.bf16.msra.mxu3 %v4452_v13  ;;  %868 = vmatpush.bf16.msra.mxu1 %v4452_v13  ;;  %v3996_v13 = vor.u32 %v4381_v11, %v3995_v10  ;;  %v4393_v53 = vld [vmem:[#allocation6 + $0x6c] sm:$0xf0]  ;;  %v4391_v54 = vld [vmem:[#allocation6 + $0x64] sm:$0xf]  ;;  %v4035_v61 = vld [vmem:[#allocation6 + $0x48] sm:$0xf] }
  0x27   :  { %v4044_v55 = vor.u32 %v4393_v53, %v4043_v52  ;;  %v4390_v62 = vld [vmem:[#allocation6 + $0x54] sm:$0xf0]  ;;  %v4388_v63 = vld [vmem:[#allocation6 + $0x4c] sm:$0xf]  ;;  %v4059_v6 = vld [vmem:[#allocation6 + $0x80] sm:$0xf] }
  0x28   :  { %v4036_v4 = vor.u32 %v4390_v62, %v4035_v61  ;;  %v4397_v7 = vld [vmem:[#allocation6 + $0x8c] sm:$0xf0]  ;;  %v4061_v10 = vld [vmem:[#allocation6 + $0x90] sm:$0xf0]  ;;  %v4083_v53 = vld [vmem:[#allocation6 + $0xa8] sm:$0xf] }
  0x29   :  { %4482 = vmatpush.bf16.msra.mxu2 %v4443_v14  ;;  %780 = vmatpush.bf16.msra.mxu0 %v4443_v14  ;;  %v3997_v14 = vld [vmem:[#allocation6 + $0x10] sm:$0xf0] }
  0x2a   :  { %4490 = vmatpush.bf16.msra.mxu3 %v4451_v15  ;;  %869 = vmatpush.bf16.msra.mxu1 %v4451_v15  ;;  %v4000_v15 = vor.u32 %v4379_v12, %v3997_v14 }
  0x2c   :  { %821 = vmatmul.bf16.vlgmr.msra.gmra.mxu2 %v4124_v22  ;;  %781 = vmatmul.bf16.vlgmr.msra.gmra.mxu0 %v3996_v13  ;;  %v4011_v22 = vld [vmem:[#allocation6 + $0x20] sm:$0xf] }
  0x2d   :  { %951 = vmatpush.bf16.msrb.mxu2 %v4466_v20  ;;  %910 = vmatmul.bf16.vlgmr.msra.gmra.mxu3 %v4128_v23  ;;  %v4236_v20 = vor.u32 %v4441_v17, %v4235_v16  ;;  %v4385_v23 = vld [vmem:[#allocation6 + $0x2c] sm:$0xf0]  ;;  %v4394_v16 = vld [vmem:[#allocation6 + $0x74] sm:$0xf0]  ;;  %v4392_v17 = vld [vmem:[#allocation6 + $0x6c] sm:$0xf] }
  0x2e   :  { %1040 = vmatpush.bf16.msrb.mxu3 %v4474_v21  ;;  %870 = vmatmul.bf16.vlgmr.msra.gmra.mxu1 %v4000_v15  ;;  %v4240_v21 = vor.u32 %v4439_v18, %v4237_v19  ;;  %v4051_v15 = vld [vmem:[#allocation6 + $0x68] sm:$0xf]  ;;  %v4053_v18 = vld [vmem:[#allocation6 + $0x78] sm:$0xf0] }
  0x31   :  { %952 = vmatpush.bf16.msrb.mxu2 %v4465_v24  ;;  %v4383_v24 = vld [vmem:[#allocation6 + $0x24] sm:$0xf] }
  0x32   :  { %1041 = vmatpush.bf16.msrb.mxu3 %v4473_v25  ;;  %v4012_v25 = vor.u32 %v4385_v23, %v4011_v22  ;;  %v4052_v22 = vor.u32 %v4394_v16, %v4051_v15  ;;  %v4056_v23 = vor.u32 %v4392_v17, %v4053_v18 }
  0x35   :  { %953 = vmatpush.bf16.msrb.mxu2 %v4464_v26  ;;  %v4013_v26 = vld [vmem:[#allocation6 + $0x30] sm:$0xf0] }
  0x36   :  { %1042 = vmatpush.bf16.msrb.mxu3 %v4472_v27  ;;  %v4016_v27 = vor.u32 %v4383_v24, %v4013_v26  ;;  %v4075_v24 = vld [vmem:[#allocation6 + $0xa0] sm:$0xf]  ;;  %v4399_v26 = vld [vmem:[#allocation6 + $0xa4] sm:$0xf] }
  0x39   :  { %954 = vmatpush.bf16.msrb.mxu2 %v4463_v34  ;;  %v4027_v34 = vld [vmem:[#allocation6 + $0x40] sm:$0xf] }
  0x3a   :  { %1043 = vmatpush.bf16.msrb.mxu3 %v4471_v35  ;;  %v4389_v35 = vld [vmem:[#allocation6 + $0x4c] sm:$0xf0] }
  0x3b   :  { %v4028_v37 = vor.u32 %v4389_v35, %v4027_v34  ;;  %v4398_v34 = vld [vmem:[#allocation6 + $0x94] sm:$0xf0]  ;;  %v4396_v35 = vld [vmem:[#allocation6 + $0x8c] sm:$0xf] }
  0x3c   :  { %826 = vmatmul.bf16.gmra.mxu2 %v4140_v32  ;;  %786 = vmatmul.bf16.gmra.mxu0 %v4012_v25  ;;  %v4004_v32 = vor.u32 %v4382_v29, %v4003_v28  ;;  %v4401_v25 = vld [vmem:[#allocation6 + $0xac] sm:$0xf0]  ;;  %v4077_v28 = vld [vmem:[#allocation6 + $0xb0] sm:$0xf0] }
  0x3d   :  { %915 = vmatmul.bf16.gmra.mxu3 %v4144_v33  ;;  %955 = vmatpush.bf16.msrb.mxu2 %v4462_v42  ;;  %v4008_v33 = vor.u32 %v4380_v30, %v4005_v31  ;;  %v4080_v31 = vor.u32 %v4399_v26, %v4077_v28  ;;  %v4115_v26 = vld [vmem:[#allocation6 + $0xe8] sm:$0xf]  ;;  %v4408_v28 = vld [vmem:[#allocation6 + $0xec] sm:$0xf] }
  0x3e   :  { %1044 = vmatpush.bf16.msrb.mxu3 %v4470_v43  ;;  %875 = vmatmul.bf16.gmra.mxu1 %v4016_v27  ;;  %v4019_v43 = vld [vmem:[#allocation6 + $0x28] sm:$0xf]  ;;  %v4076_v27 = vor.u32 %v4401_v25, %v4075_v24 }
  0x41   :  { %956 = vmatpush.bf16.msrb.mxu2 %v4461_v50  ;;  %v4020_v50 = vor.u32 %v4386_v44, %v4019_v43  ;;  %v4091_v43 = vld [vmem:[#allocation6 + $0xc0] sm:$0xf]  ;;  %v4405_v44 = vld [vmem:[#allocation6 + $0xcc] sm:$0xf0] }
  0x42   :  { %1045 = vmatpush.bf16.msrb.mxu3 %v4469_v51  ;;  %v4024_v51 = vor.u32 %v4384_v45, %v4021_v46  ;;  %v4403_v45 = vld [vmem:[#allocation6 + $0xc4] sm:$0xf]  ;;  %v4092_v46 = vor.u32 %v4405_v44, %v4091_v43 }
  0x45   :  { %957 = vmatpush.bf16.msrb.mxu2 %v4460_v58 }
  0x46   :  { %1046 = vmatpush.bf16.msrb.mxu3 %v4468_v59 }
  0x49   :  { %958 = vmatpush.bf16.msrb.mxu2 %v4459_v2 }
  0x4a   :  { %1047 = vmatpush.bf16.msrb.mxu3 %v4467_v3 }
  0x4c   :  { %831 = vmatmul.bf16.gmra.mxu2 %v4156_v40  ;;  %791 = vmatmul.bf16.gmra.mxu0 %v4028_v37 }
  0x4d   :  { %920 = vmatmul.bf16.gmra.mxu3 %v4160_v41  ;;  %v4032_v41 = vor.u32 %v4387_v36, %v4029_v38  ;;  %v4069_v36 = vld [vmem:[#allocation6 + $0x98] sm:$0xf0] }
  0x4f   :  { %880 = vmatmul.bf16.gmra.mxu1 %v4032_v41  ;;  %v4072_v41 = vor.u32 %v4396_v35, %v4069_v36 }
  0x5c   :  { %836 = vmatmul.bf16.gmra.mxu2 %v4172_v48  ;;  %796 = vmatmul.bf16.gmra.mxu0 %v4044_v55  ;;  %v4400_v55 = vld [vmem:[#allocation6 + $0xac] sm:$0xf] }
  0x5d   :  { %925 = vmatmul.bf16.gmra.mxu3 %v4176_v49 }
  0x6c   :  { %841 = vmatmul.bf16.gmra.mxu2 %v4188_v56  ;;  %v4045_v56 = vld [vmem:[#allocation6 + $0x70] sm:$0xf0] }
  0x6d   :  { %930 = vmatmul.bf16.gmra.mxu3 %v4192_v57  ;;  %v4048_v59 = vor.u32 %v4391_v54, %v4045_v56  ;;  %v4402_v54 = vld [vmem:[#allocation6 + $0xb4] sm:$0xf0]  ;;  %v4085_v56 = vld [vmem:[#allocation6 + $0xb8] sm:$0xf0] }
  0x6e   :  { %v4084_v61 = vor.u32 %v4402_v54, %v4083_v53  ;;  %v4088_v62 = vor.u32 %v4400_v55, %v4085_v56 }
  0x6f   :  { %885 = vmatmul.bf16.gmra.mxu1 %v4048_v59 }
  0x7c   :  { %846 = vmatmul.bf16.gmra.mxu2 %v4204_v0  ;;  %v4037_v0 = vld [vmem:[#allocation6 + $0x58] sm:$0xf0] }
  0x7d   :  { %935 = vmatmul.bf16.gmra.mxu3 %v4208_v1  ;;  %v4040_v5 = vor.u32 %v4388_v63, %v4037_v0  ;;  %v4107_v63 = vld [vmem:[#allocation6 + $0xe0] sm:$0xf]  ;;  %v4409_v0 = vld [vmem:[#allocation6 + $0xec] sm:$0xf0] }
  0x8c   :  { %851 = vmatmul.bf16.gmra.mxu2 %v4220_v8  ;;  %v4395_v8 = vld [vmem:[#allocation6 + $0x84] sm:$0xf] }
  0x8d   :  { %940 = vmatmul.bf16.gmra.mxu3 %v4224_v9  ;;  %v4060_v9 = vor.u32 %v4397_v7, %v4059_v6  ;;  %v4064_v13 = vor.u32 %v4395_v8, %v4061_v10  ;;  %v4406_v10 = vld [vmem:[#allocation6 + $0xd4] sm:$0xf0] }
  0x8f   :  { %801 = vmatmul.bf16.gmra.mxu0 %v4060_v9  ;;  %890 = vmatmul.bf16.gmra.mxu1 %v4064_v13  ;;  %v4099_v9 = vld [vmem:[#allocation6 + $0xc8] sm:$0xf] }
  0x90   :  { %v4100_v17 = vor.u32 %v4406_v10, %v4099_v9  ;;  %v4418_v9 = vld [vmem:[#allocation6 + $0x134] sm:$0xf0]  ;;  %v4416_v10 = vld [vmem:[#allocation6 + $0x12c] sm:$0xf] }
  0x9c   :  { %856 = vmatmul.bf16.gmra.mxu2 %v4236_v20 }
  0x9d   :  { %945 = vmatmul.bf16.gmra.mxu3 %v4240_v21 }
  0x9f   :  { %806 = vmatmul.bf16.gmra.mxu0 %v4076_v27  ;;  %895 = vmatmul.bf16.gmra.mxu1 %v4080_v31  ;;  %v4410_v27 = vld [vmem:[#allocation6 + $0xf4] sm:$0xf0] }
  0xac   :  { %959 = vmatmul.bf16.vlgmr.msrb.gmra.mxu2 %v4004_v32 }
  0xad   :  { %1048 = vmatmul.bf16.vlgmr.msrb.gmra.mxu3 %v4008_v33  ;;  %v4067_v33 = vld [vmem:[#allocation6 + $0x88] sm:$0xf] }
  0xaf   :  { %v822_v39 = vpop.f32.mrf.mxu2  ;;  %811 = vmatmul.bf16.gmra.mxu0 %v4092_v46 }
  0xb0   :  { %v911_v40 = vpop.f32.mrf.mxu3 }
  0xb1   :  { %v5154_v42 = vadd.f32 %v911_v40, %v822_v39  ;;  %v4068_v40 = vor.u32 %v4398_v34, %v4067_v33 }
  0xb7   :  { %v824_v47 = vpop.f32.mrf.mxu2 }
  0xb8   :  { %v913_v48 = vpop.f32.mrf.mxu3 }
  0xb9   :  { %v5156_v49 = vadd.f32 %v913_v48, %v824_v47  ;;  %v4093_v47 = vld [vmem:[#allocation6 + $0xd0] sm:$0xf0] }
  0xbc   :  { %964 = vmatmul.bf16.gmra.mxu2 %v4020_v50 }
  0xbd   :  { %1053 = vmatmul.bf16.gmra.mxu3 %v4024_v51  ;;  %v4096_v51 = vor.u32 %v4403_v45, %v4093_v47  ;;  %v4131_v47 = vld [vmem:[#allocation6 + $0x108] sm:$0xf] }
  0xbf   :  { %v827_v57 = vpop.f32.mrf.mxu2  ;;  %900 = vmatmul.bf16.gmra.mxu1 %v4096_v51  ;;  %v4133_v51 = vld [vmem:[#allocation6 + $0x118] sm:$0xf0] }
  0xc0   :  { %v916_v58 = vpop.f32.mrf.mxu3 }
  0xc1   :  { %v5158_v60 = vadd.f32 %v916_v58, %v827_v57 }
  0xc7   :  { %v829_v1 = vpop.f32.mrf.mxu2 }
  0xc8   :  { %v918_v2 = vpop.f32.mrf.mxu3 }
  0xc9   :  { %v5160_v3 = vadd.f32 %v918_v2, %v829_v1  ;;  %v4407_v1 = vld [vmem:[#allocation6 + $0xe4] sm:$0xf]  ;;  %v4108_v2 = vor.u32 %v4409_v0, %v4107_v63 }
  0xcb   :  { %816 = vmatmul.bf16.gmra.mxu0 %v4108_v2 }
  0xcc   :  { %969 = vmatmul.bf16.gmra.mxu2 %v4036_v4  ;;  %v4109_v4 = vld [vmem:[#allocation6 + $0xf0] sm:$0xf0] }
  0xcd   :  { %1058 = vmatmul.bf16.gmra.mxu3 %v4040_v5  ;;  %v4112_v7 = vor.u32 %v4407_v1, %v4109_v4 }
  0xcf   :  { %v832_v11 = vpop.f32.mrf.mxu2  ;;  %905 = vmatmul.bf16.gmra.mxu1 %v4112_v7  ;;  %v4147_v7 = vld [vmem:[#allocation6 + $0x128] sm:$0xf] }
  0xd0   :  { %v921_v12 = vpop.f32.mrf.mxu3 }
  0xd1   :  { %v5162_v14 = vadd.f32 %v921_v12, %v832_v11  ;;  %v4404_v11 = vld [vmem:[#allocation6 + $0xcc] sm:$0xf]  ;;  %v4101_v12 = vld [vmem:[#allocation6 + $0xd8] sm:$0xf0] }
  0xd2   :  { %v4104_v18 = vor.u32 %v4404_v11, %v4101_v12  ;;  %v4149_v11 = vld [vmem:[#allocation6 + $0x138] sm:$0xf0] }
  0xd7   :  { %v834_v19 = vpop.f32.mrf.mxu2 }
  0xd8   :  { %v923_v20 = vpop.f32.mrf.mxu3 }
  0xd9   :  { %v5164_v21 = vadd.f32 %v923_v20, %v834_v19  ;;  %v782_v19 = vpop.f32.mrf.mxu0  ;;  %v871_v20 = vpop.f32.mrf.mxu1 }
  0xda   :  { %v872_v24 = vadd.f32 %v871_v20, %v782_v19  ;;  %v4148_v20 = vor.u32 %v4418_v9, %v4147_v7 }
  0xdc   :  { %974 = vmatmul.bf16.gmra.mxu2 %v4052_v22 }
  0xdd   :  { %1063 = vmatmul.bf16.gmra.mxu3 %v4056_v23 }
  0xdf   :  { %v837_v29 = vpop.f32.mrf.mxu2 }
  0xe0   :  { %v926_v30 = vpop.f32.mrf.mxu3 }
  0xe1   :  { %v5166_v32 = vadd.f32 %v926_v30, %v837_v29  ;;  %v4117_v29 = vld [vmem:[#allocation6 + $0xf8] sm:$0xf0]  ;;  %v784_v30 = vpop.f32.mrf.mxu0  ;;  %v873_v31 = vpop.f32.mrf.mxu1 }
  0xe2   :  { %v874_v35 = vadd.f32 %v873_v31, %v784_v30 }
  0xe7   :  { %v839_v37 = vpop.f32.mrf.mxu2 }
  0xe8   :  { %v928_v38 = vpop.f32.mrf.mxu3 }
  0xe9   :  { %v5168_v39 = vadd.f32 %v928_v38, %v839_v37  ;;  %v4116_v37 = vor.u32 %v4410_v27, %v4115_v26  ;;  %v4120_v38 = vor.u32 %v4408_v28, %v4117_v29 }
  0xec   :  { %979 = vmatmul.bf16.gmra.mxu2 %v4068_v40  ;;  %v787_v40 = vpop.f32.mrf.mxu0 }
  0xed   :  { %1068 = vmatmul.bf16.gmra.mxu3 %v4072_v41  ;;  %v876_v41 = vpop.f32.mrf.mxu1 }
  0xee   :  { %v877_v45 = vadd.f32 %v876_v41, %v787_v40 }
  0xef   :  { %v842_v48 = vpop.f32.mrf.mxu2 }
  0xf0   :  { %v931_v50 = vpop.f32.mrf.mxu3 }
  0xf1   :  { %v5170_v52 = vadd.f32 %v931_v50, %v842_v48  ;;  %v4414_v48 = vld [vmem:[#allocation6 + $0x114] sm:$0xf0]  ;;  %v4412_v50 = vld [vmem:[#allocation6 + $0x10c] sm:$0xf] }
  0xf4   :  { %v789_v53 = vpop.f32.mrf.mxu0 }
  0xf5   :  { %v878_v54 = vpop.f32.mrf.mxu1 }
  0xf7   :  { %v844_v57 = vpop.f32.mrf.mxu2 }
  0xf8   :  { %v933_v58 = vpop.f32.mrf.mxu3 }
  0xf9   :  { %v5172_v59 = vadd.f32 %v933_v58, %v844_v57  ;;  %v879_v57 = vadd.f32 %v878_v54, %v789_v53 }
  0xfc   :  { %984 = vmatmul.bf16.gmra.mxu2 %v4084_v61  ;;  %v4132_v61 = vor.u32 %v4414_v48, %v4131_v47  ;;  %v792_v63 = vpop.f32.mrf.mxu0 }
  0xfd   :  { %1073 = vmatmul.bf16.gmra.mxu3 %v4088_v62  ;;  %v4136_v62 = vor.u32 %v4412_v50, %v4133_v51  ;;  %v881_v0 = vpop.f32.mrf.mxu1 }
  0xfe   :  { %v882_v4 = vadd.f32 %v881_v0, %v792_v63  ;;  %v4181_v63 = vld [vmem:[#allocation6 + $0x178] sm:$0xf0] }
  0xff   :  { %v847_v5 = vpop.f32.mrf.mxu2 }
 0x100   :  { %v936_v6 = vpop.f32.mrf.mxu3 }
 0x101   :  { %v5174_v8 = vadd.f32 %v936_v6, %v847_v5 }
 0x104   :  { %v794_v12 = vpop.f32.mrf.mxu0 }
 0x107   :  { %v849_v13 = vpop.f32.mrf.mxu2 }
 0x108   :  { %v938_v15 = vpop.f32.mrf.mxu3 }
 0x109   :  { %v5176_v16 = vadd.f32 %v938_v15, %v849_v13  ;;  %v883_v13 = vpop.f32.mrf.mxu1 }
 0x10c   :  { %989 = vmatmul.bf16.gmra.mxu2 %v4100_v17  ;;  %v797_v26 = vpop.f32.mrf.mxu0 }
 0x10d   :  { %1078 = vmatmul.bf16.gmra.mxu3 %v4104_v18  ;;  %v884_v18 = vadd.f32 %v883_v13, %v794_v12 }
 0x10f   :  { %v852_v22 = vpop.f32.mrf.mxu2 }
 0x110   :  { %v941_v23 = vpop.f32.mrf.mxu3 }
 0x111   :  { %v5178_v25 = vadd.f32 %v941_v23, %v852_v22  ;;  %v4152_v22 = vor.u32 %v4416_v10, %v4149_v11 }
 0x114   :  { %v799_v40 = vpop.f32.mrf.mxu0 }
 0x117   :  { %v854_v33 = vpop.f32.mrf.mxu2 }
 0x118   :  { %v943_v34 = vpop.f32.mrf.mxu3 }
 0x119   :  { %v5180_v36 = vadd.f32 %v943_v34, %v854_v33  ;;  %v4163_v33 = vld [vmem:[#allocation6 + $0x148] sm:$0xf]  ;;  %v4422_v34 = vld [vmem:[#allocation6 + $0x154] sm:$0xf0] }
 0x11a   :  { %v4164_v48 = vor.u32 %v4422_v34, %v4163_v33 }
 0x11c   :  { %994 = vmatmul.bf16.gmra.mxu2 %v4116_v37  ;;  %v4420_v37 = vld [vmem:[#allocation6 + $0x14c] sm:$0xf]  ;;  %v802_v9 = vpop.f32.mrf.mxu0 }
 0x11d   :  { %1083 = vmatmul.bf16.gmra.mxu3 %v4120_v38  ;;  %v4165_v38 = vld [vmem:[#allocation6 + $0x158] sm:$0xf0] }
 0x11e   :  { %v4168_v50 = vor.u32 %v4420_v37, %v4165_v38 }
 0x11f   :  { %v857_v43 = vpop.f32.mrf.mxu2 }
 0x120   :  { %v946_v44 = vpop.f32.mrf.mxu3 }
 0x121   :  { %v5182_v46 = vadd.f32 %v946_v44, %v857_v43 }
 0x127   :  { %v859_v55 = vpop.f32.mrf.mxu2 }
 0x128   :  { %v948_v56 = vpop.f32.mrf.mxu3 }
 0x129   :  { %v5184_v58 = vadd.f32 %v948_v56, %v859_v55  ;;  %v4179_v56 = vld [vmem:[#allocation6 + $0x168] sm:$0xf] }
 0x12c   :  { %999 = vmatmul.bf16.gmra.mxu2 %v4132_v61  ;;  %v4426_v61 = vld [vmem:[#allocation6 + $0x174] sm:$0xf0] }
 0x12d   :  { %1088 = vmatmul.bf16.gmra.mxu3 %v4136_v62  ;;  %v4424_v62 = vld [vmem:[#allocation6 + $0x16c] sm:$0xf] }
 0x12f   :  { %v960_v1 = vpop.f32.mrf.mxu2 }
 0x130   :  { %v1049_v2 = vpop.f32.mrf.mxu3  ;;  %v961_v5 = vadd.f32 %v960_v1, %v872_v24  ;;  %v886_v24 = vpop.f32.mrf.mxu1 }
 0x131   :  { %v887_v29 = vadd.f32 %v886_v24, %v797_v26  ;;  %v4197_v26 = vld [vmem:[#allocation6 + $0x198] sm:$0xf0] }
 0x132   :  { %v5186_v6 = vadd.f32 %v1049_v2, %v961_v5  ;;  %v4180_v5 = vor.u32 %v4426_v61, %v4179_v56 }
 0x137   :  { %v962_v15 = vpop.f32.mrf.mxu2 }
 0x138   :  { %v1051_v17 = vpop.f32.mrf.mxu3  ;;  %v963_v19 = vadd.f32 %v962_v15, %v874_v35  ;;  %v888_v35 = vpop.f32.mrf.mxu1  ;;  %v4195_v15 = vld [vmem:[#allocation6 + $0x188] sm:$0xf] }
 0x139   :  { %v889_v44 = vadd.f32 %v888_v35, %v799_v40 }
 0x13a   :  { %v5188_v23 = vadd.f32 %v1051_v17, %v963_v19  ;;  %v804_v17 = vpop.f32.mrf.mxu0 }
 0x13c   :  { %1004 = vmatmul.bf16.gmra.mxu2 %v4148_v20  ;;  %v4430_v20 = vld [vmem:[#allocation6 + $0x194] sm:$0xf0] }
 0x13d   :  { %1093 = vmatmul.bf16.gmra.mxu3 %v4152_v22  ;;  %v4428_v22 = vld [vmem:[#allocation6 + $0x18c] sm:$0xf] }
 0x13f   :  { %v965_v27 = vpop.f32.mrf.mxu2 }
 0x140   :  { %v1054_v28 = vpop.f32.mrf.mxu3  ;;  %v966_v30 = vadd.f32 %v965_v27, %v877_v45  ;;  %v891_v10 = vpop.f32.mrf.mxu1 }
 0x141   :  { %v892_v34 = vadd.f32 %v891_v10, %v802_v9 }
 0x142   :  { %v5190_v31 = vadd.f32 %v1054_v28, %v966_v30  ;;  %v4196_v28 = vor.u32 %v4430_v20, %v4195_v15  ;;  %v4200_v30 = vor.u32 %v4428_v22, %v4197_v26  ;;  %v807_v37 = vpop.f32.mrf.mxu0  ;;  %v4438_v15 = vld [vmem:[#allocation6 + $0x1d4] sm:$0xf0] }
 0x147   :  { %v967_v41 = vpop.f32.mrf.mxu2 }
 0x148   :  { %v1056_v43 = vpop.f32.mrf.mxu3  ;;  %v968_v47 = vadd.f32 %v967_v41, %v879_v57  ;;  %v4184_v57 = vor.u32 %v4424_v62, %v4181_v63  ;;  %v893_v19 = vpop.f32.mrf.mxu1 }
 0x14a   :  { %v5192_v51 = vadd.f32 %v1056_v43, %v968_v47  ;;  %v894_v43 = vadd.f32 %v893_v19, %v804_v17  ;;  %v4211_v47 = vld [vmem:[#allocation6 + $0x1a8] sm:$0xf]  ;;  %v809_v62 = vpop.f32.mrf.mxu0  ;;  %v4436_v17 = vld [vmem:[#allocation6 + $0x1cc] sm:$0xf]  ;;  %v4229_v19 = vld [vmem:[#allocation6 + $0x1d8] sm:$0xf0] }
 0x14c   :  { %1009 = vmatmul.bf16.gmra.mxu2 %v4164_v48  ;;  %v4434_v48 = vld [vmem:[#allocation6 + $0x1b4] sm:$0xf0] }
 0x14d   :  { %1098 = vmatmul.bf16.gmra.mxu3 %v4168_v50  ;;  %v4432_v50 = vld [vmem:[#allocation6 + $0x1ac] sm:$0xf]  ;;  %v4212_v56 = vor.u32 %v4434_v48, %v4211_v47  ;;  %v4442_v47 = vld [vmem:[#allocation6 + $0x1f4] sm:$0xf0] }
 0x14e   :  { %v4440_v48 = vld [vmem:[#allocation6 + $0x1ec] sm:$0xf] }
 0x14f   :  { %v970_v53 = vpop.f32.mrf.mxu2 }
 0x150   :  { %v1059_v45 = vpop.f32.mrf.mxu3  ;;  %v971_v54 = vadd.f32 %v970_v53, %v882_v4  ;;  %v4213_v53 = vld [vmem:[#allocation6 + $0x1b8] sm:$0xf0] }
 0x151   :  { %v4216_v61 = vor.u32 %v4432_v50, %v4213_v53  ;;  %v4245_v50 = vld [vmem:[#allocation6 + $0x1f8] sm:$0xf0] }
 0x152   :  { %v5194_v55 = vadd.f32 %v1059_v45, %v971_v54  ;;  %v812_v10 = vpop.f32.mrf.mxu0 }
 0x157   :  { %v972_v0 = vpop.f32.mrf.mxu2 }
 0x158   :  { %v1061_v1 = vpop.f32.mrf.mxu3  ;;  %v973_v2 = vadd.f32 %v972_v0, %v884_v18 }
 0x15a   :  { %v5196_v7 = vadd.f32 %v1061_v1, %v973_v2 }
 0x15c   :  { %1014 = vmatmul.bf16.gmra.mxu2 %v4180_v5 }
 0x15d   :  { %1103 = vmatmul.bf16.gmra.mxu3 %v4184_v57 }
 0x15f   :  { %v975_v11 = vpop.f32.mrf.mxu2 }
 0x160   :  { %v1064_v12 = vpop.f32.mrf.mxu3  ;;  %v976_v4 = vadd.f32 %v975_v11, %v887_v29  ;;  %v896_v29 = vpop.f32.mrf.mxu1 }
 0x161   :  { %v897_v1 = vadd.f32 %v896_v29, %v807_v37 }
 0x162   :  { %v5198_v13 = vadd.f32 %v1064_v12, %v976_v4  ;;  %v4227_v4 = vld [vmem:[#allocation6 + $0x1c8] sm:$0xf] }
 0x167   :  { %v977_v18 = vpop.f32.mrf.mxu2 }
 0x168   :  { %v1066_v24 = vpop.f32.mrf.mxu3  ;;  %v978_v27 = vadd.f32 %v977_v18, %v889_v44  ;;  %v898_v63 = vpop.f32.mrf.mxu1  ;;  %v4228_v18 = vor.u32 %v4438_v15, %v4227_v4 }
 0x169   :  { %v899_v12 = vadd.f32 %v898_v63, %v809_v62  ;;  %v4248_v62 = vor.u32 %v4440_v48, %v4245_v50 }
 0x16a   :  { %v5200_v33 = vadd.f32 %v1066_v24, %v978_v27  ;;  %v4232_v24 = vor.u32 %v4436_v17, %v4229_v19 }
 0x16c   :  { %1019 = vmatmul.bf16.gmra.mxu2 %v4196_v28 }
 0x16d   :  { %1108 = vmatmul.bf16.gmra.mxu3 %v4200_v30  ;;  %v814_v30 = vpop.f32.mrf.mxu0 }
 0x16f   :  { %v980_v38 = vpop.f32.mrf.mxu2 }
 0x170   :  { %v1069_v40 = vpop.f32.mrf.mxu3  ;;  %v981_v35 = vadd.f32 %v980_v38, %v892_v34  ;;  %v901_v11 = vpop.f32.mrf.mxu1 }
 0x171   :  { %v902_v28 = vadd.f32 %v901_v11, %v812_v10 }
 0x172   :  { %v5202_v41 = vadd.f32 %v1069_v40, %v981_v35 }
 0x175   :  { %v817_v53 = vpop.f32.mrf.mxu0 }
 0x177   :  { %v982_v44 = vpop.f32.mrf.mxu2 }
 0x178   :  { %v1071_v45 = vpop.f32.mrf.mxu3  ;;  %v983_v54 = vadd.f32 %v982_v44, %v894_v43  ;;  %v903_v34 = vpop.f32.mrf.mxu1  ;;  %v4243_v43 = vld [vmem:[#allocation6 + $0x1e8] sm:$0xf] }
 0x179   :  { %v904_v35 = vadd.f32 %v903_v34, %v814_v30 }
 0x17a   :  { %v5204_v0 = vadd.f32 %v1071_v45, %v983_v54 }
 0x17c   :  { %1024 = vmatmul.bf16.gmra.mxu2 %v4212_v56 }
 0x17d   :  { %1113 = vmatmul.bf16.gmra.mxu3 %v4216_v61  ;;  %v4244_v61 = vor.u32 %v4442_v47, %v4243_v43  ;;  %v819_v10 = vpop.f32.mrf.mxu0 }
 0x17f   :  { %v985_v2 = vpop.f32.mrf.mxu2 }
 0x180   :  { %v1074_v5 = vpop.f32.mrf.mxu3  ;;  %v986_v57 = vadd.f32 %v985_v2, %v897_v1  ;;  %v906_v44 = vpop.f32.mrf.mxu1 }
 0x181   :  { %v907_v1 = vadd.f32 %v906_v44, %v817_v53 }
 0x182   :  { %v5206_v9 = vadd.f32 %v1074_v5, %v986_v57 }
 0x187   :  { %v987_v20 = vpop.f32.mrf.mxu2 }
 0x188   :  { %v1076_v22 = vpop.f32.mrf.mxu3  ;;  %v988_v26 = vadd.f32 %v987_v20, %v899_v12  ;;  %v908_v11 = vpop.f32.mrf.mxu1 }
 0x189   :  { %v909_v4 = vadd.f32 %v908_v11, %v819_v10 }
 0x18a   :  { %v5208_v27 = vadd.f32 %v1076_v22, %v988_v26 }
 0x18c   :  { %1029 = vmatmul.bf16.gmra.mxu2 %v4228_v18 }
 0x18d   :  { %1118 = vmatmul.bf16.gmra.mxu3 %v4232_v24 }
 0x18f   :  { %v990_v37 = vpop.f32.mrf.mxu2 }
 0x190   :  { %v1079_v29 = vpop.f32.mrf.mxu3  ;;  %v991_v38 = vadd.f32 %v990_v37, %v902_v28 }
 0x192   :  { %v5210_v40 = vadd.f32 %v1079_v29, %v991_v38 }
 0x197   :  { %v992_v45 = vpop.f32.mrf.mxu2 }
 0x198   :  { %v1081_v54 = vpop.f32.mrf.mxu3  ;;  %v993_v56 = vadd.f32 %v992_v45, %v904_v35 }
 0x19a   :  { %v5212_v63 = vadd.f32 %v1081_v54, %v993_v56 }
 0x19c   :  { %1034 = vmatmul.bf16.gmra.mxu2 %v4244_v61 }
 0x19d   :  { %1123 = vmatmul.bf16.gmra.mxu3 %v4248_v62 }
 0x19f   :  { %v995_v2 = vpop.f32.mrf.mxu2 }
 0x1a0   :  { %v1084_v5 = vpop.f32.mrf.mxu3  ;;  %v996_v57 = vadd.f32 %v995_v2, %v907_v1 }
 0x1a2   :  { %v5214_v12 = vadd.f32 %v1084_v5, %v996_v57 }
 0x1a7   :  { %v997_v15 = vpop.f32.mrf.mxu2 }
 0x1a8   :  { %v1086_v17 = vpop.f32.mrf.mxu3  ;;  %v998_v19 = vadd.f32 %v997_v15, %v909_v4 }
 0x1aa   :  { %v5219_v20 = vadd.f32 %v1086_v17, %v998_v19 }
 0x1af   :  { %v1000_v22 = vpop.f32.mrf.mxu2 }
 0x1b0   :  { %v1089_v26 = vpop.f32.mrf.mxu3  ;;  %v1001_v18 = vadd.f32 %v1000_v22, %v5154_v42 }
 0x1b2   :  { %v5222_v24 = vadd.f32 %v1089_v26, %v1001_v18 }
 0x1b7   :  { %v1002_v28 = vpop.f32.mrf.mxu2 }
 0x1b8   :  { %v1091_v30 = vpop.f32.mrf.mxu3  ;;  %v1003_v34 = vadd.f32 %v1002_v28, %v5156_v49 }
 0x1ba   :  { %v5225_v37 = vadd.f32 %v1091_v30, %v1003_v34 }
 0x1bf   :  { %v1005_v29 = vpop.f32.mrf.mxu2 }
 0x1c0   :  { %v1094_v38 = vpop.f32.mrf.mxu3  ;;  %v1006_v35 = vadd.f32 %v1005_v29, %v5158_v60 }
 0x1c2   :  { %v5228_v43 = vadd.f32 %v1094_v38, %v1006_v35 }
 0x1c7   :  { %v1007_v47 = vpop.f32.mrf.mxu2 }
 0x1c8   :  { %v1096_v48 = vpop.f32.mrf.mxu3  ;;  %v1008_v50 = vadd.f32 %v1007_v47, %v5160_v3 }
 0x1ca   :  { %v5231_v53 = vadd.f32 %v1096_v48, %v1008_v50 }
 0x1cf   :  { %v1010_v42 = vpop.f32.mrf.mxu2 }
 0x1d0   :  { %v1099_v44 = vpop.f32.mrf.mxu3  ;;  %v1011_v45 = vadd.f32 %v1010_v42, %v5162_v14 }
 0x1d2   :  { %v5234_v54 = vadd.f32 %v1099_v44, %v1011_v45 }
 0x1d7   :  { %v1012_v49 = vpop.f32.mrf.mxu2 }
 0x1d8   :  { %v1101_v56 = vpop.f32.mrf.mxu3  ;;  %v1013_v61 = vadd.f32 %v1012_v49, %v5164_v21 }
 0x1da   :  { %v5237_v62 = vadd.f32 %v1101_v56, %v1013_v61 }
 0x1df   :  { %v1015_v60 = vpop.f32.mrf.mxu2 }
 0x1e0   :  { %v1104_v1 = vpop.f32.mrf.mxu3  ;;  %v1016_v2 = vadd.f32 %v1015_v60, %v5166_v32 }
 0x1e2   :  { %v5240_v5 = vadd.f32 %v1104_v1, %v1016_v2 }
 0x1e7   :  { %v1017_v3 = vpop.f32.mrf.mxu2 }
 0x1e8   :  { %v1106_v57 = vpop.f32.mrf.mxu3  ;;  %v1018_v10 = vadd.f32 %v1017_v3, %v5168_v39 }
 0x1ea   :  { %v5243_v11 = vadd.f32 %v1106_v57, %v1018_v10 }
 0x1ef   :  { %v1020_v14 = vpop.f32.mrf.mxu2 }
 0x1f0   :  { %v1109_v4 = vpop.f32.mrf.mxu3  ;;  %v1021_v15 = vadd.f32 %v1020_v14, %v5170_v52 }
 0x1f2   :  { %v5246_v17 = vadd.f32 %v1109_v4, %v1021_v15 }
 0x1f7   :  { %v1022_v21 = vpop.f32.mrf.mxu2 }
 0x1f8   :  { %v1111_v19 = vpop.f32.mrf.mxu3  ;;  %v1023_v22 = vadd.f32 %v1022_v21, %v5172_v59 }
 0x1fa   :  { %v5249_v26 = vadd.f32 %v1111_v19, %v1023_v22 }
 0x1ff   :  { %v1025_v32 = vpop.f32.mrf.mxu2 }
 0x200   :  { %v1114_v18 = vpop.f32.mrf.mxu3  ;;  %v1026_v28 = vadd.f32 %v1025_v32, %v5174_v8 }
 0x202   :  { %v1115_v30 = vadd.f32 %v1114_v18, %v1026_v28 }
 0x207   :  { %v1027_v39 = vpop.f32.mrf.mxu2 }
 0x208   :  { %v1116_v34 = vpop.f32.mrf.mxu3  ;;  %v1028_v29 = vadd.f32 %v1027_v39, %v5176_v16 }
 0x20a   :  { %v1117_v38 = vadd.f32 %v1116_v34, %v1028_v29 }
 0x20f   :  { %v1030_v35 = vpop.f32.mrf.mxu2 }
 0x210   :  { %v1119_v52 = vpop.f32.mrf.mxu3  ;;  %v1031_v47 = vadd.f32 %v1030_v35, %v5178_v25 }
 0x212   :  { %v1120_v48 = vadd.f32 %v1119_v52, %v1031_v47 }
 0x217   :  { %v1032_v50 = vpop.f32.mrf.mxu2 }
 0x218   :  { %v1121_v42 = vpop.f32.mrf.mxu3  ;;  %v1033_v59 = vadd.f32 %v1032_v50, %v5180_v36 }
 0x21a   :  { %v1122_v44 = vadd.f32 %v1121_v42, %v1033_v59 }
 0x21f   :  { %v1035_v45 = vpop.f32.mrf.mxu2 }
 0x220   :  { %v1124_v49 = vpop.f32.mrf.mxu3  ;;  %v1036_v8 = vadd.f32 %v1035_v45, %v5182_v46 }
 0x222   :  { %v1125_v56 = vadd.f32 %v1124_v49, %v1036_v8 }
 0x227   :  { %v1037_v61 = vpop.f32.mrf.mxu2 }
 0x228   :  { %v1038_v60 = vadd.f32 %v1037_v61, %v5184_v58  ;;  %v1126_v16 = vpop.f32.mrf.mxu3 }
 0x22a   :  { %v1127_v1 = vadd.f32 %v1126_v16, %v1038_v60 }
 0x22b   :  { %5102 = dma.done.wait [#allocation4], 4096 }
 0x22c   :  { %5103 = vsyncadd [#allocation4], 4294963200  ;;  %v5260_v25 = vld [vmem:[%s7929_s3] ss:$0 sm:$0xff]  ;;  %s5113_s12 = smov 100.0   ;;  %s3976_s22 = sshll.u32 %s7931_s5, 4  ;;  %s3977_s22 = int_to_ptr.hbm [resolvable:$true] %s3976_s22 }
 0x22d   :  { %v5263_v36 = vadd.f32 %v5260_v25, %v1125_v56  ;;  %v5267_v2 = vadd.f32 %v5260_v25, %v5214_v12  ;;  %v5271_v46 = vadd.f32 %v5260_v25, %v5210_v40  ;;  %v5280_v10 = vadd.f32 %v5260_v25, %v1127_v1  ;;  %s5117_s24 = smov [#allocation11]  }
 0x22e   :  { %v5284_v12 = vadd.f32 %v5260_v25, %v5219_v20  ;;  %v5288_v40 = vadd.f32 %v5260_v25, %v5212_v63  ;;  %v5297_v21 = vadd.f32 %v5260_v25, %v1122_v44  ;;  %v5300_v20 = vadd.f32 %v5260_v25, %v1120_v48  ;;  %s3974_s25 = sshll.u32 %s5117_s24, 4  ;;  %s3975_s25 = int_to_ptr.vmem [resolvable:$true] %s3974_s25 }
 0x22f   :  { %v1809_v58 = vmul.f32 %v5263_v36, %v5263_v36  ;;  %v1793_v3 = vmul.f32 %v5267_v2, %v5267_v2  ;;  %v1791_v57 = vmul.f32 %v5271_v46, %v5271_v46  ;;  %v1810_v14 = vmul.f32 %v5280_v10, %v5280_v10 }
 0x230   :  { %v1794_v4 = vmul.f32 %v5284_v12, %v5284_v12  ;;  %v1792_v15 = vmul.f32 %v5288_v40, %v5288_v40  ;;  %v5304_v63 = vadd.f32 %v5260_v25, %v5206_v9  ;;  %v1808_v19 = vmul.f32 %v5297_v21, %v5297_v21 }
 0x231   :  { %1871 = vadd.xlane.f32.xlu1 %v1809_v58  ;;  %1839 = vadd.xlane.f32.xlu0 %v1793_v3  ;;  %v1807_v22 = vmul.f32 %v5300_v20, %v5300_v20  ;;  %v5313_v18 = vadd.f32 %v5260_v25, %v1115_v30  ;;  %v5317_v28 = vadd.f32 %v5260_v25, %v5208_v27 }
 0x232   :  { %1835 = vadd.xlane.f32.xlu2 %v1791_v57  ;;  %v1789_v32 = vmul.f32 %v5304_v63, %v5304_v63  ;;  %v5320_v9 = vadd.f32 %v5260_v25, %v1117_v38  ;;  %v5330_v30 = vadd.f32 %v5260_v25, %v5204_v0  ;;  %v5334_v27 = vadd.f32 %v5260_v25, %v5202_v41 }
 0x233   :  { %v1805_v39 = vmul.f32 %v5313_v18, %v5313_v18  ;;  %v1790_v34 = vmul.f32 %v5317_v28, %v5317_v28  ;;  %v5338_v38 = vadd.f32 %v5260_v25, %v5246_v17  ;;  %v5348_v41 = vadd.f32 %v5260_v25, %v5249_v26 }
 0x234   :  { %v1806_v29 = vmul.f32 %v5320_v9, %v5320_v9  ;;  %v1788_v35 = vmul.f32 %v5330_v30, %v5330_v30  ;;  %v1787_v52 = vmul.f32 %v5334_v27, %v5334_v27  ;;  %v5352_v0 = vadd.f32 %v5260_v25, %v5198_v13 }
 0x235   :  { %v1803_v47 = vmul.f32 %v5338_v38, %v5338_v38  ;;  %v5356_v17 = vadd.f32 %v5260_v25, %v5200_v33  ;;  %v1804_v48 = vmul.f32 %v5348_v41, %v5348_v41  ;;  %v5366_v13 = vadd.f32 %v5260_v25, %v5240_v5 }
 0x236   :  { %v1785_v50 = vmul.f32 %v5352_v0, %v5352_v0  ;;  %v5370_v26 = vadd.f32 %v5260_v25, %v5243_v11  ;;  %v5374_v33 = vadd.f32 %v5260_v25, %v5194_v55  ;;  %v5384_v5 = vadd.f32 %v5260_v25, %v5234_v54 }
 0x237   :  { %v1786_v42 = vmul.f32 %v5356_v17, %v5356_v17  ;;  %v1801_v59 = vmul.f32 %v5366_v13, %v5366_v13  ;;  %v5388_v11 = vadd.f32 %v5260_v25, %v5196_v7  ;;  %v5392_v55 = vadd.f32 %v5260_v25, %v5237_v62 }
 0x238   :  { %v1802_v44 = vmul.f32 %v5370_v26, %v5370_v26  ;;  %v1783_v45 = vmul.f32 %v5374_v33, %v5374_v33  ;;  %v1799_v49 = vmul.f32 %v5384_v5, %v5384_v5  ;;  %v5402_v7 = vadd.f32 %v5260_v25, %v5192_v51 }
 0x239   :  { %1873 = vadd.xlane.f32.xlu1 %v1810_v14  ;;  %1841 = vadd.xlane.f32.xlu0 %v1794_v4  ;;  %v1784_v8 = vmul.f32 %v5388_v11, %v5388_v11  ;;  %v1800_v56 = vmul.f32 %v5392_v55, %v5392_v55  ;;  %v5406_v54 = vadd.f32 %v5260_v25, %v5190_v31 }
 0x23a   :  { %1837 = vadd.xlane.f32.xlu2 %v1792_v15  ;;  %8005 = vst [vmem:[#allocation20_spill] sm:$0xff] %v5402_v7  ;;  %v5410_v62 = vadd.f32 %v5260_v25, %v5228_v43  ;;  %v1782_v61 = vmul.f32 %v5402_v7, %v5402_v7  ;;  %v5420_v31 = vadd.f32 %v5260_v25, %v5231_v53  ;;  %v1201_v15 = vld [vmem:[#allocation3 + $0x10] sm:$0xff] }
 0x23b   :  { %v1781_v60 = vmul.f32 %v5406_v54, %v5406_v54  ;;  %v5424_v51 = vadd.f32 %v5260_v25, %v5186_v6  ;;  %v5428_v43 = vadd.f32 %v5260_v25, %v5188_v23  ;;  %v5438_v6 = vadd.f32 %v5260_v25, %v5222_v24  ;;  %v1199_v23 = vld [vmem:[#allocation3] sm:$0xff]  ;;  %v1202_v24 = vld [vmem:[#allocation3 + $0x18] sm:$0xff] }
 0x23c   :  { %8006 = vst [vmem:[#allocation21_spill] sm:$0xff] %v5410_v62  ;;  %v1797_v16 = vmul.f32 %v5410_v62, %v5410_v62  ;;  %v1798_v1 = vmul.f32 %v5420_v31, %v5420_v31  ;;  %v5442_v53 = vadd.f32 %v5260_v25, %v5225_v37  ;;  %v1231_v4 = vmul.f32 %v1199_v23, %v1199_v23  ;;  %v1204_v37 = vld [vmem:[#allocation3 + $0x28] sm:$0xff]  ;;  %v1203_v25 = vld [vmem:[#allocation3 + $0x20] sm:$0xff] }
 0x23d   :  { %8007 = vst [vmem:[#allocation22_spill] sm:$0xff] %v5420_v31  ;;  %v1779_v58 = vmul.f32 %v5424_v51, %v5424_v51  ;;  %v1780_v3 = vmul.f32 %v5428_v43, %v5428_v43  ;;  %v1795_v57 = vmul.f32 %v5438_v6, %v5438_v6 }
 0x23e   :  { %8008 = vst [vmem:[#allocation23_spill] sm:$0xff] %v5424_v51  ;;  %v1796_v14 = vmul.f32 %v5442_v53, %v5442_v53 }
 0x23f   :  { %8009 = vst [vmem:[#allocation24_spill] sm:$0xff] %v5428_v43 }
 0x240   :  { %8010 = vst [vmem:[#allocation25_spill] sm:$0xff] %v5438_v6 }
 0x241   :  { %1869 = vadd.xlane.f32.xlu1 %v1808_v19  ;;  %1867 = vadd.xlane.f32.xlu0 %v1807_v22  ;;  %8011 = vst [vmem:[#allocation26_spill] sm:$0xff] %v5442_v53  ;;  %v1200_v19 = vld [vmem:[#allocation3 + $0x8] sm:$0xff]  ;;  %v1233_v22 = vmul.f32 %v1201_v15, %v1201_v15 }
 0x242   :  { %1831 = vadd.xlane.f32.xlu2 %v1789_v32  ;;  %v1232_v32 = vmul.f32 %v1200_v19, %v1200_v19 }
 0x249   :  { %1863 = vadd.xlane.f32.xlu1 %v1805_v39  ;;  %1833 = vadd.xlane.f32.xlu0 %v1790_v34  ;;  %v1234_v39 = vmul.f32 %v1202_v24, %v1202_v24  ;;  %v1205_v34 = vld [vmem:[#allocation3 + $0x30] sm:$0xff] }
 0x24a   :  { %1865 = vadd.xlane.f32.xlu2 %v1806_v29  ;;  %v1236_v29 = vmul.f32 %v1204_v37, %v1204_v37  ;;  %v1217_v37 = vld [vmem:[#allocation3 + $0x90] sm:$0xff] }
 0x251   :  { %1829 = vadd.xlane.f32.xlu1 %v1788_v35  ;;  %1827 = vadd.xlane.f32.xlu0 %v1787_v52  ;;  %v1235_v35 = vmul.f32 %v1203_v25, %v1203_v25  ;;  %v1237_v52 = vmul.f32 %v1205_v34, %v1205_v34 }
 0x252   :  { %1859 = vadd.xlane.f32.xlu2 %v1803_v47  ;;  %v1207_v47 = vld [vmem:[#allocation3 + $0x40] sm:$0xff] }
 0x259   :  { %1861 = vadd.xlane.f32.xlu0 %v1804_v48  ;;  %1823 = vadd.xlane.f32.xlu1 %v1785_v50  ;;  %v1206_v48 = vld [vmem:[#allocation3 + $0x38] sm:$0xff]  ;;  %v1208_v50 = vld [vmem:[#allocation3 + $0x48] sm:$0xff] }
 0x25a   :  { %1825 = vadd.xlane.f32.xlu2 %v1786_v42  ;;  %v1239_v42 = vmul.f32 %v1207_v47, %v1207_v47 }
 0x261   :  { %1855 = vadd.xlane.f32.xlu0 %v1801_v59  ;;  %1857 = vadd.xlane.f32.xlu1 %v1802_v44  ;;  %v1238_v59 = vmul.f32 %v1206_v48, %v1206_v48  ;;  %v1240_v44 = vmul.f32 %v1208_v50, %v1208_v50 }
 0x262   :  { %1819 = vadd.xlane.f32.xlu2 %v1783_v45  ;;  %v1210_v45 = vld [vmem:[#allocation3 + $0x58] sm:$0xff] }
 0x269   :  { %1851 = vadd.xlane.f32.xlu1 %v1799_v49  ;;  %1821 = vadd.xlane.f32.xlu0 %v1784_v8  ;;  %v1209_v49 = vld [vmem:[#allocation3 + $0x50] sm:$0xff]  ;;  %v1211_v8 = vld [vmem:[#allocation3 + $0x60] sm:$0xff] }
 0x26a   :  { %1853 = vadd.xlane.f32.xlu2 %v1800_v56  ;;  %v1242_v56 = vmul.f32 %v1210_v45, %v1210_v45  ;;  %v1249_v45 = vmul.f32 %v1217_v37, %v1217_v37 }
 0x271   :  { %1817 = vadd.xlane.f32.xlu1 %v1782_v61  ;;  %1815 = vadd.xlane.f32.xlu0 %v1781_v60  ;;  %v1241_v61 = vmul.f32 %v1209_v49, %v1209_v49  ;;  %v1243_v60 = vmul.f32 %v1211_v8, %v1211_v8 }
 0x272   :  { %1847 = vadd.xlane.f32.xlu2 %v1797_v16  ;;  %v1213_v16 = vld [vmem:[#allocation3 + $0x70] sm:$0xff] }
 0x273   :  { %v1245_v15 = vmul.f32 %v1213_v16, %v1213_v16  ;;  %v1218_v16 = vld [vmem:[#allocation3 + $0x98] sm:$0xff] }
 0x279   :  { %1849 = vadd.xlane.f32.xlu0 %v1798_v1  ;;  %1811 = vadd.xlane.f32.xlu1 %v1779_v58  ;;  %v1212_v1 = vld [vmem:[#allocation3 + $0x68] sm:$0xff]  ;;  %v1214_v58 = vld [vmem:[#allocation3 + $0x78] sm:$0xff] }
 0x27a   :  { %1813 = vadd.xlane.f32.xlu2 %v1780_v3  ;;  %v1244_v19 = vmul.f32 %v1212_v1, %v1212_v1  ;;  %v1220_v1 = vld [vmem:[#allocation3 + $0xa8] sm:$0xff] }
 0x281   :  { %1843 = vadd.xlane.f32.xlu0 %v1795_v57  ;;  %1845 = vadd.xlane.f32.xlu1 %v1796_v14 }
 0x282   :  { %1263 = vadd.xlane.f32.xlu2 %v1231_v4 }
 0x289   :  { %1267 = vadd.xlane.f32.xlu1 %v1233_v22  ;;  %1265 = vadd.xlane.f32.xlu0 %v1232_v32  ;;  %v1246_v22 = vmul.f32 %v1214_v58, %v1214_v58  ;;  %v1216_v32 = vld [vmem:[#allocation3 + $0x88] sm:$0xff]  ;;  %v1222_v58 = vld [vmem:[#allocation3 + $0xb8] sm:$0xff] }
 0x28a   :  { %1269 = vadd.xlane.f32.xlu2 %v1234_v39  ;;  %v1215_v39 = vld [vmem:[#allocation3 + $0x80] sm:$0xff]  ;;  %v1248_v48 = vmul.f32 %v1216_v32, %v1216_v32 }
 0x28b   :  { %v1247_v50 = vmul.f32 %v1215_v39, %v1215_v39 }
 0x291   :  { %1273 = vadd.xlane.f32.xlu1 %v1236_v29  ;;  %1271 = vadd.xlane.f32.xlu0 %v1235_v35 }
 0x292   :  { %1275 = vadd.xlane.f32.xlu2 %v1237_v52 }
 0x299   :  { %1279 = vadd.xlane.f32.xlu1 %v1239_v42  ;;  %1277 = vadd.xlane.f32.xlu0 %v1238_v59 }
 0x29a   :  { %1281 = vadd.xlane.f32.xlu2 %v1240_v44 }
 0x2a1   :  { %1285 = vadd.xlane.f32.xlu1 %v1242_v56  ;;  %1283 = vadd.xlane.f32.xlu0 %v1241_v61  ;;  %v1219_v61 = vld [vmem:[#allocation3 + $0xa0] sm:$0xff] }
 0x2a2   :  { %1287 = vadd.xlane.f32.xlu2 %v1243_v60 }
 0x2a4   :  { %v1872_v3 = vpop.xlane.xlu1 %1871  ;;  %v1840_v23 = vpop.xlane.xlu0 %1839 }
 0x2a5   :  { %v5448_v57 = vadd.f32 1e-12, %v1872_v3  ;;  %v5450_v14 = vadd.f32 1e-12, %v1840_v23  ;;  %v1836_v4 = vpop.xlane.xlu2 %1835  ;;  %v1221_v3 = vld [vmem:[#allocation3 + $0xb0] sm:$0xff]  ;;  %v1223_v23 = vld [vmem:[#allocation3 + $0xc0] sm:$0xff] }
 0x2a6   :  { %v5452_v24 = vadd.f32 1e-12, %v1836_v4 }
 0x2a7   :  { %4514 = vrsqrt.f32 %v5448_v57  ;;  %vm2053_vm0 = vweird.f32 %v5450_v14  ;;  %vm2213_vm1 = vweird.f32 %v5448_v57 }
 0x2a8   :  { %4516 = vrsqrt.f32 %v5450_v14  ;;  %vm2033_vm7 = vweird.f32 %v5452_v24 }
 0x2a9   :  { %1291 = vadd.xlane.f32.xlu1 %v1245_v15  ;;  %1289 = vadd.xlane.f32.xlu0 %v1244_v19  ;;  %4518 = vrsqrt.f32 %v5452_v24  ;;  %v1251_v19 = vmul.f32 %v1219_v61, %v1219_v61 }
 0x2aa   :  { %1293 = vadd.xlane.f32.xlu2 %v1246_v22  ;;  %v1225_v22 = vld [vmem:[#allocation3 + $0xd0] sm:$0xff] }
 0x2ac   :  { %v1874_v25 = vpop.xlane.xlu1 %1873  ;;  %v1842_v34 = vpop.xlane.xlu0 %1841 }
 0x2ad   :  { %v5457_v29 = vpop.eup %4514  ;;  %v5459_v35 = vadd.f32 1e-12, %v1874_v25  ;;  %v5461_v52 = vadd.f32 1e-12, %v1842_v34  ;;  %v1838_v47 = vpop.xlane.xlu2 %1837  ;;  %v1250_v25 = vmul.f32 %v1218_v16, %v1218_v16  ;;  %v1252_v34 = vmul.f32 %v1220_v1, %v1220_v1 }
 0x2ae   :  { %v5463_v42 = vpop.eup %4516  ;;  %v2208_v59 = vmul.f32 %v5457_v29, %v5448_v57  ;;  %v5467_v44 = vadd.f32 1e-12, %v1838_v47  ;;  %v5480_v47 = vmul.f32 %v1222_v58, %v1222_v58  ;;  %v5500_v1 = vmul.f32 %v1225_v22, %v1225_v22  ;;  %v1224_v58 = vld [vmem:[#allocation3 + $0xc8] sm:$0xff] }
 0x2af   :  { %v2048_v49 = vmul.f32 %v5463_v42, %v5450_v14  ;;  %4520 = vrsqrt.f32 %v5459_v35  ;;  %v5472_v8 = vpop.eup %4518  ;;  %vm2054_vm2 = vweird.f32 %v5463_v42  ;;  %vm2214_vm3 = vweird.f32 %v5457_v29 }
 0x2b0   :  { %v2209_v56 = vmul.f32 %v5457_v29, %v2208_v59  ;;  %4522 = vrsqrt.f32 %v5461_v52  ;;  %v2028_v15 = vmul.f32 %v5472_v8, %v5452_v24  ;;  %vm2063_vm4 = vweird.f32 %v5461_v52  ;;  %vm5543_vm10 = vmor %vm2213_vm1, %vm2214_vm3 }
 0x2b1   :  { %v2049_v60 = vmul.f32 %v5463_v42, %v2048_v49  ;;  %4524 = vrsqrt.f32 %v5467_v44  ;;  %1297 = vadd.xlane.f32.xlu1 %v1248_v48  ;;  %1295 = vadd.xlane.f32.xlu0 %v1247_v50  ;;  %v5488_v49 = vmul.f32 %v1221_v3, %v1221_v3  ;;  %vm2043_vm5 = vweird.f32 %v5467_v44  ;;  %vm5555_vm11 = vmor %vm2053_vm0, %vm2054_vm2 }
 0x2b2   :  { %1299 = vadd.xlane.f32.xlu2 %v1249_v45  ;;  %v2210_v4 = vmul.f32 0.5, %v2209_v56  ;;  %v5490_v56 = vmul.f32 %v1223_v23, %v1223_v23  ;;  %v2029_v23 = vmul.f32 %v5472_v8, %v2028_v15  ;;  %vm2223_vm6 = vweird.f32 %v5459_v35 }
 0x2b3   :  { %v2050_v32 = vmul.f32 0.5, %v2049_v60  ;;  %vm2034_vm15 = vweird.f32 %v5472_v8 }
 0x2b4   :  { %v1870_v39 = vpop.xlane.xlu1 %1869  ;;  %v1868_v37 = vpop.xlane.xlu0 %1867  ;;  %v2211_v3 = vsub.f32 1.5, %v2210_v4  ;;  %v5515_v4 = vmul.f32 %v1224_v58, %v1224_v58 }
 0x2b5   :  { %v5482_v48 = vpop.eup %4520  ;;  %v5484_v50 = vadd.f32 1e-12, %v1870_v39  ;;  %v5486_v59 = vadd.f32 1e-12, %v1868_v37  ;;  %v1832_v45 = vpop.xlane.xlu2 %1831  ;;  %v2051_v53 = vsub.f32 1.5, %v2050_v32 }
 0x2b6   :  { %v5492_v61 = vpop.eup %4522  ;;  %v2218_v60 = vmul.f32 %v5482_v48, %v5459_v35  ;;  %v5496_v16 = vadd.f32 1e-12, %v1832_v45  ;;  %vm2224_vm8 = vweird.f32 %v5482_v48 }
 0x2b7   :  { %v5502_v39 = vpop.eup %4524  ;;  %v2058_v37 = vmul.f32 %v5492_v61, %v5461_v52  ;;  %4526 = vrsqrt.f32 %v5484_v50  ;;  %vm2064_vm9 = vweird.f32 %v5492_v61  ;;  %vm2225_vm12 = vmor %vm2223_vm6, %vm2224_vm8  ;;  %vm2203_vm2 = vweird.f32 %v5484_v50 }
 0x2b8   :  { %v2219_v45 = vmul.f32 %v5482_v48, %v2218_v60  ;;  %v2038_v6 = vmul.f32 %v5502_v39, %v5467_v44  ;;  %4528 = vrsqrt.f32 %v5486_v59  ;;  %vm2065_vm13 = vmor %vm2063_vm4, %vm2064_vm9  ;;  %vm2044_vm14 = vweird.f32 %v5502_v39 }
 0x2b9   :  { %v2059_v22 = vmul.f32 %v5492_v61, %v2058_v37  ;;  %1303 = vadd.xlane.f32.xlu1 %v1251_v19  ;;  %1301 = vadd.xlane.f32.xlu0 %v1250_v25  ;;  %4530 = vrsqrt.f32 %v5496_v16  ;;  %v2212_v19 = vmul.f32 %v5457_v29, %v2211_v3  ;;  %v2030_v25 = vmul.f32 0.5, %v2029_v23  ;;  %vm5621_vm0 = vmor %vm2043_vm5, %vm2044_vm14 }
 0x2ba   :  { %v2220_v15 = vmul.f32 0.5, %v2219_v45  ;;  %v2039_v32 = vmul.f32 %v5502_v39, %v2038_v6  ;;  %1305 = vadd.xlane.f32.xlu2 %v1252_v34  ;;  %v2052_v45 = vmul.f32 %v5463_v42, %v2051_v53  ;;  %vm2193_vm3 = vweird.f32 %v5486_v59  ;;  %vm5642_vm4 = vmor %vm2033_vm7, %vm2034_vm15 }
 0x2bb   :  { %v2060_v60 = vmul.f32 0.5, %v2059_v22  ;;  %v2216_v57 = vsel %vm5543_vm10, %v5457_v29, %v2212_v19  ;;  %vm2013_vm8 = vweird.f32 %v5496_v16 }
 0x2bc   :  { %v2221_v37 = vsub.f32 1.5, %v2220_v15  ;;  %v2040_v31 = vmul.f32 0.5, %v2039_v32  ;;  %v1864_v58 = vpop.xlane.xlu1 %1863  ;;  %v1834_v62 = vpop.xlane.xlu0 %1833  ;;  %v2056_v7 = vsel %vm5555_vm11, %v5463_v42, %v2052_v45  ;;  %v5585_v35 = vmul.f32 %v2216_v57, %v5263_v36 }
 0x2bd   :  { %v5524_v6 = vpop.eup %4526  ;;  %v2061_v34 = vsub.f32 1.5, %v2060_v60  ;;  %v5527_v43 = vadd.f32 1e-12, %v1864_v58  ;;  %v5529_v22 = vadd.f32 1e-12, %v1834_v62  ;;  %v1866_v51 = vpop.xlane.xlu2 %1865 }
 0x2be   :  { %v5532_v3 = vpop.eup %4528  ;;  %v2198_v23 = vmul.f32 %v5524_v6, %v5484_v50  ;;  %v5536_v15 = vadd.f32 1e-12, %v1866_v51  ;;  %v2222_v62 = vmul.f32 %v5482_v48, %v2221_v37  ;;  %v2041_v32 = vsub.f32 1.5, %v2040_v31  ;;  %8016 = vst [vmem:[#allocation27_spill] sm:$0xff] %v5585_v35 }
 0x2bf   :  { %v2188_v60 = vmul.f32 %v5532_v3, %v5486_v59  ;;  %4532 = vrsqrt.f32 %v5527_v43  ;;  %v5562_v58 = vpop.eup %4530  ;;  %v2031_v31 = vsub.f32 1.5, %v2030_v25  ;;  %v2062_v29 = vmul.f32 %v5492_v61, %v2061_v34 }
 0x2c0   :  { %v2199_v37 = vmul.f32 %v5524_v6, %v2198_v23  ;;  %4534 = vrsqrt.f32 %v5529_v22  ;;  %v2226_v19 = vsel %vm2225_vm12, %v5482_v48, %v2222_v62  ;;  %v2008_v48 = vmul.f32 %v5562_v58, %v5496_v16 }
 0x2c1   :  { %v2189_v14 = vmul.f32 %v5532_v3, %v2188_v60  ;;  %4536 = vrsqrt.f32 %v5536_v15  ;;  %1309 = vadd.xlane.f32.xlu1 %v5480_v47  ;;  %1307 = vadd.xlane.f32.xlu0 %v5488_v49  ;;  %v5588_v42 = vmul.f32 %v2226_v19, %v5280_v10  ;;  %v2066_v49 = vsel %vm2065_vm13, %v5492_v61, %v2062_v29 }
 0x2c2   :  { %v2200_v25 = vmul.f32 0.5, %v2199_v37  ;;  %1311 = vadd.xlane.f32.xlu2 %v5490_v56  ;;  %v1226_v56 = vld [vmem:[#allocation3 + $0xd8] sm:$0xff]  ;;  %v2042_v45 = vmul.f32 %v5502_v39, %v2041_v32  ;;  %v5596_v23 = vmul.f32 %v2056_v7, %v5267_v2  ;;  %v5599_v36 = vmul.f32 %v2066_v49, %v5284_v12 }
 0x2c3   :  { %8017 = vst [vmem:[#allocation28_spill] sm:$0xff] %v5588_v42  ;;  %v2190_v47 = vmul.f32 0.5, %v2189_v14  ;;  %v2329_v10 = vpack.c.bf16 %v5588_v42, %v5585_v35  ;;  %v2032_v51 = vmul.f32 %v5472_v8, %v2031_v31  ;;  %v1258_v37 = vmul.f32 %v1226_v56, %v1226_v56 }
 0x2c4   :  { %v1830_v34 = vpop.xlane.xlu1 %1829  ;;  %v1828_v52 = vpop.xlane.xlu0 %1827  ;;  %v2201_v7 = vsub.f32 1.5, %v2200_v25  ;;  %v2321_v57 = vpack.c.bf16 %v5599_v36, %v5596_v23  ;;  %v2009_v29 = vmul.f32 %v5562_v58, %v2008_v48  ;;  %v2046_v25 = vsel %vm5621_vm0, %v5502_v39, %v2042_v45 }
 0x2c5   :  { %v5604_v53 = vpop.eup %4532  ;;  %v2191_v62 = vsub.f32 1.5, %v2190_v47  ;;  %v1860_v61 = vpop.xlane.xlu2 %1859  ;;  %v5606_v60 = vadd.f32 1e-12, %v1830_v34  ;;  %v5608_v32 = vadd.f32 1e-12, %v1828_v52  ;;  %2419 = vmatpush.bf16.xpose.msrb.mxu1 %v2329_v10  ;;  %vm2194_vm1 = vweird.f32 %v5532_v3  ;;  %v1227_v52 = vld [vmem:[#allocation3 + $0xe0] sm:$0xff] }
 0x2c6   :  { %v5611_v2 = vpop.eup %4534  ;;  %v2168_v12 = vmul.f32 %v5604_v53, %v5527_v43  ;;  %2330 = vmatpush.bf16.xpose.msrb.mxu0 %v2321_v57  ;;  %v2036_v59 = vsel %vm5642_vm4, %v5472_v8, %v2032_v51  ;;  %v5657_v49 = vmul.f32 %v2046_v25, %v5288_v40  ;;  %vm5661_vm5 = vmor %vm2193_vm3, %vm2194_vm1  ;;  %vm2204_vm6 = vweird.f32 %v5524_v6  ;;  %v1228_v8 = vld [vmem:[#allocation3 + $0xe8] sm:$0xff]  ;;  %v1229_v25 = vld [vmem:[#allocation3 + $0xf0] sm:$0xff] }
 0x2c7   :  { %v5625_v31 = vpop.eup %4536  ;;  %v2018_v19 = vmul.f32 %v5611_v2, %v5529_v22  ;;  %4538 = vrsqrt.f32 %v5606_v60  ;;  %v2192_v48 = vmul.f32 %v5532_v3, %v2191_v62  ;;  %v5667_v34 = vadd.f32 1e-12, %v1860_v61  ;;  %vm2205_vm7 = vmor %vm2203_vm2, %vm2204_vm6 }
 0x2c8   :  { %v2169_v44 = vmul.f32 %v5604_v53, %v2168_v12  ;;  %4540 = vrsqrt.f32 %v5608_v32  ;;  %v2178_v24 = vmul.f32 %v5625_v31, %v5536_v15  ;;  %v1260_v50 = vmul.f32 %v1228_v8, %v1228_v8 }
 0x2c9   :  { %v2019_v39 = vmul.f32 %v5611_v2, %v2018_v19  ;;  %1315 = vadd.xlane.f32.xlu1 %v5500_v1  ;;  %1313 = vadd.xlane.f32.xlu0 %v5515_v4  ;;  %v2202_v1 = vmul.f32 %v5524_v6, %v2201_v7  ;;  %v2010_v4 = vmul.f32 0.5, %v2009_v29  ;;  %v2196_v40 = vsel %vm5661_vm5, %v5532_v3, %v2192_v48 }
 0x2ca   :  { %1317 = vadd.xlane.f32.xlu2 %v1258_v37  ;;  %v2170_v10 = vmul.f32 0.5, %v2169_v44  ;;  %v5675_v7 = vmul.f32 %v2036_v59, %v5271_v46  ;;  %v5681_v61 = vmul.f32 %v2196_v40, %v5300_v20  ;;  %v2179_v29 = vmul.f32 %v5625_v31, %v2178_v24 }
 0x2cb   :  { %v2020_v45 = vmul.f32 0.5, %v2019_v39  ;;  %v2206_v12 = vsel %vm2205_vm7, %v5524_v6, %v2202_v1  ;;  %v1259_v6 = vmul.f32 %v1227_v52, %v1227_v52  ;;  %v2011_v47 = vsub.f32 1.5, %v2010_v4 }
 0x2cc   :  { %v1862_v62 = vpop.xlane.xlu0 %1861  ;;  %v1824_v51 = vpop.xlane.xlu1 %1823  ;;  %8024 = vst [vmem:[#allocation29_spill] sm:$0xff] %v5681_v61  ;;  %v5684_v3 = vmul.f32 %v2206_v12, %v5297_v21  ;;  %v2320_v46 = vpack.c.bf16 %v5657_v49, %v5675_v7  ;;  %4542 = vrsqrt.f32 %v5667_v34  ;;  %v1261_v48 = vmul.f32 %v1229_v25, %v1229_v25 }
 0x2cd   :  { %v1826_v57 = vpop.xlane.xlu2 %1825  ;;  %v5678_v37 = vadd.f32 1e-12, %v1824_v51  ;;  %v5686_v14 = vpop.eup %4538  ;;  %v2021_v20 = vsub.f32 1.5, %v2020_v45  ;;  %v5696_v21 = vadd.f32 1e-12, %v1862_v62  ;;  %v2171_v24 = vsub.f32 1.5, %v2170_v10 }
 0x2ce   :  { %8025 = vst [vmem:[#allocation30_spill] sm:$0xff] %v5684_v3  ;;  %v5689_v19 = vadd.f32 1e-12, %v1826_v57  ;;  %v5693_v44 = vpop.eup %4540  ;;  %2331 = vmatpush.bf16.xpose.msrb.mxu0 %v2320_v46  ;;  %v2328_v59 = vpack.c.bf16 %v5684_v3, %v5681_v61  ;;  %v2180_v56 = vmul.f32 0.5, %v2179_v29  ;;  %vm2014_vm9 = vweird.f32 %v5562_v58 }
 0x2cf   :  { %v1988_v39 = vmul.f32 %v5693_v44, %v5608_v32  ;;  %v1998_v1 = vmul.f32 %v5686_v14, %v5606_v60  ;;  %v2012_v8 = vmul.f32 %v5562_v58, %v2011_v47  ;;  %v2022_v4 = vmul.f32 %v5611_v2, %v2021_v20  ;;  %vm5718_vm12 = vmor %vm2013_vm8, %vm2014_vm9 }
 0x2d0   :  { %4544 = vrsqrt.f32 %v5689_v19  ;;  %2420 = vmatpush.bf16.xpose.msrb.mxu1 %v2328_v59  ;;  %vm2024_vm10 = vweird.f32 %v5611_v2  ;;  %vm2023_vm11 = vweird.f32 %v5529_v22  ;;  %v2172_v22 = vmul.f32 %v5604_v53, %v2171_v24 }
 0x2d1   :  { %4546 = vrsqrt.f32 %v5678_v37  ;;  %1321 = vadd.xlane.f32.xlu1 %v1260_v50  ;;  %1319 = vadd.xlane.f32.xlu0 %v1259_v6  ;;  %v1989_v10 = vmul.f32 %v5693_v44, %v1988_v39  ;;  %vm5726_vm13 = vmor %vm2023_vm11, %vm2024_vm10  ;;  %vm2174_vm14 = vweird.f32 %v5604_v53  ;;  %v2181_v46 = vsub.f32 1.5, %v2180_v56  ;;  %v1230_v56 = vld [vmem:[#allocation3 + $0xf8] sm:$0xff] }
 0x2d2   :  { %1323 = vadd.xlane.f32.xlu2 %v1261_v48  ;;  %v5711_v52 = vpop.eup %4542  ;;  %4548 = vrsqrt.f32 %v5696_v21  ;;  %v1999_v16 = vmul.f32 %v5686_v14, %v1998_v1  ;;  %v2016_v6 = vsel %vm5718_vm12, %v5562_v58, %v2012_v8  ;;  %v2026_v25 = vsel %vm5726_vm13, %v5611_v2, %v2022_v4 }
 0x2d3   :  { %vm2173_vm15 = vweird.f32 %v5527_v43  ;;  %vm2183_vm0 = vweird.f32 %v5536_v15  ;;  %v2148_v39 = vmul.f32 %v5711_v52, %v5667_v34  ;;  %v1990_v59 = vmul.f32 0.5, %v1989_v10 }
 0x2d4   :  { %v1856_v45 = vpop.xlane.xlu0 %1855  ;;  %v1858_v40 = vpop.xlane.xlu1 %1857  ;;  %vm2175_vm1 = vmor %vm2173_vm15, %vm2174_vm14  ;;  %v5755_v43 = vmul.f32 %v2016_v6, %v5304_v63  ;;  %v5758_v2 = vmul.f32 %v2026_v25, %v5317_v28  ;;  %v2000_v8 = vmul.f32 0.5, %v1999_v16  ;;  %vm2184_vm2 = vweird.f32 %v5625_v31 }
 0x2d5   :  { %v1820_v62 = vpop.xlane.xlu2 %1819  ;;  %v5724_v57 = vadd.f32 1e-12, %v1856_v45  ;;  %v5749_v48 = vadd.f32 1e-12, %v1858_v40  ;;  %v2176_v24 = vsel %vm2175_vm1, %v5604_v53, %v2172_v22  ;;  %v2182_v45 = vmul.f32 %v5625_v31, %v2181_v46  ;;  %vm2185_vm3 = vmor %vm2183_vm0, %vm2184_vm2 }
 0x2d6   :  { %v5722_v12 = vpop.eup %4544  ;;  %v5751_v58 = vadd.f32 1e-12, %v1820_v62  ;;  %v2319_v63 = vpack.c.bf16 %v5758_v2, %v5755_v43  ;;  %v5772_v28 = vmul.f32 %v2176_v24, %v5313_v18  ;;  %v2260_v53 = vstv %s7930_s4 }
 0x2d7   :  { %v5732_v29 = vpop.eup %4546  ;;  %v1978_v47 = vmul.f32 %v5722_v12, %v5689_v19  ;;  %4550 = vrsqrt.f32 %v5724_v57  ;;  %v2186_v51 = vsel %vm2185_vm3, %v5625_v31, %v2182_v45  ;;  %v2261_v50 = vmul.f32 1.442695, %v2260_v53 }
 0x2d8   :  { %v1968_v20 = vmul.f32 %v5732_v29, %v5678_v37  ;;  %v5761_v1 = vpop.eup %4548  ;;  %8030 = vst [vmem:[#allocation31_spill] sm:$0xff] %v5772_v28  ;;  %4552 = vrsqrt.f32 %v5749_v48  ;;  %v1262_v22 = vmul.f32 %v1230_v56, %v1230_v56  ;;  %v1991_v16 = vsub.f32 1.5, %v1990_v59  ;;  %2332 = vmatpush.bf16.xpose.msrb.mxu0 %v2319_v63 }
 0x2d9   :  { %v1979_v40 = vmul.f32 %v5722_v12, %v1978_v47  ;;  %v2158_v15 = vmul.f32 %v5761_v1, %v5696_v21  ;;  %4554 = vrsqrt.f32 %v5751_v58  ;;  %v5783_v18 = vmul.f32 %v2186_v51, %v5320_v9 }
 0x2da   :  { %v1969_v4 = vmul.f32 %v5732_v29, %v1968_v20  ;;  %4556 = vpow2.f32 %v2261_v50  ;;  %1325 = vadd.xlane.f32.xlu0 %v1262_v22  ;;  %v2149_v31 = vmul.f32 %v5711_v52, %v2148_v39  ;;  %v2001_v24 = vsub.f32 1.5, %v2000_v8 }
 0x2db   :  { %8031 = vst [vmem:[#allocation32_spill] sm:$0xff] %v5783_v18  ;;  %v1980_v20 = vmul.f32 0.5, %v1979_v40  ;;  %v2327_v59 = vpack.c.bf16 %v5783_v18, %v5772_v28  ;;  %vm2003_vm4 = vweird.f32 %v5606_v60  ;;  %vm1993_vm5 = vweird.f32 %v5608_v32  ;;  %v8048_v28 = vld [vmem:[#allocation21_spill] sm:$0xff]  ;;  %v8053_v18 = vld [vmem:[#allocation26_spill] sm:$0xff] }
 0x2dc   :  { %v1852_v10 = vpop.xlane.xlu1 %1851  ;;  %v1822_v62 = vpop.xlane.xlu0 %1821  ;;  %v1970_v6 = vmul.f32 0.5, %v1969_v4  ;;  %v2159_v56 = vmul.f32 %v5761_v1, %v2158_v15  ;;  %v1992_v39 = vmul.f32 %v5693_v44, %v1991_v16  ;;  %vm1994_vm6 = vweird.f32 %v5693_v44 }
 0x2dd   :  { %v1854_v46 = vpop.xlane.xlu2 %1853  ;;  %v5785_v25 = vadd.f32 1e-12, %v1852_v10  ;;  %v5787_v47 = vpop.eup %4550  ;;  %v5794_v9 = vadd.f32 1e-12, %v1822_v62  ;;  %2421 = vmatpush.bf16.xpose.msrb.mxu1 %v2327_v59  ;;  %v2150_v53 = vmul.f32 0.5, %v2149_v31  ;;  %v1981_v10 = vsub.f32 1.5, %v1980_v20  ;;  %vm1995_vm9 = vmor %vm1993_vm5, %vm1994_vm6 }
 0x2de   :  { %v5798_v4 = vadd.f32 1e-12, %v1854_v46  ;;  %v5801_v45 = vpop.eup %4552  ;;  %v1971_v40 = vsub.f32 1.5, %v1970_v6  ;;  %v2128_v8 = vmul.f32 %v5787_v47, %v5724_v57  ;;  %vm1983_vm7 = vweird.f32 %v5689_v19 }
 0x2df   :  { %4558 = vrsqrt.f32 %v5785_v25  ;;  %v5807_v63 = vpop.eup %4554  ;;  %vm1984_vm8 = vweird.f32 %v5722_v12  ;;  %v1996_v22 = vsel %vm1995_vm9, %v5693_v44, %v1992_v39  ;;  %v2002_v46 = vmul.f32 %v5686_v14, %v2001_v24 }
 0x2e0   :  { %4560 = vrsqrt.f32 %v5794_v9  ;;  %v4557_v50 = vpop.eup %4556  ;;  %vm2004_vm10 = vweird.f32 %v5686_v14  ;;  %v2160_v15 = vmul.f32 0.5, %v2159_v56  ;;  %vm1974_vm11 = vweird.f32 %v5732_v29  ;;  %vm1985_vm0 = vmor %vm1983_vm7, %vm1984_vm8 }
 0x2e1   :  { %4562 = vrsqrt.f32 %v5798_v4  ;;  %v2138_v6 = vmul.f32 %v5801_v45, %v5749_v48  ;;  %4491 = vpush %v4557_v50  ;;  %vm2005_vm12 = vmor %vm2003_vm4, %vm2004_vm10  ;;  %v5823_v32 = vmul.f32 %v1996_v22, %v5334_v27  ;;  %v2129_v44 = vmul.f32 %v5787_v47, %v2128_v8 }
 0x2e2   :  { %v1948_v20 = vmul.f32 %v5807_v63, %v5751_v58  ;;  %v2006_v59 = vsel %vm2005_vm12, %v5686_v14, %v2002_v46  ;;  %v1972_v24 = vmul.f32 %v5732_v29, %v1971_v40  ;;  %v1982_v27 = vmul.f32 %v5722_v12, %v1981_v10 }
 0x2e3   :  { %v5835_v60 = vmul.f32 %v2006_v59, %v5330_v30  ;;  %v2151_v8 = vsub.f32 1.5, %v2150_v53  ;;  %vm1973_vm13 = vweird.f32 %v5678_v37  ;;  %vm2153_vm14 = vweird.f32 %v5667_v34 }
 0x2e4   :  { %v1818_v62 = vpop.xlane.xlu1 %1817  ;;  %v1816_v51 = vpop.xlane.xlu0 %1815  ;;  %v2161_v14 = vsub.f32 1.5, %v2160_v15  ;;  %vm1975_vm15 = vmor %vm1973_vm13, %vm1974_vm11  ;;  %v2130_v37 = vmul.f32 0.5, %v2129_v44  ;;  %v2139_v53 = vmul.f32 %v5801_v45, %v2138_v6  ;;  %v1986_v15 = vsel %vm1985_vm0, %v5722_v12, %v1982_v27 }
 0x2e5   :  { %v1848_v16 = vpop.xlane.xlu2 %1847  ;;  %v5825_v31 = vpop.eup %4558  ;;  %v5837_v39 = vadd.f32 1e-12, %v1818_v62  ;;  %v5843_v22 = vadd.f32 1e-12, %v1816_v51  ;;  %v2318_v40 = vpack.c.bf16 %v5835_v60, %v5823_v32  ;;  %v1949_v62 = vmul.f32 %v5807_v63, %v1948_v20 }
 0x2e6   :  { %v2108_v56 = vmul.f32 %v5825_v31, %v5785_v25  ;;  %v5840_v50 = vpop.eup %4560  ;;  %v1976_v51 = vsel %vm1975_vm15, %v5732_v29, %v1972_v24  ;;  %v5869_v6 = vmul.f32 %v1986_v15, %v5356_v17  ;;  %v2152_v44 = vmul.f32 %v5711_v52, %v2151_v8 }
 0x2e7   :  { %v1958_v30 = vmul.f32 %v5840_v50, %v5794_v9  ;;  %v5852_v10 = vpop.eup %4562  ;;  %2333 = vmatpush.bf16.xpose.msrb.mxu0 %v2318_v40  ;;  %4564 = vrsqrt.f32 %v5837_v39  ;;  %v5865_v59 = vmul.f32 %v1976_v51, %v5352_v0  ;;  %vm2154_vm1 = vweird.f32 %v5711_v52 }
 0x2e8   :  { %v2109_v46 = vmul.f32 %v5825_v31, %v2108_v56  ;;  %4566 = vrsqrt.f32 %v5843_v22  ;;  %v2118_v12 = vmul.f32 %v5852_v10, %v5798_v4  ;;  %v2162_v0 = vmul.f32 %v5761_v1, %v2161_v14  ;;  %vm2155_vm5 = vmor %vm2153_vm14, %vm2154_vm1 }
 0x2e9   :  { %v1959_v20 = vmul.f32 %v5840_v50, %v1958_v30  ;;  %vm2164_vm2 = vweird.f32 %v5761_v1  ;;  %vm2163_vm3 = vweird.f32 %v5696_v21  ;;  %v2131_v24 = vsub.f32 1.5, %v2130_v37 }
 0x2ea   :  { %vm2133_vm4 = vweird.f32 %v5724_v57  ;;  %v2140_v17 = vmul.f32 0.5, %v2139_v53  ;;  %vm2143_vm6 = vweird.f32 %v5749_v48  ;;  %v5883_v56 = vadd.f32 1e-12, %v1848_v16  ;;  %vm2165_vm7 = vmor %vm2163_vm3, %vm2164_vm2 }
 0x2eb   :  { %v2317_v27 = vpack.c.bf16 %v5869_v6, %v5865_v59  ;;  %v2156_v8 = vsel %vm2155_vm5, %v5711_v52, %v2152_v44  ;;  %vm2134_vm8 = vweird.f32 %v5787_v47  ;;  %v1950_v21 = vmul.f32 0.5, %v1949_v62 }
 0x2ec   :  { %v1850_v42 = vpop.xlane.xlu0 %1849  ;;  %v1812_v19 = vpop.xlane.xlu1 %1811  ;;  %v2110_v14 = vmul.f32 0.5, %v2109_v46  ;;  %v2166_v30 = vsel %vm2165_vm7, %v5761_v1, %v2162_v0  ;;  %v1960_v34 = vmul.f32 0.5, %v1959_v20  ;;  %v2119_v37 = vmul.f32 %v5852_v10, %v2118_v12  ;;  %vm2135_vm11 = vmor %vm2133_vm4, %vm2134_vm8 }
 0x2ed   :  { %v1814_v29 = vpop.xlane.xlu2 %1813  ;;  %v5890_v40 = vpop.eup %4564  ;;  %v5894_v16 = vmul.f32 %v2156_v8, %v5338_v38  ;;  %v5897_v53 = vmul.f32 %v2166_v30, %v5348_v41  ;;  %v2141_v52 = vsub.f32 1.5, %v2140_v17  ;;  %v5901_v15 = vadd.f32 1e-12, %v1850_v42 }
 0x2ee   :  { %v5899_v51 = vpop.eup %4566  ;;  %v5903_v62 = vadd.f32 1e-12, %v1814_v29  ;;  %v2132_v1 = vmul.f32 %v5787_v47, %v2131_v24  ;;  %vm1953_vm9 = vweird.f32 %v5751_v58  ;;  %4568 = vrsqrt.f32 %v5883_v56 }
 0x2ef   :  { %8032 = vst [vmem:[#allocation33_spill] sm:$0xff] %v5897_v53  ;;  %2334 = vmatpush.bf16.xpose.msrb.mxu0 %v2317_v27  ;;  %v2326_v38 = vpack.c.bf16 %v5897_v53, %v5894_v16  ;;  %v5910_v46 = vadd.f32 1e-12, %v1812_v19  ;;  %vm2144_vm10 = vweird.f32 %v5801_v45  ;;  %v1951_v42 = vsub.f32 1.5, %v1950_v21 }
 0x2f0   :  { %v2111_v20 = vsub.f32 1.5, %v2110_v14  ;;  %4570 = vrsqrt.f32 %v5901_v15  ;;  %v1961_v12 = vsub.f32 1.5, %v1960_v34  ;;  %v2120_v0 = vmul.f32 0.5, %v2119_v37  ;;  %vm2145_vm12 = vmor %vm2143_vm6, %vm2144_vm10 }
 0x2f1   :  { %v1928_v19 = vmul.f32 %v5899_v51, %v5843_v22  ;;  %2422 = vmatpush.bf16.xpose.msrb.mxu1 %v2326_v38  ;;  %4572 = vrsqrt.f32 %v5903_v62  ;;  %v1938_v24 = vmul.f32 %v5890_v40, %v5837_v39  ;;  %v2136_v17 = vsel %vm2135_vm11, %v5787_v47, %v2132_v1 }
 0x2f2   :  { %4574 = vrsqrt.f32 %v5910_v46  ;;  %v2142_v27 = vmul.f32 %v5801_v45, %v2141_v52  ;;  %vm1954_vm13 = vweird.f32 %v5807_v63  ;;  %vm2113_vm14 = vweird.f32 %v5785_v25 }
 0x2f3   :  { %v5933_v57 = vmul.f32 %v2136_v17, %v5366_v13  ;;  %vm1963_vm15 = vweird.f32 %v5794_v9  ;;  %vm1964_vm0 = vweird.f32 %v5840_v50  ;;  %v1952_v21 = vmul.f32 %v5807_v63, %v1951_v42  ;;  %vm5952_vm2 = vmor %vm1953_vm9, %vm1954_vm13 }
 0x2f4   :  { %v1844_v41 = vpop.xlane.xlu0 %1843  ;;  %v1846_v44 = vpop.xlane.xlu1 %1845  ;;  %v2146_v47 = vsel %vm2145_vm12, %v5801_v45, %v2142_v27  ;;  %vm2114_vm1 = vweird.f32 %v5825_v31  ;;  %v2121_v48 = vsub.f32 1.5, %v2120_v0  ;;  %v1929_v30 = vmul.f32 %v5899_v51, %v1928_v19  ;;  %vm5967_vm3 = vmor %vm1963_vm15, %vm1964_vm0 }
 0x2f5   :  { %v1264_v29 = vpop.xlane.xlu2 %1263  ;;  %v5941_v14 = vpop.eup %4568  ;;  %v5946_v13 = vmul.f32 %v2146_v47, %v5370_v26  ;;  %v1939_v45 = vmul.f32 %v5890_v40, %v1938_v24  ;;  %v5957_v52 = vadd.f32 1e-12, %v1844_v41  ;;  %v1962_v1 = vmul.f32 %v5840_v50, %v1961_v12  ;;  %vm5993_vm5 = vmor %vm2113_vm14, %vm2114_vm1 }
 0x2f6   :  { %v5935_v8 = vadd.f32 1e-12, %v1264_v29  ;;  %v5948_v34 = vpop.eup %4570  ;;  %v2112_v38 = vmul.f32 %v5825_v31, %v2111_v20  ;;  %v5973_v29 = vadd.f32 1e-12, %v1846_v44  ;;  %v1956_v41 = vsel %vm5952_vm2, %v5807_v63, %v1952_v21 }
 0x2f7   :  { %v5961_v42 = vpop.eup %4572  ;;  %v2325_v58 = vpack.c.bf16 %v5946_v13, %v5933_v57  ;;  %vm2123_vm4 = vweird.f32 %v5798_v4  ;;  %v2088_v9 = vmul.f32 %v5941_v14, %v5883_v56  ;;  %v1966_v44 = vsel %vm5967_vm3, %v5840_v50, %v1962_v1 }
 0x2f8   :  { %4576 = vrsqrt.f32 %v5935_v8  ;;  %v5979_v12 = vpop.eup %4574  ;;  %v1918_v0 = vmul.f32 %v5961_v42, %v5903_v62  ;;  %vm2124_vm6 = vweird.f32 %v5852_v10  ;;  %v1930_v19 = vmul.f32 0.5, %v1929_v30 }
 0x2f9   :  { %v1908_v24 = vmul.f32 %v5979_v12, %v5910_v46  ;;  %2423 = vmatpush.bf16.xpose.msrb.mxu1 %v2325_v58  ;;  %v6001_v17 = vmul.f32 %v1966_v44, %v5388_v11  ;;  %4578 = vrsqrt.f32 %v5957_v52  ;;  %v6005_v25 = vmul.f32 %v1956_v41, %v5374_v33  ;;  %vm2125_vm7 = vmor %vm2123_vm4, %vm2124_vm6 }
 0x2fa   :  { %v2116_v47 = vsel %vm5993_vm5, %v5825_v31, %v2112_v38  ;;  %v2122_v21 = vmul.f32 %v5852_v10, %v2121_v48  ;;  %v1940_v30 = vmul.f32 0.5, %v1939_v45  ;;  %v2098_v37 = vmul.f32 %v5948_v34, %v5901_v15 }
 0x2fb   :  { %v1909_v11 = vmul.f32 %v5979_v12, %v1908_v24  ;;  %4580 = vrsqrt.f32 %v5973_v29  ;;  %v2089_v1 = vmul.f32 %v5941_v14, %v2088_v9  ;;  %v1919_v26 = vmul.f32 %v5961_v42, %v1918_v0 }
 0x2fc   :  { %v1266_v20 = vpop.xlane.xlu0 %1265  ;;  %v1268_v27 = vpop.xlane.xlu1 %1267  ;;  %v2316_v33 = vpack.c.bf16 %v6001_v17, %v6005_v25  ;;  %vm1943_vm8 = vweird.f32 %v5837_v39  ;;  %v6027_v48 = vmul.f32 %v2116_v47, %v5384_v5  ;;  %vm1944_vm9 = vweird.f32 %v5890_v40  ;;  %v8039_v39 = vld [vmem:[#allocation20_spill] sm:$0xff] }
 0x2fd   :  { %v1270_v50 = vpop.xlane.xlu2 %1269  ;;  %v1910_v31 = vmul.f32 0.5, %v1909_v11  ;;  %v1931_v45 = vsub.f32 1.5, %v1930_v19  ;;  %vm1933_vm10 = vweird.f32 %v5843_v22  ;;  %v2126_v38 = vsel %vm2125_vm7, %v5852_v10, %v2122_v21  ;;  %vm1945_vm0 = vmor %vm1943_vm8, %vm1944_vm9 }
 0x2fe   :  { %v6019_v58 = vpop.eup %4576  ;;  %2335 = vmatpush.bf16.xpose.msrb.mxu0 %v2316_v33  ;;  %v1941_v41 = vsub.f32 1.5, %v1940_v30  ;;  %vm1934_vm11 = vweird.f32 %v5899_v51  ;;  %v2099_v4 = vmul.f32 %v5948_v34, %v2098_v37  ;;  %v6035_v9 = vmul.f32 %v2126_v38, %v5392_v55 }
 0x2ff   :  { %v6037_v0 = vpop.eup %4578  ;;  %v2090_v5 = vmul.f32 0.5, %v2089_v1  ;;  %v1920_v44 = vmul.f32 0.5, %v1919_v26  ;;  %v1360_v63 = vmul.f32 %v6019_v58, %v5935_v8  ;;  %v6041_v19 = vadd.f32 1e-12, %v1266_v20  ;;  %vm1935_vm15 = vmor %vm1933_vm10, %vm1934_vm11 }
 0x300   :  { %vm1923_vm12 = vweird.f32 %v5903_v62  ;;  %v1911_v10 = vsub.f32 1.5, %v1910_v31  ;;  %v2324_v47 = vpack.c.bf16 %v6035_v9, %v6027_v48  ;;  %v6048_v21 = vadd.f32 1e-12, %v1270_v50 }
 0x301   :  { %v6043_v24 = vpop.eup %4580  ;;  %vm1914_vm13 = vweird.f32 %v5979_v12  ;;  %v6051_v30 = vadd.f32 1e-12, %v1268_v27  ;;  %4582 = vrsqrt.f32 %v6041_v19  ;;  %v1932_v20 = vmul.f32 %v5899_v51, %v1931_v45 }
 0x302   :  { %vm2093_vm14 = vweird.f32 %v5883_v56  ;;  %v2100_v37 = vmul.f32 0.5, %v2099_v4  ;;  %v2068_v50 = vmul.f32 %v6037_v0, %v5957_v52  ;;  %2424 = vmatpush.bf16.xpose.msrb.mxu1 %v2324_v47  ;;  %4584 = vrsqrt.f32 %v6048_v21 }
 0x303   :  { %v1942_v27 = vmul.f32 %v5890_v40, %v1941_v41  ;;  %v1921_v26 = vsub.f32 1.5, %v1920_v44  ;;  %v2078_v22 = vmul.f32 %v6043_v24, %v5973_v29  ;;  %v1361_v33 = vmul.f32 %v6019_v58, %v1360_v63 }
 0x304   :  { %v1272_v55 = vpop.xlane.xlu0 %1271  ;;  %v1274_v11 = vpop.xlane.xlu1 %1273  ;;  %v1936_v31 = vsel %vm1935_vm15, %v5899_v51, %v1932_v20  ;;  %v1912_v4 = vmul.f32 %v5979_v12, %v1911_v10  ;;  %vm1924_vm1 = vweird.f32 %v5961_v42  ;;  %vm1913_vm2 = vweird.f32 %v5910_v46 }
 0x305   :  { %v1276_v1 = vpop.xlane.xlu2 %1275  ;;  %v1946_v45 = vsel %vm1945_vm0, %v5890_v40, %v1942_v27  ;;  %v6074_v38 = vmul.f32 %v1936_v31, %v5406_v54  ;;  %v6076_v41 = vadd.f32 1e-12, %v1272_v55  ;;  %4586 = vrsqrt.f32 %v6051_v30  ;;  %vm6087_vm3 = vmor %vm1913_vm2, %vm1914_vm13 }
 0x306   :  { %v6083_v44 = vmul.f32 %v1946_v45, %v8039_v39  ;;  %v2091_v63 = vsub.f32 1.5, %v2090_v5  ;;  %v2101_v51 = vsub.f32 1.5, %v2100_v37  ;;  %v2069_v40 = vmul.f32 %v6037_v0, %v2068_v50  ;;  %vm1925_vm4 = vmor %vm1923_vm12, %vm1924_vm1 }
 0x307   :  { %v6092_v10 = vadd.f32 1e-12, %v1274_v11  ;;  %v6094_v47 = vpop.eup %4582  ;;  %v6098_v55 = vadd.f32 1e-12, %v1276_v1  ;;  %v1916_v5 = vsel %vm6087_vm3, %v5979_v12, %v1912_v4  ;;  %v1922_v20 = vmul.f32 %v5961_v42, %v1921_v26  ;;  %v8042_v26 = vld [vmem:[#allocation23_spill] sm:$0xff] }
 0x308   :  { %v2315_v46 = vpack.c.bf16 %v6083_v44, %v6074_v38  ;;  %v6104_v37 = vpop.eup %4584  ;;  %v2079_v50 = vmul.f32 %v6043_v24, %v2078_v22  ;;  %v1362_v27 = vmul.f32 0.5, %v1361_v33  ;;  %v1370_v11 = vmul.f32 %v6094_v47, %v6041_v19  ;;  %v8043_v22 = vld [vmem:[#allocation24_spill] sm:$0xff] }
 0x309   :  { %4588 = vrsqrt.f32 %v6076_v41  ;;  %vm2094_vm5 = vweird.f32 %v5941_v14  ;;  %v1390_v12 = vmul.f32 %v6104_v37, %v6048_v21  ;;  %v1926_v1 = vsel %vm1925_vm4, %v5961_v42, %v1922_v20 }
 0x30a   :  { %2336 = vmatpush.bf16.xpose.msrb.mxu0 %v2315_v46  ;;  %v6119_v31 = vmul.f32 %v1916_v5, %v8042_v26  ;;  %v1371_v62 = vmul.f32 %v6094_v47, %v1370_v11  ;;  %4590 = vrsqrt.f32 %v6092_v10  ;;  %v6124_v33 = vmul.f32 %v1926_v1, %v8043_v22  ;;  %vm6137_vm8 = vmor %vm2093_vm14, %vm2094_vm5 }
 0x30b   :  { %v2092_v45 = vmul.f32 %v5941_v14, %v2091_v63  ;;  %v6127_v39 = vpop.eup %4586  ;;  %vm2104_vm6 = vweird.f32 %v5948_v34  ;;  %4592 = vrsqrt.f32 %v6098_v55  ;;  %v2102_v42 = vmul.f32 %v5948_v34, %v2101_v51 }
 0x30c   :  { %v1278_v4 = vpop.xlane.xlu0 %1277  ;;  %vm2103_vm7 = vweird.f32 %v5901_v15  ;;  %v2070_v54 = vmul.f32 0.5, %v2069_v40  ;;  %v2080_v46 = vmul.f32 0.5, %v2079_v50  ;;  %v1363_v5 = vsub.f32 1.5, %v1362_v27  ;;  %v1280_v20 = vpop.xlane.xlu1 %1279 }
 0x30d   :  { %v1282_v11 = vpop.xlane.xlu2 %1281  ;;  %vm2073_vm9 = vweird.f32 %v5957_v52  ;;  %vm2083_vm10 = vweird.f32 %v5973_v29  ;;  %v1391_v51 = vmul.f32 %v6104_v37, %v1390_v12  ;;  %v2314_v15 = vpack.c.bf16 %v6124_v33, %v6119_v31  ;;  %vm6150_vm11 = vmor %vm2103_vm7, %vm2104_vm6 }
 0x30e   :  { %vm1365_vm12 = vweird.f32 %v5935_v8  ;;  %v1380_v56 = vmul.f32 %v6127_v39, %v6051_v30  ;;  %v1372_v27 = vmul.f32 0.5, %v1371_v62  ;;  %v2096_v12 = vsel %vm6137_vm8, %v5941_v14, %v2092_v45 }
 0x30f   :  { %v6146_v40 = vpop.eup %4588  ;;  %vm2074_vm13 = vweird.f32 %v6037_v0  ;;  %vm2084_vm14 = vweird.f32 %v6043_v24  ;;  %v2106_v1 = vsel %vm6150_vm11, %v5948_v34, %v2102_v42  ;;  %v6165_v26 = vadd.f32 1e-12, %v1278_v4  ;;  %v8049_v34 = vld [vmem:[#allocation22_spill] sm:$0xff] }
 0x310   :  { %v6167_v22 = vpop.eup %4590  ;;  %v2071_v61 = vsub.f32 1.5, %v2070_v54  ;;  %v2081_v3 = vsub.f32 1.5, %v2080_v46  ;;  %v1364_v62 = vmul.f32 %v6019_v58, %v1363_v5  ;;  %vm1366_vm15 = vweird.f32 %v6019_v58  ;;  %vm2075_vm4 = vmor %vm2073_vm9, %vm2074_vm13  ;;  %v8052_v5 = vld [vmem:[#allocation25_spill] sm:$0xff] }
 0x311   :  { %v6171_v63 = vpop.eup %4592  ;;  %v1392_v14 = vmul.f32 0.5, %v1391_v51  ;;  %v1400_v45 = vmul.f32 %v6146_v40, %v6076_v41  ;;  %v6176_v50 = vmul.f32 %v2096_v12, %v8048_v28  ;;  %v6179_v4 = vmul.f32 %v2106_v1, %v8049_v34  ;;  %vm6194_vm3 = vmor %vm1365_vm12, %vm1366_vm15 }
 0x312   :  { %2337 = vmatpush.bf16.xpose.msrb.mxu0 %v2314_v15  ;;  %s4492_s4 = spop %4491  ;;  %v1381_v42 = vmul.f32 %v6127_v39, %v1380_v56  ;;  %v1373_v54 = vsub.f32 1.5, %v1372_v27  ;;  %vm1376_vm0 = vweird.f32 %v6094_v47  ;;  %vm1395_vm1 = vweird.f32 %v6048_v21  ;;  %vm2085_vm5 = vmor %vm2083_vm10, %vm2084_vm14 }
 0x313   :  { %vm1396_vm2 = vweird.f32 %v6104_v37  ;;  %v2323_v46 = vpack.c.bf16 %v6179_v4, %v6176_v50  ;;  %s2264_s13 = smin.f32 %s5113_s12, %s4492_s4  ;;  %v6187_v28 = vadd.f32 1e-12, %v1280_v20  ;;  %4594 = vrsqrt.f32 %v6165_v26 }
 0x314   :  { %v1410_v51 = vmul.f32 %v6167_v22, %v6092_v10  ;;  %v1420_v15 = vmul.f32 %v6171_v63, %v6098_v55  ;;  %v6202_v56 = vadd.f32 1e-12, %v1282_v11  ;;  %v2072_v20 = vmul.f32 %v6037_v0, %v2071_v61  ;;  %v1284_v27 = vpop.xlane.xlu0 %1283  ;;  %vm6249_vm8 = vmor %vm1395_vm1, %vm1396_vm2 }
 0x315   :  { %v1393_v8 = vsub.f32 1.5, %v1392_v14  ;;  %v1401_v12 = vmul.f32 %v6146_v40, %v1400_v45  ;;  %2425 = vmatpush.bf16.xpose.msrb.mxu1 %v2323_v46  ;;  %v2082_v1 = vmul.f32 %v6043_v24, %v2081_v3  ;;  %v1368_v34 = vsel %vm6194_vm3, %v6019_v58, %v1364_v62  ;;  %v1286_v14 = vpop.xlane.xlu1 %1285  ;;  %v1288_v45 = vpop.xlane.xlu2 %1287  ;;  %v4970_v62 = vld [vmem:[#allocation3] sm:$0xff] }
 0x316   :  { %v1374_v61 = vmul.f32 %v6094_v47, %v1373_v54  ;;  %v6219_v11 = vstv %s2264_s13  ;;  %4596 = vrsqrt.f32 %v6202_v56  ;;  %v2076_v52 = vsel %vm2075_vm4, %v6037_v0, %v2072_v20 }
 0x317   :  { %v1382_v3 = vmul.f32 0.5, %v1381_v42  ;;  %v2086_v46 = vsel %vm2085_vm5, %v6043_v24, %v2082_v1  ;;  %v6225_v58 = vmul.f32 %v2076_v52, %v8052_v5  ;;  %v1679_v35 = vmul.f32 %v4970_v62, %v1368_v34 }
 0x318   :  { %vm1375_vm6 = vweird.f32 %v6041_v19  ;;  %v1411_v29 = vmul.f32 %v6167_v22, %v1410_v51  ;;  %v1421_v54 = vmul.f32 %v6171_v63, %v1420_v15  ;;  %v6231_v53 = vmul.f32 %v2086_v46, %v8053_v18  ;;  %v4971_v46 = vld [vmem:[#allocation3 + $0x8] sm:$0xff] }
 0x319   :  { %v6233_v0 = vpop.eup %4594  ;;  %vm6237_vm7 = vmor %vm1375_vm6, %vm1376_vm0  ;;  %v1394_v42 = vmul.f32 %v6104_v37, %v1393_v8  ;;  %v1402_v20 = vmul.f32 0.5, %v1401_v12  ;;  %v2266_v19 = vmul.f32 %v6219_v11, %v1679_v35  ;;  %v6243_v1 = vadd.f32 1e-12, %v1284_v27 }
 0x31a   :  { %4598 = vrsqrt.f32 %v6187_v28  ;;  %v2322_v51 = vpack.c.bf16 %v6231_v53, %v6225_v58  ;;  %v6256_v15 = vadd.f32 1e-12, %v1286_v14  ;;  %v1378_v35 = vsel %vm6237_vm7, %v6094_v47, %v1374_v61 }
 0x31b   :  { %v1383_v27 = vsub.f32 1.5, %v1382_v3  ;;  %vm1385_vm9 = vweird.f32 %v6051_v30  ;;  %v3634_v21 = vmul.f32 %v2266_v19, %v6119_v31  ;;  %v1422_v12 = vmul.f32 0.5, %v1421_v54  ;;  %v4972_v54 = vld [vmem:[#allocation3 + $0x18] sm:$0xff] }
 0x31c   :  { %v6263_v8 = vpop.eup %4596  ;;  %v1430_v34 = vmul.f32 %v6233_v0, %v6165_v26  ;;  %v6267_v52 = vadd.f32 1e-12, %v1288_v45  ;;  %v1680_v14 = vmul.f32 %v4971_v46, %v1378_v35  ;;  %v1403_v5 = vsub.f32 1.5, %v1402_v20  ;;  %v1290_v45 = vpop.xlane.xlu0 %1289  ;;  %v4974_v35 = vld [vmem:[#allocation3 + $0x20] sm:$0xff] }
 0x31d   :  { %v1450_v62 = vmul.f32 %v6263_v8, %v6202_v56  ;;  %2426 = vmatpush.bf16.xpose.msrb.mxu1 %v2322_v51  ;;  %3666 = vadd.xlane.f32.xlu0 %v3634_v21  ;;  %4600 = vrsqrt.f32 %v6243_v1  ;;  %v1398_v47 = vsel %vm6249_vm8, %v6104_v37, %v1394_v42  ;;  %vm1386_vm10 = vweird.f32 %v6127_v39  ;;  %v1292_v18 = vpop.xlane.xlu1 %1291  ;;  %v1294_v51 = vpop.xlane.xlu2 %1293 }
 0x31e   :  { %v1412_v31 = vmul.f32 0.5, %v1411_v29  ;;  %4602 = vrsqrt.f32 %v6256_v15  ;;  %v2267_v61 = vmul.f32 %v6219_v11, %v1680_v14  ;;  %v1384_v3 = vmul.f32 %v6127_v39, %v1383_v27  ;;  %vm6290_vm13 = vmor %vm1385_vm9, %vm1386_vm10 }
 0x31f   :  { %vm1405_vm11 = vweird.f32 %v6076_v41  ;;  %vm1406_vm12 = vweird.f32 %v6146_v40  ;;  %v1682_v24 = vmul.f32 %v4972_v54, %v1398_v47  ;;  %v1431_v37 = vmul.f32 %v6233_v0, %v1430_v34 }
 0x320   :  { %v6281_v20 = vpop.eup %4598  ;;  %4604 = vrsqrt.f32 %v6267_v52  ;;  %v3635_v29 = vmul.f32 %v2267_v61, %v6124_v33  ;;  %v2298_v42 = vpack.c.bf16 %v2267_v61, %v2266_v19  ;;  %v1404_v27 = vmul.f32 %v6146_v40, %v1403_v5  ;;  %vm6304_vm15 = vmor %vm1405_vm11, %vm1406_vm12 }
 0x321   :  { %v1423_v21 = vsub.f32 1.5, %v1422_v12  ;;  %v1451_v34 = vmul.f32 %v6263_v8, %v1450_v62  ;;  %v6297_v46 = vmul.f32 %v6219_v11, %v1682_v24  ;;  %v1413_v33 = vsub.f32 1.5, %v1412_v31 }
 0x322   :  { %vm1415_vm14 = vweird.f32 %v6092_v10  ;;  %3668 = vadd.xlane.f32.xlu1 %v3635_v29  ;;  %2338 = vmatmul.bf16.vlgmr.msrb.gmra.mxu0 %v2298_v42  ;;  %vm1425_vm0 = vweird.f32 %v6098_v55  ;;  %vm1426_vm1 = vweird.f32 %v6171_v63  ;;  %v1440_v12 = vmul.f32 %v6281_v20, %v6187_v28  ;;  %v4973_v29 = vld [vmem:[#allocation3 + $0x10] sm:$0xff] }
 0x323   :  { %v6308_v19 = vpop.eup %4600  ;;  %v3637_v14 = vmul.f32 %v6297_v46, %v6083_v44  ;;  %vm1416_vm2 = vweird.f32 %v6167_v22  ;;  %v1432_v41 = vmul.f32 0.5, %v1431_v37  ;;  %v6319_v62 = vadd.f32 1e-12, %v1290_v45  ;;  %vm6337_vm3 = vmor %vm1425_vm0, %vm1426_vm1 }
 0x324   :  { %v6316_v5 = vpop.eup %4602  ;;  %2427 = vmatmul.bf16.vlgmr.msrb.gmra.mxu1 %v2298_v42  ;;  %v6321_v47 = vadd.f32 1e-12, %v1294_v51  ;;  %v1424_v31 = vmul.f32 %v6171_v63, %v1423_v21  ;;  %v1452_v61 = vmul.f32 0.5, %v1451_v34  ;;  %v1388_v54 = vsel %vm6290_vm13, %v6127_v39, %v1384_v3  ;;  %v1296_v21 = vpop.xlane.xlu0 %1295  ;;  %vm6362_vm6 = vmor %vm1415_vm14, %vm1416_vm2 }
 0x325   :  { %3672 = vadd.xlane.f32.xlu0 %v3637_v14  ;;  %v1408_v44 = vsel %vm6304_vm15, %v6146_v40, %v1404_v27  ;;  %v1414_v37 = vmul.f32 %v6167_v22, %v1413_v33  ;;  %vm1435_vm4 = vweird.f32 %v6165_v26  ;;  %v1460_v39 = vmul.f32 %v6308_v19, %v6243_v1  ;;  %v1300_v45 = vpop.xlane.xlu2 %1299 }
 0x326   :  { %v6330_v24 = vpop.eup %4604  ;;  %4606 = vrsqrt.f32 %v6319_v62  ;;  %v1441_v40 = vmul.f32 %v6281_v20, %v1440_v12  ;;  %v1470_v3 = vmul.f32 %v6316_v5, %v6256_v15  ;;  %v1681_v55 = vmul.f32 %v4973_v29, %v1388_v54 }
 0x327   :  { %4608 = vrsqrt.f32 %v6321_v47  ;;  %v1433_v42 = vsub.f32 1.5, %v1432_v41  ;;  %vm1455_vm5 = vweird.f32 %v6202_v56  ;;  %v6350_v51 = vadd.f32 1e-12, %v1292_v18  ;;  %v4976_v18 = vld [vmem:[#allocation3 + $0x28] sm:$0xff] }
 0x328   :  { %v1683_v27 = vmul.f32 %v4974_v35, %v1408_v44  ;;  %v1453_v34 = vsub.f32 1.5, %v1452_v61  ;;  %v1480_v33 = vmul.f32 %v6330_v24, %v6267_v52  ;;  %v2268_v30 = vmul.f32 %v6219_v11, %v1681_v55  ;;  %v4975_v61 = vld [vmem:[#allocation3 + $0x30] sm:$0xff]  ;;  %v1298_v44 = vpop.xlane.xlu1 %1297 }
 0x329   :  { %v1428_v12 = vsel %vm6337_vm3, %v6171_v63, %v1424_v31  ;;  %vm1436_vm7 = vweird.f32 %v6233_v0  ;;  %v1461_v14 = vmul.f32 %v6308_v19, %v1460_v39  ;;  %v1442_v63 = vmul.f32 0.5, %v1441_v40 }
 0x32a   :  { %v6369_v41 = vmul.f32 %v6219_v11, %v1683_v27  ;;  %v1685_v54 = vmul.f32 %v4975_v61, %v1428_v12  ;;  %vm1456_vm8 = vweird.f32 %v6263_v8  ;;  %v1471_v10 = vmul.f32 %v6316_v5, %v1470_v3  ;;  %vm6391_vm9 = vmor %vm1435_vm4, %vm1436_vm7 }
 0x32b   :  { %v3636_v31 = vmul.f32 %v2268_v30, %v6074_v38  ;;  %4610 = vrsqrt.f32 %v6350_v51  ;;  %v6382_v35 = vadd.f32 1e-12, %v1296_v21  ;;  %v1434_v40 = vmul.f32 %v6233_v0, %v1433_v42  ;;  %vm6405_vm11 = vmor %vm1455_vm5, %vm1456_vm8 }
 0x32c   :  { %v6374_v29 = vpop.eup %4606  ;;  %v3638_v39 = vmul.f32 %v6369_v41, %v6005_v25  ;;  %v6380_v55 = vmul.f32 %v6219_v11, %v1685_v54  ;;  %v1454_v3 = vmul.f32 %v6263_v8, %v1453_v34  ;;  %v1481_v25 = vmul.f32 %v6330_v24, %v1480_v33 }
 0x32d   :  { %v6384_v27 = vpop.eup %4608  ;;  %3670 = vadd.xlane.f32.xlu1 %v3636_v31  ;;  %v1418_v21 = vsel %vm6362_vm6, %v6167_v22, %v1414_v37  ;;  %vm1445_vm10 = vweird.f32 %v6187_v28  ;;  %v1462_v42 = vmul.f32 0.5, %v1461_v14  ;;  %v6411_v33 = vadd.f32 1e-12, %v1300_v45 }
 0x32e   :  { %3674 = vadd.xlane.f32.xlu2 %v3638_v39  ;;  %v3640_v34 = vmul.f32 %v6380_v55, %v5865_v59  ;;  %v1443_v12 = vsub.f32 1.5, %v1442_v63  ;;  %vm1446_vm12 = vweird.f32 %v6281_v20  ;;  %v1490_v22 = vmul.f32 %v6374_v29, %v6319_v62 }
 0x32f   :  { %4612 = vrsqrt.f32 %v6382_v35  ;;  %v1472_v56 = vmul.f32 0.5, %v1471_v10  ;;  %vm1465_vm13 = vweird.f32 %v6243_v1  ;;  %v1510_v37 = vmul.f32 %v6384_v27, %v6321_v47  ;;  %vm6456_vm0 = vmor %vm1445_vm10, %vm1446_vm12 }
 0x330   :  { %3678 = vadd.xlane.f32.xlu0 %v3640_v34  ;;  %v1684_v14 = vmul.f32 %v4976_v18, %v1418_v21  ;;  %v1482_v59 = vmul.f32 0.5, %v1481_v25  ;;  %v1438_v61 = vsel %vm6391_vm9, %v6233_v0, %v1434_v40  ;;  %v2299_v54 = vpack.c.bf16 %v6297_v46, %v2268_v30  ;;  %v1302_v25 = vpop.xlane.xlu0 %1301  ;;  %v4977_v46 = vld [vmem:[#allocation3 + $0x38] sm:$0xff]  ;;  %v1304_v26 = vpop.xlane.xlu1 %1303 }
 0x331   :  { %v1458_v45 = vsel %vm6405_vm11, %v6263_v8, %v1454_v3  ;;  %v6427_v63 = vpop.eup %4610  ;;  %v1463_v10 = vsub.f32 1.5, %v1462_v42  ;;  %v6429_v31 = vadd.f32 1e-12, %v1298_v44  ;;  %4614 = vrsqrt.f32 %v6411_v33  ;;  %v4978_v8 = vld [vmem:[#allocation3 + $0x48] sm:$0xff]  ;;  %v1306_v42 = vpop.xlane.xlu2 %1305 }
 0x332   :  { %v6433_v39 = vmul.f32 %v6219_v11, %v1684_v14  ;;  %v1444_v38 = vmul.f32 %v6281_v20, %v1443_v12  ;;  %vm1475_vm14 = vweird.f32 %v6256_v15  ;;  %v1491_v0 = vmul.f32 %v6374_v29, %v1490_v22  ;;  %2343 = vmatmul.bf16.gmra.mxu0 %v2299_v54 }
 0x333   :  { %v1686_v30 = vmul.f32 %v4977_v46, %v1438_v61  ;;  %v1688_v40 = vmul.f32 %v4978_v8, %v1458_v45  ;;  %v1473_v3 = vsub.f32 1.5, %v1472_v56  ;;  %vm1466_vm15 = vweird.f32 %v6308_v19  ;;  %v4979_v8 = vld [vmem:[#allocation3 + $0x40] sm:$0xff] }
 0x334   :  { %v1511_v44 = vmul.f32 %v6384_v27, %v1510_v37  ;;  %v3639_v21 = vmul.f32 %v6433_v39, %v6001_v17  ;;  %2432 = vmatmul.bf16.gmra.mxu1 %v2299_v54  ;;  %v1483_v12 = vsub.f32 1.5, %v1482_v59  ;;  %v1500_v22 = vmul.f32 %v6427_v63, %v6350_v51  ;;  %vm6469_vm2 = vmor %vm1465_vm13, %vm1466_vm15 }
 0x335   :  { %v6442_v34 = vpop.eup %4612  ;;  %v6447_v18 = vmul.f32 %v6219_v11, %v1686_v30  ;;  %v6450_v56 = vmul.f32 %v6219_v11, %v1688_v40  ;;  %v1464_v37 = vmul.f32 %v6308_v19, %v1463_v10  ;;  %vm1485_vm1 = vweird.f32 %v6267_v52 }
 0x336   :  { %4616 = vrsqrt.f32 %v6429_v31  ;;  %3676 = vadd.xlane.f32.xlu1 %v3639_v21  ;;  %v6463_v14 = vadd.f32 1e-12, %v1302_v25  ;;  %vm1486_vm3 = vweird.f32 %v6330_v24  ;;  %v1492_v28 = vmul.f32 0.5, %v1491_v0 }
 0x337   :  { %v3641_v61 = vmul.f32 %v6447_v18, %v5869_v6  ;;  %v3643_v54 = vmul.f32 %v6450_v56, %v5835_v60  ;;  %v6478_v45 = vpop.eup %4614  ;;  %v6481_v10 = vmul.f32 %v6316_v5, %v1473_v3  ;;  %vm1476_vm4 = vweird.f32 %v6316_v5  ;;  %vm6497_vm5 = vmor %vm1485_vm1, %vm1486_vm3 }
 0x338   :  { %v1512_v1 = vmul.f32 0.5, %v1511_v44  ;;  %v1520_v25 = vmul.f32 %v6442_v34, %v6382_v35  ;;  %v1484_v46 = vmul.f32 %v6330_v24, %v1483_v12  ;;  %v1501_v0 = vmul.f32 %v6427_v63, %v1500_v22  ;;  %v1308_v59 = vpop.xlane.xlu0 %1307  ;;  %vm6530_vm8 = vmor %vm1475_vm14, %vm1476_vm4 }
 0x339   :  { %3680 = vadd.xlane.f32.xlu2 %v3641_v61  ;;  %3684 = vadd.xlane.f32.xlu0 %v3643_v54  ;;  %v6488_v6 = vadd.f32 1e-12, %v1306_v42  ;;  %v1448_v60 = vsel %vm6456_vm0, %v6281_v20, %v1444_v38  ;;  %vm1495_vm6 = vweird.f32 %v6319_v62  ;;  %4618 = vrsqrt.f32 %v6463_v14  ;;  %v4980_v20 = vld [vmem:[#allocation3 + $0x50] sm:$0xff]  ;;  %v4981_v54 = vld [vmem:[#allocation3 + $0x60] sm:$0xff] }
 0x33a   :  { %v1687_v40 = vmul.f32 %v4979_v8, %v1448_v60  ;;  %v1468_v3 = vsel %vm6469_vm2, %v6308_v19, %v1464_v37  ;;  %v1493_v44 = vsub.f32 1.5, %v1492_v28  ;;  %vm1515_vm7 = vweird.f32 %v6321_v47 }
 0x33b   :  { %v1540_v52 = vmul.f32 %v6478_v45, %v6411_v33  ;;  %v1689_v38 = vmul.f32 %v4980_v20, %v1468_v3  ;;  %v1513_v42 = vsub.f32 1.5, %v1512_v1  ;;  %v1521_v12 = vmul.f32 %v6442_v34, %v1520_v25  ;;  %v1310_v25 = vpop.xlane.xlu1 %1309 }
 0x33c   :  { %v6509_v21 = vpop.eup %4616  ;;  %v6512_v22 = vadd.f32 1e-12, %v1304_v26  ;;  %v6515_v17 = vmul.f32 %v6219_v11, %v1687_v40  ;;  %v6517_v19 = vmul.f32 0.5, %v1501_v0  ;;  %4620 = vrsqrt.f32 %v6488_v6  ;;  %v1312_v0 = vpop.xlane.xlu2 %1311 }
 0x33d   :  { %v6521_v37 = vmul.f32 %v6219_v11, %v1689_v38  ;;  %v1488_v28 = vsel %vm6497_vm5, %v6330_v24, %v1484_v46  ;;  %vm1496_vm9 = vweird.f32 %v6374_v29  ;;  %vm1516_vm10 = vweird.f32 %v6384_v27 }
 0x33e   :  { %v3642_v61 = vmul.f32 %v6515_v17, %v5823_v32  ;;  %v1691_v1 = vmul.f32 %v4981_v54, %v1488_v28  ;;  %v1494_v24 = vmul.f32 %v6374_v29, %v1493_v44  ;;  %v1530_v15 = vmul.f32 %v6509_v21, %v6429_v31  ;;  %vm6555_vm11 = vmor %vm1495_vm6, %vm1496_vm9 }
 0x33f   :  { %v1541_v46 = vmul.f32 %v6478_v45, %v1540_v52  ;;  %v3644_v60 = vmul.f32 %v6521_v37, %v5755_v43  ;;  %v6544_v30 = vpop.eup %4618  ;;  %v1514_v8 = vmul.f32 %v6384_v27, %v1513_v42  ;;  %v1522_v40 = vmul.f32 0.5, %v1521_v12  ;;  %vm6576_vm14 = vmor %vm1515_vm7, %vm1516_vm10 }
 0x340   :  { %4622 = vrsqrt.f32 %v6512_v22  ;;  %3682 = vadd.xlane.f32.xlu1 %v3642_v61  ;;  %v6549_v32 = vmul.f32 %v6219_v11, %v1691_v1  ;;  %v6559_v43 = vadd.f32 1e-12, %v1310_v25  ;;  %v6561_v44 = vadd.f32 1e-12, %v1308_v59 }
 0x341   :  { %3686 = vadd.xlane.f32.xlu2 %v3644_v60  ;;  %v6563_v52 = vadd.f32 1e-12, %v1312_v0  ;;  %v1478_v20 = vsel %vm6530_vm8, %v6316_v5, %v6481_v10  ;;  %v1503_v38 = vsub.f32 1.5, %v6517_v19  ;;  %vm1505_vm12 = vweird.f32 %v6350_v51  ;;  %v4982_v19 = vld [vmem:[#allocation3 + $0x58] sm:$0xff]  ;;  %v4983_v0 = vld [vmem:[#allocation3 + $0x68] sm:$0xff] }
 0x342   :  { %vm1506_vm13 = vweird.f32 %v6427_v63  ;;  %v3646_v42 = vmul.f32 %v6549_v32, %v5675_v7  ;;  %v6582_v12 = vpop.eup %4620  ;;  %vm1525_vm15 = vweird.f32 %v6382_v35  ;;  %v1542_v5 = vmul.f32 0.5, %v1541_v46  ;;  %v4984_v46 = vld [vmem:[#allocation3 + $0x78] sm:$0xff] }
 0x343   :  { %v1550_v10 = vmul.f32 %v6544_v30, %v6463_v14  ;;  %4624 = vrsqrt.f32 %v6561_v44  ;;  %v1531_v59 = vmul.f32 %v6509_v21, %v1530_v15  ;;  %v1523_v47 = vsub.f32 1.5, %v1522_v40  ;;  %vm6624_vm2 = vmor %vm1505_vm12, %vm1506_vm13 }
 0x344   :  { %3690 = vadd.xlane.f32.xlu0 %v3646_v42  ;;  %4626 = vrsqrt.f32 %v6563_v52  ;;  %v1690_v28 = vmul.f32 %v4982_v19, %v1478_v20  ;;  %v1498_v7 = vsel %vm6555_vm11, %v6374_v29, %v1494_v24  ;;  %v2300_v26 = vpack.c.bf16 %v6433_v39, %v6369_v41  ;;  %v1314_v29 = vpop.xlane.xlu0 %1313 }
 0x345   :  { %4628 = vrsqrt.f32 %v6559_v43  ;;  %v1518_v61 = vsel %vm6576_vm14, %v6384_v27, %v1514_v8  ;;  %v1570_v1 = vmul.f32 %v6582_v12, %v6488_v6  ;;  %v1692_v15 = vmul.f32 %v4983_v0, %v1498_v7 }
 0x346   :  { %v6599_v54 = vpop.eup %4622  ;;  %v6604_v25 = vmul.f32 %v6219_v11, %v1690_v28  ;;  %v1694_v60 = vmul.f32 %v4984_v46, %v1518_v61  ;;  %vm1526_vm0 = vweird.f32 %v6442_v34  ;;  %v1543_v41 = vsub.f32 1.5, %v1542_v5  ;;  %2348 = vmatmul.bf16.gmra.mxu0 %v2300_v26  ;;  %2437 = vmatmul.bf16.gmra.mxu1 %v2300_v26 }
 0x347   :  { %vm1545_vm1 = vweird.f32 %v6411_v33  ;;  %v1551_v27 = vmul.f32 %v6544_v30, %v1550_v10  ;;  %v1504_v39 = vmul.f32 %v6427_v63, %v1503_v38  ;;  %v6613_v8 = vmul.f32 %v6219_v11, %v1692_v15  ;;  %vm6640_vm4 = vmor %vm1525_vm15, %vm1526_vm0  ;;  %v4985_v15 = vld [vmem:[#allocation3 + $0x70] sm:$0xff] }
 0x348   :  { %v3645_v24 = vmul.f32 %v6604_v25, %v5758_v2  ;;  %v6616_v40 = vmul.f32 %v6219_v11, %v1694_v60  ;;  %v1524_v38 = vmul.f32 %v6442_v34, %v1523_v47  ;;  %vm1546_vm3 = vweird.f32 %v6478_v45 }
 0x349   :  { %v6618_v3 = vpop.eup %4624  ;;  %v1560_v2 = vmul.f32 %v6599_v54, %v6512_v22  ;;  %v6632_v62 = vadd.f32 1e-12, %v1314_v29  ;;  %v1532_v5 = vmul.f32 0.5, %v1531_v59  ;;  %v1571_v10 = vmul.f32 %v6582_v12, %v1570_v1  ;;  %vm6655_vm6 = vmor %vm1545_vm1, %vm1546_vm3 }
 0x34a   :  { %v6634_v42 = vpop.eup %4626  ;;  %3688 = vadd.xlane.f32.xlu1 %v3645_v24  ;;  %v3647_v47 = vmul.f32 %v6613_v8, %v5657_v49  ;;  %v1544_v28 = vmul.f32 %v6478_v45, %v1543_v41  ;;  %v1552_v7 = vmul.f32 0.5, %v1551_v27  ;;  %v3649_v59 = vmul.f32 %v6616_v40, %v5599_v36  ;;  %v4986_v41 = vld [vmem:[#allocation3 + $0x80] sm:$0xff] }
 0x34b   :  { %v6647_v19 = vpop.eup %4628  ;;  %vm1535_vm5 = vweird.f32 %v6429_v31  ;;  %v1580_v26 = vmul.f32 %v6618_v3, %v6561_v44  ;;  %4630 = vrsqrt.f32 %v6632_v62  ;;  %v1561_v49 = vmul.f32 %v6599_v54, %v1560_v2  ;;  %v4987_v2 = vld [vmem:[#allocation3 + $0x90] sm:$0xff] }
 0x34c   :  { %3692 = vadd.xlane.f32.xlu2 %v3647_v47  ;;  %v1600_v61 = vmul.f32 %v6634_v42, %v6563_v52  ;;  %3696 = vadd.xlane.f32.xlu0 %v3649_v59  ;;  %v1508_v36 = vsel %vm6624_vm2, %v6427_v63, %v1504_v39  ;;  %v1528_v33 = vsel %vm6640_vm4, %v6442_v34, %v1524_v38  ;;  %v1533_v1 = vsub.f32 1.5, %v1532_v5 }
 0x34d   :  { %vm1536_vm7 = vweird.f32 %v6509_v21  ;;  %v1572_v0 = vmul.f32 0.5, %v1571_v10  ;;  %v1693_v46 = vmul.f32 %v4985_v15, %v1508_v36  ;;  %v1553_v60 = vsub.f32 1.5, %v1552_v7 }
 0x34e   :  { %v1590_v29 = vmul.f32 %v6647_v19, %v6559_v43  ;;  %v1695_v27 = vmul.f32 %v4986_v41, %v1528_v33  ;;  %v1548_v63 = vsel %vm6655_vm6, %v6478_v45, %v1544_v28  ;;  %vm1555_vm8 = vweird.f32 %v6463_v14  ;;  %vm6696_vm10 = vmor %vm1535_vm5, %vm1536_vm7 }
 0x34f   :  { %vm1556_vm9 = vweird.f32 %v6544_v30  ;;  %v1581_v34 = vmul.f32 %v6618_v3, %v1580_v26  ;;  %v6681_v39 = vmul.f32 %v6219_v11, %v1693_v46  ;;  %v1562_v24 = vmul.f32 0.5, %v1561_v49 }
 0x350   :  { %v1601_v20 = vmul.f32 %v6634_v42, %v1600_v61  ;;  %v6685_v38 = vmul.f32 %v6219_v11, %v1695_v27  ;;  %v1697_v5 = vmul.f32 %v4987_v2, %v1548_v63  ;;  %v1534_v45 = vmul.f32 %v6509_v21, %v1533_v1  ;;  %vm6710_vm11 = vmor %vm1555_vm8, %vm1556_vm9  ;;  %v4989_v27 = vld [vmem:[#allocation3 + $0x98] sm:$0xff] }
 0x351   :  { %v6687_v51 = vpop.eup %4630  ;;  %v1573_v10 = vsub.f32 1.5, %v1572_v0  ;;  %v3648_v47 = vmul.f32 %v6681_v39, %v5596_v23  ;;  %v1554_v7 = vmul.f32 %v6544_v30, %v1553_v60  ;;  %v1591_v59 = vmul.f32 %v6647_v19, %v1590_v29 }
 0x352   :  { %v1610_v35 = vmul.f32 %v6687_v51, %v6632_v62  ;;  %v3650_v26 = vmul.f32 %v6685_v38, %v6225_v58  ;;  %vm1575_vm12 = vweird.f32 %v6488_v6  ;;  %vm1576_vm13 = vweird.f32 %v6582_v12 }
 0x353   :  { %v1582_v31 = vmul.f32 0.5, %v1581_v34  ;;  %3694 = vadd.xlane.f32.xlu1 %v3648_v47  ;;  %v6717_v49 = vmul.f32 %v6219_v11, %v1697_v5  ;;  %v1563_v61 = vsub.f32 1.5, %v1562_v24  ;;  %v1602_v36 = vmul.f32 0.5, %v1601_v20  ;;  %vm6724_vm15 = vmor %vm1575_vm12, %vm1576_vm13  ;;  %v4990_v5 = vld [vmem:[#allocation3 + $0xa8] sm:$0xff] }
 0x354   :  { %3698 = vadd.xlane.f32.xlu2 %v3650_v26  ;;  %v1574_v58 = vmul.f32 %v6582_v12, %v1573_v10  ;;  %v1611_v14 = vmul.f32 %v6687_v51, %v1610_v35  ;;  %vm1565_vm14 = vweird.f32 %v6512_v22  ;;  %v1592_v1 = vmul.f32 0.5, %v1591_v59  ;;  %v4991_v59 = vld [vmem:[#allocation3 + $0xa0] sm:$0xff] }
 0x355   :  { %v3652_v33 = vmul.f32 %v6717_v49, %v6176_v50  ;;  %v1538_v0 = vsel %vm6696_vm10, %v6509_v21, %v1534_v45  ;;  %v1558_v15 = vsel %vm6710_vm11, %v6544_v30, %v1554_v7  ;;  %vm1566_vm0 = vweird.f32 %v6599_v54  ;;  %v4988_v50 = vld [vmem:[#allocation3 + $0x88] sm:$0xff] }
 0x356   :  { %v1583_v46 = vsub.f32 1.5, %v1582_v31  ;;  %vm1585_vm1 = vweird.f32 %v6561_v44  ;;  %v1696_v60 = vmul.f32 %v4988_v50, %v1538_v0  ;;  %v1564_v29 = vmul.f32 %v6599_v54, %v1563_v61  ;;  %vm6748_vm3 = vmor %vm1565_vm14, %vm1566_vm0 }
 0x357   :  { %3702 = vadd.xlane.f32.xlu0 %v3652_v33  ;;  %v1603_v41 = vsub.f32 1.5, %v1602_v36  ;;  %v1698_v63 = vmul.f32 %v4989_v27, %v1558_v15  ;;  %v2301_v21 = vpack.c.bf16 %v6447_v18, %v6380_v55  ;;  %vm1586_vm2 = vweird.f32 %v6618_v3 }
 0x358   :  { %v1612_v34 = vmul.f32 0.5, %v1611_v14  ;;  %v2283_v30 = vmul.f32 %v6219_v11, %v1696_v60  ;;  %v1578_v24 = vsel %vm6724_vm15, %v6582_v12, %v1574_v58  ;;  %v1593_v2 = vsub.f32 1.5, %v1592_v1  ;;  %vm6763_vm8 = vmor %vm1585_vm1, %vm1586_vm2  ;;  %v4993_v58 = vld [vmem:[#allocation3 + $0xc0] sm:$0xff]  ;;  %v4994_v1 = vld [vmem:[#allocation3 + $0xb8] sm:$0xff] }
 0x359   :  { %vm1605_vm4 = vweird.f32 %v6563_v52  ;;  %vm1606_vm5 = vweird.f32 %v6634_v42  ;;  %2353 = vmatmul.bf16.gmra.mxu0 %v2301_v21  ;;  %2442 = vmatmul.bf16.gmra.mxu1 %v2301_v21  ;;  %v1584_v55 = vmul.f32 %v6618_v3, %v1583_v46  ;;  %v2285_v12 = vmul.f32 %v6219_v11, %v1698_v63  ;;  %v6836_v63 = vpop.xlane.xlu2 %1317 }
 0x35a   :  { %v3651_v18 = vmul.f32 %v2283_v30, %v6231_v53  ;;  %vm1595_vm6 = vweird.f32 %v6559_v43  ;;  %vm1596_vm7 = vweird.f32 %v6647_v19  ;;  %v1604_v52 = vmul.f32 %v6634_v42, %v1603_v41  ;;  %vm6768_vm9 = vmor %vm1605_vm4, %vm1606_vm5 }
 0x35b   :  { %v1700_v45 = vmul.f32 %v4990_v5, %v1578_v24  ;;  %v1613_v10 = vsub.f32 1.5, %v1612_v34  ;;  %v3653_v43 = vmul.f32 %v2285_v12, %v6179_v4  ;;  %v1568_v44 = vsel %vm6748_vm3, %v6599_v54, %v1564_v29  ;;  %vm6778_vm11 = vmor %vm1595_vm6, %vm1596_vm7  ;;  %v4992_v54 = vld [vmem:[#allocation3 + $0xb0] sm:$0xff] }
 0x35c   :  { %3700 = vadd.xlane.f32.xlu1 %v3651_v18  ;;  %v1594_v47 = vmul.f32 %v6647_v19, %v1593_v2  ;;  %vm1615_vm10 = vweird.f32 %v6632_v62  ;;  %vm1616_vm12 = vweird.f32 %v6687_v51  ;;  %v1699_v35 = vmul.f32 %v4991_v59, %v1568_v44  ;;  %v4995_v62 = vld [vmem:[#allocation3 + $0xc8] sm:$0xff] }
 0x35d   :  { %3704 = vadd.xlane.f32.xlu2 %v3653_v43  ;;  %v2287_v7 = vmul.f32 %v6219_v11, %v1700_v45  ;;  %v1588_v4 = vsel %vm6763_vm8, %v6618_v3, %v1584_v55  ;;  %v1608_v23 = vsel %vm6768_vm9, %v6634_v42, %v1604_v52  ;;  %v1614_v31 = vmul.f32 %v6687_v51, %v1613_v10  ;;  %vm1617_vm13 = vmor %vm1615_vm10, %vm1616_vm12 }
 0x35e   :  { %v1701_v26 = vmul.f32 %v4992_v54, %v1588_v4  ;;  %v2286_v36 = vmul.f32 %v6219_v11, %v1699_v35  ;;  %v1703_v14 = vmul.f32 %v4993_v58, %v1608_v23  ;;  %v1598_v3 = vsel %vm6778_vm11, %v6647_v19, %v1594_v47 }
 0x35f   :  { %v3655_v61 = vmul.f32 %v2287_v7, %v6035_v9  ;;  %v1702_v0 = vmul.f32 %v4994_v1, %v1598_v3  ;;  %v1618_v15 = vsel %vm1617_vm13, %v6687_v51, %v1614_v31  ;;  %v2304_v19 = vpack.c.bf16 %v6613_v8, %v6549_v32  ;;  %v8102_v8 = vld [vmem:[#allocation33_spill] sm:$0xff] }
 0x360   :  { %v2288_v33 = vmul.f32 %v6219_v11, %v1701_v26  ;;  %v3654_v42 = vmul.f32 %v2286_v36, %v6027_v48  ;;  %v2290_v9 = vmul.f32 %v6219_v11, %v1703_v14  ;;  %v1704_v46 = vmul.f32 %v4995_v62, %v1618_v15 }
 0x361   :  { %3708 = vadd.xlane.f32.xlu0 %v3655_v61  ;;  %v2289_v60 = vmul.f32 %v6219_v11, %v1702_v0  ;;  %v2305_v29 = vpack.c.bf16 %v6616_v40, %v6681_v39  ;;  %v6813_v51 = vpack.c.bf16 %v2283_v30, %v6685_v38  ;;  %v6816_v41 = vpack.c.bf16 %v2285_v12, %v6717_v49  ;;  %v6828_v39 = vpop.xlane.xlu0 %1319  ;;  %v6830_v38 = vpop.xlane.xlu1 %1315 }
 0x362   :  { %v3656_v6 = vmul.f32 %v2288_v33, %v5933_v57  ;;  %v3658_v50 = vmul.f32 %v2290_v9, %v5894_v16  ;;  %v2291_v48 = vmul.f32 %v6219_v11, %v1704_v46  ;;  %v2302_v57 = vpack.c.bf16 %v6450_v56, %v6515_v17  ;;  %v6842_v2 = vpop.xlane.xlu2 %1323 }
 0x363   :  { %v6818_v16 = vpack.c.bf16 %v2287_v7, %v2286_v36  ;;  %v3657_v32 = vmul.f32 %v2289_v60, %v5946_v13  ;;  %v6822_v56 = vpack.c.bf16 %v2289_v60, %v2288_v33  ;;  %v2303_v40 = vpack.c.bf16 %v6604_v25, %v6521_v37 }
 0x364   :  { %3706 = vadd.xlane.f32.xlu1 %v3654_v42  ;;  %v3659_v27 = vmul.f32 %v2291_v48, %v8102_v8  ;;  %v6824_v17 = vpack.c.bf16 %v2291_v48, %v2290_v9  ;;  %v2541_v34 = vlaneseq  ;;  %vm3762_vm14 = vcmask 7168  }
 0x365   :  { %3710 = vadd.xlane.f32.xlu2 %v3656_v6  ;;  %v5114_v12 = vmov -1e+30  }
 0x366   :  { %v6838_v37 = vand.u32 127, %v2541_v34 }
 0x368   :  { %8103 = vst [vmem:[#allocation20_spill] sm:$0xff] %v6838_v37  ;;  %vm2608_vm15 = vcmp.lt.s32.totalorder %v6838_v37, 8 }
 0x369   :  { %2358 = vmatmul.bf16.gmra.mxu0 %v2302_v57  ;;  %2447 = vmatmul.bf16.gmra.mxu1 %v2302_v57  ;;  %v6832_v49 = vpop.xlane.xlu0 %1325  ;;  %v6834_v13 = vpop.xlane.xlu1 %1321  ;;  %v6847_v22 = vsel %vm2608_vm15, 0.0, %v5114_v12 }
 0x36a   :  { %3714 = vadd.xlane.f32.xlu0 %v3658_v50  ;;  %8104 = vst [vmem:[#allocation23_spill] sm:$0xff] %v6847_v22 }
 0x36c   :  { %3712 = vadd.xlane.f32.xlu1 %v3657_v32 }
 0x36d   :  { %3716 = vadd.xlane.f32.xlu2 %v3659_v27 }
 0x379   :  { %2363 = vmatmul.bf16.gmra.mxu0 %v2303_v40  ;;  %2452 = vmatmul.bf16.gmra.mxu1 %v2303_v40 }
 0x389   :  { %2368 = vmatmul.bf16.gmra.mxu0 %v2304_v19  ;;  %2457 = vmatmul.bf16.gmra.mxu1 %v2304_v19 }
 0x390   :  { %v3667_v21 = vpop.xlane.xlu0 %3666 }
 0x391   :  { %v3883_v25 = vsel %vm3762_vm14, %v3667_v21, 0.0 }
 0x395   :  { %v3669_v30 = vpop.xlane.xlu1 %3668 }
 0x396   :  { %v3852_v24 = vmul.f32 0.0, %v3669_v30 }
 0x398   :  { %v3884_v20 = vsel %vm3762_vm14, %v3852_v24, 0.0  ;;  %v3673_v18 = vpop.xlane.xlu0 %3672 }
 0x399   :  { %v3885_v55 = vadd.f32 %v3884_v20, %v3883_v25  ;;  %2373 = vmatmul.bf16.gmra.mxu0 %v2305_v29  ;;  %2462 = vmatmul.bf16.gmra.mxu1 %v2305_v29  ;;  %v3854_v53 = vmul.f32 0.0, %v3673_v18 }
 0x39b   :  { %v3888_v4 = vsel %vm3762_vm14, %v3854_v53, 0.0 }
 0x39f   :  { %v6849_v52 = vpop.f32.mrf.mxu0 }
 0x3a0   :  { %v3671_v5 = vpop.xlane.xlu1 %3670  ;;  %v6853_v45 = vadd.f32 %v6847_v22, %v6849_v52 }
 0x3a1   :  { %v3853_v10 = vmul.f32 0.0, %v3671_v5  ;;  %v3675_v43 = vpop.xlane.xlu2 %3674  ;;  %v6855_v44 = vpop.f32.mrf.mxu1 }
 0x3a2   :  { %v6858_v47 = vadd.f32 -1e+30, %v6855_v44  ;;  %v3855_v7 = vmul.f32 0.0, %v3675_v43 }
 0x3a3   :  { %v3886_v28 = vsel %vm3762_vm14, %v3853_v10, 0.0  ;;  %v3679_v54 = vpop.xlane.xlu0 %3678 }
 0x3a4   :  { %v3887_v59 = vadd.f32 %v3886_v28, %v3885_v55  ;;  %v2744_v35 = vmax.f32 %v6853_v45, %v6858_v47  ;;  %v3890_v23 = vsel %vm3762_vm14, %v3855_v7, 0.0  ;;  %v3857_v33 = vmul.f32 0.0, %v3679_v54 }
 0x3a6   :  { %v3889_v26 = vadd.f32 %v3888_v4, %v3887_v59  ;;  %2745 = vmax.xlane.f32.xlu1 %v2744_v35  ;;  %v3894_v62 = vsel %vm3762_vm14, %v3857_v33, 0.0 }
 0x3a7   :  { %v6865_v31 = vpop.f32.mrf.mxu0 }
 0x3a8   :  { %v3891_v61 = vadd.f32 %v3890_v23, %v3889_v26  ;;  %v6869_v36 = vadd.f32 %v6847_v22, %v6865_v31 }
 0x3a9   :  { %v3677_v58 = vpop.xlane.xlu1 %3676  ;;  %v2430_v14 = vpop.f32.mrf.mxu1  ;;  %2378 = vmatmul.bf16.gmra.mxu0 %v6813_v51  ;;  %2467 = vmatmul.bf16.gmra.mxu1 %v6813_v51 }
 0x3aa   :  { %v3856_v3 = vmul.f32 0.0, %v3677_v58  ;;  %v6871_v42 = vadd.f32 -1e+30, %v2430_v14 }
 0x3ac   :  { %v3892_v6 = vsel %vm3762_vm14, %v3856_v3, 0.0  ;;  %v3681_v9 = vpop.xlane.xlu2 %3680  ;;  %v2747_v1 = vmax.f32 %v6869_v36, %v6871_v42  ;;  %v3685_v46 = vpop.xlane.xlu0 %3684 }
 0x3ad   :  { %v3893_v0 = vadd.f32 %v3892_v6, %v3891_v61  ;;  %v3858_v15 = vmul.f32 0.0, %v3681_v9  ;;  %v3860_v8 = vmul.f32 0.0, %v3685_v46 }
 0x3ae   :  { %2748 = vmax.xlane.f32.xlu2 %v2747_v1 }
 0x3af   :  { %v3895_v50 = vadd.f32 %v3894_v62, %v3893_v0  ;;  %v3896_v60 = vsel %vm3762_vm14, %v3858_v15, 0.0  ;;  %v2344_v19 = vpop.f32.mrf.mxu0  ;;  %v3900_v25 = vsel %vm3762_vm14, %v3860_v8, 0.0 }
 0x3b0   :  { %v6881_v57 = vadd.f32 %v6847_v22, %v2344_v19  ;;  %v6902_v54 = vadd.f32 -1e+30, %v2344_v19 }
 0x3b1   :  { %v3897_v48 = vadd.f32 %v3896_v60, %v3895_v50  ;;  %v2433_v29 = vpop.f32.mrf.mxu1 }
 0x3b2   :  { %v6883_v51 = vadd.f32 -1e+30, %v2433_v29 }
 0x3b3   :  { %v3683_v32 = vpop.xlane.xlu1 %3682 }
 0x3b4   :  { %v3859_v27 = vmul.f32 0.0, %v3683_v32  ;;  %v3687_v40 = vpop.xlane.xlu2 %3686  ;;  %v2750_v21 = vmax.f32 %v6881_v57, %v6883_v51  ;;  %v6922_v32 = vadd.f32 1e-12, %v6830_v38 }
 0x3b5   :  { %v3861_v30 = vmul.f32 0.0, %v3687_v40 }
 0x3b6   :  { %v3898_v34 = vsel %vm3762_vm14, %v3859_v27, 0.0  ;;  %2751 = vmax.xlane.f32.xlu0 %v2750_v21  ;;  %4632 = vrsqrt.f32 %v6922_v32  ;;  %vm1625_vm0 = vweird.f32 %v6922_v32 }
 0x3b7   :  { %v3899_v24 = vadd.f32 %v3898_v34, %v3897_v48  ;;  %v6889_v20 = vpop.f32.mrf.mxu0  ;;  %v3691_v55 = vpop.xlane.xlu0 %3690  ;;  %v3902_v53 = vsel %vm3762_vm14, %v3861_v30, 0.0 }
 0x3b8   :  { %v6893_v5 = vadd.f32 %v6847_v22, %v6889_v20  ;;  %v3863_v59 = vmul.f32 0.0, %v3691_v55 }
 0x3b9   :  { %v3901_v18 = vadd.f32 %v3900_v25, %v3899_v24  ;;  %v2435_v12 = vpop.f32.mrf.mxu1  ;;  %2383 = vmatmul.bf16.gmra.mxu0 %v6816_v41  ;;  %2472 = vmatmul.bf16.gmra.mxu1 %v6816_v41  ;;  %v3288_v41 = vmax.f32 %v6849_v52, %v6902_v54  ;;  %v6929_v24 = vadd.f32 1e-12, %v6836_v63 }
 0x3ba   :  { %v6896_v10 = vadd.f32 -1e+30, %v2435_v12  ;;  %v3906_v58 = vsel %vm3762_vm14, %v3863_v59, 0.0 }
 0x3bb   :  { %v3903_v43 = vadd.f32 %v3902_v53, %v3901_v18  ;;  %4634 = vrsqrt.f32 %v6929_v24  ;;  %vm1635_vm2 = vweird.f32 %v6929_v24 }
 0x3bc   :  { %8105 = vst [vmem:[#allocation24_spill] sm:$0xff] %v6896_v10  ;;  %v2753_v28 = vmax.f32 %v6893_v5, %v6896_v10  ;;  %v6941_v59 = vpop.eup %4632 }
 0x3bd   :  { %v3689_v7 = vpop.xlane.xlu1 %3688  ;;  %vm1626_vm1 = vweird.f32 %v6941_v59 }
 0x3be   :  { %v3862_v35 = vmul.f32 0.0, %v3689_v7  ;;  %2754 = vmax.xlane.f32.xlu1 %v2753_v28  ;;  %vm7025_vm4 = vmor %vm1625_vm0, %vm1626_vm1 }
 0x3bf   :  { %v3693_v4 = vpop.xlane.xlu2 %3692  ;;  %v3697_v14 = vpop.xlane.xlu0 %3696 }
 0x3c0   :  { %v3904_v26 = vsel %vm3762_vm14, %v3862_v35, 0.0  ;;  %v3864_v23 = vmul.f32 0.0, %v3693_v4  ;;  %v3866_v19 = vmul.f32 0.0, %v3697_v14 }
 0x3c1   :  { %v3905_v61 = vadd.f32 %v3904_v26, %v3903_v43 }
 0x3c2   :  { %v3908_v3 = vsel %vm3762_vm14, %v3864_v23, 0.0  ;;  %v3912_v21 = vsel %vm3762_vm14, %v3866_v19, 0.0 }
 0x3c3   :  { %v3907_v33 = vadd.f32 %v3906_v58, %v3905_v61  ;;  %v2349_v6 = vpop.f32.mrf.mxu0  ;;  %v2438_v9 = vpop.f32.mrf.mxu1  ;;  %v1620_v58 = vmul.f32 %v6941_v59, %v6922_v32 }
 0x3c4   :  { %v6910_v0 = vadd.f32 %v6847_v22, %v2349_v6  ;;  %v6912_v15 = vadd.f32 -1e+30, %v2349_v6  ;;  %v6914_v62 = vadd.f32 -1e+30, %v2438_v9  ;;  %v6945_v61 = vpop.eup %4634 }
 0x3c5   :  { %v3909_v1 = vadd.f32 %v3908_v3, %v3907_v33  ;;  %vm1636_vm3 = vweird.f32 %v6945_v61 }
 0x3c6   :  { %v3695_v46 = vpop.xlane.xlu1 %3694  ;;  %v6917_v50 = vmax.f32 %v3288_v41, %v6912_v15  ;;  %v2756_v60 = vmax.f32 %v6910_v0, %v6914_v62  ;;  %v6950_v41 = vadd.f32 1e-12, %v6834_v13  ;;  %vm7034_vm5 = vmor %vm1635_vm2, %vm1636_vm3 }
 0x3c7   :  { %v3865_v48 = vmul.f32 0.0, %v3695_v46  ;;  %v3699_v29 = vpop.xlane.xlu2 %3698 }
 0x3c8   :  { %2757 = vmax.xlane.f32.xlu2 %v2756_v60  ;;  %v3867_v27 = vmul.f32 0.0, %v3699_v29  ;;  %v1630_v29 = vmul.f32 %v6945_v61, %v6929_v24  ;;  %vm1655_vm8 = vweird.f32 %v6950_v41 }
 0x3c9   :  { %v3910_v8 = vsel %vm3762_vm14, %v3865_v48, 0.0  ;;  %2388 = vmatmul.bf16.gmra.mxu0 %v6818_v16  ;;  %2477 = vmatmul.bf16.gmra.mxu1 %v6818_v16 }
 0x3ca   :  { %v3911_v40 = vadd.f32 %v3910_v8, %v3909_v1  ;;  %v3703_v25 = vpop.xlane.xlu0 %3702  ;;  %v3914_v12 = vsel %vm3762_vm14, %v3867_v27, 0.0  ;;  %v6963_v8 = vadd.f32 -1e+30, %v6889_v20  ;;  %v6976_v20 = vadd.f32 -1e+30, %v6865_v31 }
 0x3cb   :  { %v2351_v34 = vpop.f32.mrf.mxu0  ;;  %v2440_v30 = vpop.f32.mrf.mxu1  ;;  %v3869_v63 = vmul.f32 0.0, %v3703_v25 }
 0x3cc   :  { %v3913_v55 = vadd.f32 %v3912_v21, %v3911_v40  ;;  %v6931_v18 = vadd.f32 -1e+30, %v2440_v30  ;;  %v6934_v38 = vadd.f32 %v6847_v22, %v2351_v34  ;;  %v1621_v40 = vmul.f32 %v6941_v59, %v1620_v58 }
 0x3cd   :  { %v3918_v23 = vsel %vm3762_vm14, %v3869_v63, 0.0  ;;  %v6967_v21 = vadd.f32 1e-12, %v6828_v39 }
 0x3ce   :  { %v3915_v53 = vadd.f32 %v3914_v12, %v3913_v55  ;;  %v2759_v16 = vmax.f32 %v6934_v38, %v6931_v18  ;;  %v6978_v12 = vadd.f32 -1e+30, %v2351_v34  ;;  %v1622_v31 = vmul.f32 0.5, %v1621_v40 }
 0x3cf   :  { %v3701_v43 = vpop.xlane.xlu1 %3700  ;;  %4636 = vrsqrt.f32 %v6967_v21  ;;  %vm1645_vm6 = vweird.f32 %v6967_v21 }
 0x3d0   :  { %2760 = vmax.xlane.f32.xlu0 %v2759_v16  ;;  %v3868_v28 = vmul.f32 0.0, %v3701_v43  ;;  %v3705_v7 = vpop.xlane.xlu2 %3704  ;;  %v1631_v43 = vmul.f32 %v6945_v61, %v1630_v29  ;;  %4638 = vrsqrt.f32 %v6950_v41 }
 0x3d1   :  { %v3870_v4 = vmul.f32 0.0, %v3705_v7 }
 0x3d2   :  { %v3916_v35 = vsel %vm3762_vm14, %v3868_v28, 0.0 }
 0x3d3   :  { %v3917_v26 = vadd.f32 %v3916_v35, %v3915_v53  ;;  %v3920_v3 = vsel %vm3762_vm14, %v3870_v4, 0.0 }
 0x3d4   :  { %v3709_v14 = vpop.xlane.xlu0 %3708 }
 0x3d5   :  { %v3919_v33 = vadd.f32 %v3918_v23, %v3917_v26  ;;  %v3872_v13 = vmul.f32 0.0, %v3709_v14 }
 0x3d6   :  { %v2354_v6 = vpop.f32.mrf.mxu0  ;;  %v2443_v9 = vpop.f32.mrf.mxu1 }
 0x3d7   :  { %v3921_v1 = vadd.f32 %v3920_v3, %v3919_v33  ;;  %v3707_v46 = vpop.xlane.xlu1 %3706  ;;  %v6954_v60 = vadd.f32 %v6847_v22, %v2354_v6  ;;  %v6956_v19 = vadd.f32 -1e+30, %v2354_v6  ;;  %v6958_v48 = vadd.f32 -1e+30, %v2443_v9 }
 0x3d8   :  { %v3871_v27 = vmul.f32 0.0, %v3707_v46  ;;  %v3711_v30 = vpop.xlane.xlu2 %3710  ;;  %v1632_v3 = vmul.f32 0.5, %v1631_v43 }
 0x3d9   :  { %v3292_v25 = vmax.f32 %v6917_v50, %v6956_v19  ;;  %2393 = vmatmul.bf16.gmra.mxu0 %v6822_v56  ;;  %2482 = vmatmul.bf16.gmra.mxu1 %v6822_v56  ;;  %v2762_v55 = vmax.f32 %v6954_v60, %v6958_v48  ;;  %v3873_v39 = vmul.f32 0.0, %v3711_v30  ;;  %v3289_v50 = vmax.f32 %v6976_v20, %v6963_v8  ;;  %v7003_v30 = vpop.eup %4636 }
 0x3da   :  { %v3922_v53 = vsel %vm3762_vm14, %v3871_v27, 0.0  ;;  %v3924_v56 = vsel %vm3762_vm14, %v3872_v13, 0.0  ;;  %v1623_v13 = vsub.f32 1.5, %v1622_v31  ;;  %vm1646_vm7 = vweird.f32 %v7003_v30 }
 0x3db   :  { %v3923_v16 = vadd.f32 %v3922_v53, %v3921_v1  ;;  %2763 = vmax.xlane.f32.xlu1 %v2762_v55  ;;  %v6988_v34 = vmax.f32 %v3289_v50, %v6978_v12  ;;  %v3926_v7 = vsel %vm3762_vm14, %v3873_v39, 0.0  ;;  %v7005_v53 = vpop.eup %4638  ;;  %v1633_v39 = vsub.f32 1.5, %v1632_v3  ;;  %vm7098_vm10 = vmor %vm1645_vm6, %vm1646_vm7 }
 0x3dc   :  { %v1624_v50 = vmul.f32 %v6941_v59, %v1623_v13  ;;  %vm1656_vm9 = vweird.f32 %v7005_v53 }
 0x3dd   :  { %v3715_v63 = vpop.xlane.xlu0 %3714  ;;  %v3925_v28 = vadd.f32 %v3924_v56, %v3923_v16  ;;  %v1640_v56 = vmul.f32 %v7003_v30, %v6967_v21  ;;  %vm7104_vm11 = vmor %vm1655_vm8, %vm1656_vm9 }
 0x3de   :  { %v2356_v35 = vpop.f32.mrf.mxu0  ;;  %v2445_v4 = vpop.f32.mrf.mxu1  ;;  %v3875_v6 = vmul.f32 0.0, %v3715_v63  ;;  %v1628_v24 = vsel %vm7025_vm4, %v6941_v59, %v1624_v50  ;;  %vm3837_vm4 = vcmask 1040384  }
 0x3df   :  { %v3927_v26 = vadd.f32 %v3926_v7, %v3925_v28  ;;  %v3713_v23 = vpop.xlane.xlu1 %3712  ;;  %v6991_v58 = vadd.f32 -1e+30, %v2356_v35  ;;  %v6993_v14 = vadd.f32 -1e+30, %v2445_v4  ;;  %v6996_v33 = vadd.f32 %v6847_v22, %v2356_v35 }
 0x3e0   :  { %v3874_v9 = vmul.f32 0.0, %v3713_v23  ;;  %v3717_v1 = vpop.xlane.xlu2 %3716  ;;  %v3930_v16 = vsel %vm3762_vm14, %v3875_v6, 0.0  ;;  %v1650_v23 = vmul.f32 %v7005_v53, %v6950_v41 }
 0x3e1   :  { %v3293_v46 = vmax.f32 %v6988_v34, %v6991_v58  ;;  %v2765_v29 = vmax.f32 %v6996_v33, %v6993_v14  ;;  %v3876_v40 = vmul.f32 0.0, %v3717_v1  ;;  %v1641_v1 = vmul.f32 %v7003_v30, %v1640_v56 }
 0x3e2   :  { %v3928_v27 = vsel %vm3762_vm14, %v3874_v9, 0.0  ;;  %v1651_v13 = vmul.f32 %v7005_v53, %v1650_v23 }
 0x3e3   :  { %v3929_v55 = vadd.f32 %v3928_v27, %v3927_v26  ;;  %2766 = vmax.xlane.f32.xlu2 %v2765_v29  ;;  %v3932_v63 = vsel %vm3762_vm14, %v3876_v40, 0.0  ;;  %v1634_v26 = vmul.f32 %v6945_v61, %v1633_v39  ;;  %v7047_v29 = vadd.f32 1e-12, %v6832_v49 }
 0x3e4   :  { %v1642_v27 = vmul.f32 0.5, %v1641_v1  ;;  %v1652_v56 = vmul.f32 0.5, %v1651_v13 }
 0x3e5   :  { %v3931_v43 = vadd.f32 %v3930_v16, %v3929_v55  ;;  %4640 = vrsqrt.f32 %v7047_v29  ;;  %v4996_v55 = vld [vmem:[#allocation3 + $0xd0] sm:$0xff]  ;;  %vm1675_vm12 = vweird.f32 %v7047_v29 }
 0x3e6   :  { %v2359_v28 = vpop.f32.mrf.mxu0  ;;  %v2448_v31 = vpop.f32.mrf.mxu1  ;;  %v1705_v39 = vmul.f32 %v4996_v55, %v1628_v24  ;;  %v1653_v23 = vsub.f32 1.5, %v1652_v56 }
 0x3e7   :  { %v7016_v34 = vadd.f32 %v3932_v63, %v3931_v43  ;;  %v7019_v32 = vadd.f32 %v6847_v22, %v2359_v28  ;;  %v7021_v7 = vadd.f32 -1e+30, %v2359_v28  ;;  %v7023_v35 = vadd.f32 -1e+30, %v2448_v31 }
 0x3e8   :  { %v1643_v28 = vsub.f32 1.5, %v1642_v27  ;;  %v7074_v31 = vmul.f32 %v6219_v11, %v1705_v39  ;;  %v1654_v41 = vmul.f32 %v7005_v53, %v1653_v23 }
 0x3e9   :  { %8106 = vst [vmem:[#allocation21_spill] sm:$0xff] %v7016_v34  ;;  %v7039_v6 = vmax.f32 %v3292_v25, %v7021_v7  ;;  %2398 = vmatmul.bf16.gmra.mxu0 %v6824_v17  ;;  %2487 = vmatmul.bf16.gmra.mxu1 %v6824_v17  ;;  %v2768_v9 = vmax.f32 %v7019_v32, %v7023_v35  ;;  %v7057_v17 = vadd.f32 1e-12, %v6842_v2 }
 0x3ea   :  { %v1638_v25 = vsel %vm7034_vm5, %v6945_v61, %v1634_v26  ;;  %v4997_v61 = vld [vmem:[#allocation3 + $0xd8] sm:$0xff]  ;;  %8111 = vst [vmem:[#allocation22_spill] sm:$0xff] %v7074_v31  ;;  %v1658_v56 = vsel %vm7104_vm11, %v7005_v53, %v1654_v41 }
 0x3eb   :  { %2769 = vmax.xlane.f32.xlu0 %v2768_v9  ;;  %v1706_v50 = vmul.f32 %v4997_v61, %v1638_v25  ;;  %4642 = vrsqrt.f32 %v7057_v17  ;;  %v7079_v26 = vpop.eup %4640  ;;  %vm1665_vm0 = vweird.f32 %v7057_v17 }
 0x3ec   :  { %vm1676_vm13 = vweird.f32 %v7079_v26 }
 0x3ed   :  { %v7077_v4 = vmul.f32 %v6219_v11, %v1706_v50  ;;  %vm7153_vm2 = vmor %vm1675_vm12, %vm1676_vm13 }
 0x3ee   :  { %v2361_v40 = vpop.f32.mrf.mxu0  ;;  %v2450_v49 = vpop.f32.mrf.mxu1 }
 0x3ef   :  { %v7061_v16 = vadd.f32 %v6847_v22, %v2361_v40  ;;  %v7063_v59 = vadd.f32 -1e+30, %v2361_v40  ;;  %v7065_v43 = vadd.f32 -1e+30, %v2450_v49  ;;  %8112 = vst [vmem:[#allocation25_spill] sm:$0xff] %v7077_v4  ;;  %v2311_v21 = vpack.c.bf16 %v7077_v4, %v7074_v31 }
 0x3f0   :  { %v1670_v40 = vmul.f32 %v7079_v26, %v7047_v29 }
 0x3f1   :  { %v7069_v2 = vmax.f32 %v3293_v46, %v7063_v59  ;;  %v2771_v63 = vmax.f32 %v7061_v16, %v7065_v43  ;;  %v1644_v46 = vmul.f32 %v7003_v30, %v1643_v28  ;;  %v7086_v1 = vpop.eup %4642 }
 0x3f2   :  { %v1660_v61 = vmul.f32 %v7086_v1, %v7057_v17  ;;  %vm1666_vm1 = vweird.f32 %v7086_v1 }
 0x3f3   :  { %2772 = vmax.xlane.f32.xlu1 %v2771_v63  ;;  %v1648_v50 = vsel %vm7098_vm10, %v7003_v30, %v1644_v46  ;;  %v1671_v63 = vmul.f32 %v7079_v26, %v1670_v40  ;;  %v4999_v30 = vld [vmem:[#allocation3 + $0xe8] sm:$0xff]  ;;  %vm1667_vm3 = vmor %vm1665_vm0, %vm1666_vm1 }
 0x3f4   :  { %v1708_v46 = vmul.f32 %v4999_v30, %v1658_v56 }
 0x3f6   :  { %v2364_v3 = vpop.f32.mrf.mxu0  ;;  %v2453_v9 = vpop.f32.mrf.mxu1 }
 0x3f7   :  { %v7089_v24 = vadd.f32 %v6847_v22, %v2364_v3  ;;  %v7091_v25 = vadd.f32 -1e+30, %v2364_v3  ;;  %v7093_v13 = vadd.f32 -1e+30, %v2453_v9  ;;  %v4998_v3 = vld [vmem:[#allocation3 + $0xe0] sm:$0xff] }
 0x3f8   :  { %v1707_v9 = vmul.f32 %v4998_v3, %v1648_v50 }
 0x3f9   :  { %8113 = vst [vmem:[#allocation26_spill] sm:$0xff] %v7091_v25  ;;  %v3296_v55 = vmax.f32 %v7039_v6, %v7091_v25  ;;  %2403 = vmatmul.bf16.gmra.mxu0 %v2311_v21  ;;  %2492 = vmatmul.bf16.gmra.mxu1 %v2311_v21  ;;  %v2774_v39 = vmax.f32 %v7089_v24, %v7093_v13 }
 0x3fa   :  { %v1661_v6 = vmul.f32 %v7086_v1, %v1660_v61  ;;  %v7134_v49 = vmul.f32 %v6219_v11, %v1707_v9  ;;  %v7137_v61 = vmul.f32 %v6219_v11, %v1708_v46 }
 0x3fb   :  { %2775 = vmax.xlane.f32.xlu2 %v2774_v39  ;;  %v1672_v39 = vmul.f32 0.5, %v1671_v63 }
 0x3fc   :  { %v1662_v40 = vmul.f32 0.5, %v1661_v6  ;;  %8119 = vst [vmem:[#allocation34_spill] sm:$0xff] %v7134_v49  ;;  %v2312_v3 = vpack.c.bf16 %v7137_v61, %v7134_v49 }
 0x3fd   :  { %8120 = vst [vmem:[#allocation35_spill] sm:$0xff] %v7137_v61  ;;  %v1673_v50 = vsub.f32 1.5, %v1672_v39 }
 0x3fe   :  { %v2366_v28 = vpop.f32.mrf.mxu0  ;;  %v2455_v23 = vpop.f32.mrf.mxu1 }
 0x3ff   :  { %v7123_v21 = vadd.f32 %v6847_v22, %v2366_v28  ;;  %v7125_v34 = vadd.f32 -1e+30, %v2366_v28  ;;  %v7127_v27 = vadd.f32 -1e+30, %v2455_v23  ;;  %v1663_v28 = vsub.f32 1.5, %v1662_v40 }
 0x400   :  { %v1674_v29 = vmul.f32 %v7079_v26, %v1673_v50 }
 0x401   :  { %8118 = vst [vmem:[#allocation33_spill] sm:$0xff] %v7125_v34  ;;  %v3297_v53 = vmax.f32 %v7069_v2, %v7125_v34  ;;  %v2777_v41 = vmax.f32 %v7123_v21, %v7127_v27  ;;  %v1664_v39 = vmul.f32 %v7086_v1, %v1663_v28 }
 0x402   :  { %v1678_v17 = vsel %vm7153_vm2, %v7079_v26, %v1674_v29  ;;  %v5001_v26 = vld [vmem:[#allocation3 + $0xf0] sm:$0xff] }
 0x403   :  { %2778 = vmax.xlane.f32.xlu0 %v2777_v41  ;;  %v1668_v41 = vsel %vm1667_vm3, %v7086_v1, %v1664_v39 }
 0x404   :  { %v1709_v29 = vmul.f32 %v5001_v26, %v1668_v41 }
 0x406   :  { %v2369_v56 = vpop.f32.mrf.mxu0  ;;  %v2458_v63 = vpop.f32.mrf.mxu1 }
 0x407   :  { %v7142_v2 = vadd.f32 %v6847_v22, %v2369_v56  ;;  %v7144_v23 = vadd.f32 -1e+30, %v2369_v56  ;;  %v7146_v6 = vadd.f32 -1e+30, %v2458_v63 }
 0x409   :  { %8121 = vst [vmem:[#allocation36_spill] sm:$0xff] %v7144_v23  ;;  %v7158_v30 = vmax.f32 %v3296_v55, %v7144_v23  ;;  %2408 = vmatmul.bf16.gmra.mxu0 %v2312_v3  ;;  %2497 = vmatmul.bf16.gmra.mxu1 %v2312_v3  ;;  %v2780_v46 = vmax.f32 %v7142_v2, %v7146_v6  ;;  %v5000_v3 = vld [vmem:[#allocation3 + $0xf8] sm:$0xff] }
 0x40a   :  { %v1710_v49 = vmul.f32 %v5000_v3, %v1678_v17 }
 0x40b   :  { %2781 = vmax.xlane.f32.xlu1 %v2780_v46  ;;  %v7183_v46 = vmul.f32 %v6219_v11, %v1709_v29 }
 0x40c   :  { %v7180_v1 = vmul.f32 %v6219_v11, %v1710_v49 }
 0x40d   :  { %8126 = vst [vmem:[#allocation39_spill] sm:$0xff] %v7183_v46 }
 0x40e   :  { %v2371_v40 = vpop.f32.mrf.mxu0  ;;  %v2460_v50 = vpop.f32.mrf.mxu1  ;;  %8125 = vst [vmem:[#allocation38_spill] sm:$0xff] %v7180_v1  ;;  %v2313_v3 = vpack.c.bf16 %v7180_v1, %v7183_v46 }
 0x40f   :  { %v7168_v55 = vadd.f32 %v6847_v22, %v2371_v40  ;;  %v7170_v56 = vadd.f32 -1e+30, %v2371_v40  ;;  %v7172_v63 = vadd.f32 -1e+30, %v2460_v50 }
 0x411   :  { %8124 = vst [vmem:[#allocation37_spill] sm:$0xff] %v7170_v56  ;;  %v7175_v28 = vmax.f32 %v3297_v53, %v7170_v56  ;;  %v2783_v9 = vmax.f32 %v7168_v55, %v7172_v63 }
 0x413   :  { %2784 = vmax.xlane.f32.xlu2 %v2783_v9 }
 0x416   :  { %v2374_v39 = vpop.f32.mrf.mxu0  ;;  %v2463_v40 = vpop.f32.mrf.mxu1 }
 0x417   :  { %v7186_v50 = vadd.f32 %v6847_v22, %v2374_v39  ;;  %v7188_v17 = vadd.f32 -1e+30, %v2374_v39  ;;  %v7190_v53 = vadd.f32 -1e+30, %v2463_v40 }
 0x419   :  { %8127 = vst [vmem:[#allocation40_spill] sm:$0xff] %v7188_v17  ;;  %v7194_v41 = vpop.xlane.xlu1 %2745  ;;  %v3300_v9 = vmax.f32 %v7158_v30, %v7188_v17  ;;  %2413 = vmatmul.bf16.gmra.mxu0 %v2313_v3  ;;  %2502 = vmatmul.bf16.gmra.mxu1 %v2313_v3  ;;  %v2786_v26 = vmax.f32 %v7186_v50, %v7190_v53 }
 0x41a   :  { %8128 = vst [vmem:[#allocation41_spill] sm:$0xff] %v7194_v41  ;;  %v2840_v49 = vsub.f32 %v6853_v45, %v7194_v41  ;;  %v2841_v11 = vsub.f32 %v6858_v47, %v7194_v41 }
 0x41b   :  { %2787 = vmax.xlane.f32.xlu0 %v2786_v26 }
 0x41c   :  { %v2904_v29 = vmul.f32 1.442695, %v2840_v49  ;;  %v2906_v39 = vmul.f32 1.442695, %v2841_v11 }
 0x41e   :  { %4644 = vpow2.f32 %v2904_v29  ;;  %v2376_v40 = vpop.f32.mrf.mxu0  ;;  %v2465_v1 = vpop.f32.mrf.mxu1 }
 0x41f   :  { %4646 = vpow2.f32 %v2906_v39  ;;  %v7205_v45 = vadd.f32 %v6847_v22, %v2376_v40  ;;  %v7207_v61 = vadd.f32 -1e+30, %v2376_v40  ;;  %v7209_v47 = vadd.f32 -1e+30, %v2465_v1 }
 0x421   :  { %8129 = vst [vmem:[#allocation42_spill] sm:$0xff] %v7205_v45  ;;  %v7211_v30 = vpop.xlane.xlu2 %2748  ;;  %v3301_v11 = vmax.f32 %v7175_v28, %v7207_v61  ;;  %v2789_v26 = vmax.f32 %v7205_v45, %v7209_v47 }
 0x422   :  { %8130 = vst [vmem:[#allocation43_spill] sm:$0xff] %v7207_v61  ;;  %v2842_v3 = vsub.f32 %v6869_v36, %v7211_v30  ;;  %v2843_v49 = vsub.f32 %v6871_v42, %v7211_v30 }
 0x423   :  { %8131 = vst [vmem:[#allocation44_spill] sm:$0xff] %v7211_v30  ;;  %2790 = vmax.xlane.f32.xlu1 %v2789_v26 }
 0x424   :  { %v2908_v29 = vmul.f32 1.442695, %v2842_v3  ;;  %v2910_v39 = vmul.f32 1.442695, %v2843_v49  ;;  %v4645_v40 = vpop.eup %4644 }
 0x425   :  { %v4647_v1 = vpop.eup %4646 }
 0x426   :  { %4648 = vpow2.f32 %v2908_v29  ;;  %v2379_v31 = vpop.f32.mrf.mxu0  ;;  %v2468_v46 = vpop.f32.mrf.mxu1  ;;  %v3032_v28 = vadd.f32 %v4647_v1, %v4645_v40 }
 0x427   :  { %4650 = vpow2.f32 %v2910_v39  ;;  %v7222_v36 = vadd.f32 %v6847_v22, %v2379_v31  ;;  %v7224_v37 = vadd.f32 -1e+30, %v2379_v31  ;;  %v7226_v4 = vadd.f32 -1e+30, %v2468_v46 }
 0x429   :  { %8132 = vst [vmem:[#allocation45_spill] sm:$0xff] %v7222_v36  ;;  %v7228_v30 = vpop.xlane.xlu0 %2751  ;;  %v7235_v26 = vmax.f32 %v3300_v9, %v7224_v37  ;;  %v2792_v29 = vmax.f32 %v7222_v36, %v7226_v4 }
 0x42a   :  { %8133 = vst [vmem:[#allocation46_spill] sm:$0xff] %v7224_v37  ;;  %v2844_v3 = vsub.f32 %v6881_v57, %v7228_v30  ;;  %v2845_v49 = vsub.f32 %v6883_v51, %v7228_v30 }
 0x42b   :  { %8134 = vst [vmem:[#allocation47_spill] sm:$0xff] %v7228_v30  ;;  %2793 = vmax.xlane.f32.xlu2 %v2792_v29  ;;  %3033 = vadd.xlane.f32.xlu1 %v3032_v28 }
 0x42c   :  { %v2912_v39 = vmul.f32 1.442695, %v2844_v3  ;;  %v2914_v31 = vmul.f32 1.442695, %v2845_v49  ;;  %v4649_v41 = vpop.eup %4648 }
 0x42d   :  { %v4651_v46 = vpop.eup %4650 }
 0x42e   :  { %4652 = vpow2.f32 %v2912_v39  ;;  %v2381_v40 = vpop.f32.mrf.mxu0  ;;  %v2470_v1 = vpop.f32.mrf.mxu1  ;;  %v3035_v37 = vadd.f32 %v4651_v46, %v4649_v41 }
 0x42f   :  { %4654 = vpow2.f32 %v2914_v31  ;;  %v7240_v57 = vadd.f32 %v6847_v22, %v2381_v40  ;;  %v7242_v30 = vadd.f32 -1e+30, %v2381_v40  ;;  %v7244_v9 = vadd.f32 -1e+30, %v2470_v1 }
 0x431   :  { %8135 = vst [vmem:[#allocation48_spill] sm:$0xff] %v7240_v57  ;;  %v7246_v61 = vpop.xlane.xlu1 %2754  ;;  %v7253_v49 = vmax.f32 %v3301_v11, %v7242_v30  ;;  %v2795_v29 = vmax.f32 %v7240_v57, %v7244_v9 }
 0x432   :  { %8136 = vst [vmem:[#allocation49_spill] sm:$0xff] %v7242_v30  ;;  %v2846_v3 = vsub.f32 %v6893_v5, %v7246_v61  ;;  %v2847_v28 = vsub.f32 %v6896_v10, %v7246_v61 }
 0x433   :  { %8137 = vst [vmem:[#allocation50_spill] sm:$0xff] %v7246_v61  ;;  %2796 = vmax.xlane.f32.xlu0 %v2795_v29  ;;  %3036 = vadd.xlane.f32.xlu2 %v3035_v37 }
 0x434   :  { %v2916_v39 = vmul.f32 1.442695, %v2846_v3  ;;  %v2918_v31 = vmul.f32 1.442695, %v2847_v28  ;;  %v4653_v40 = vpop.eup %4652 }
 0x435   :  { %v4655_v41 = vpop.eup %4654 }
 0x436   :  { %4656 = vpow2.f32 %v2916_v39  ;;  %v2384_v46 = vpop.f32.mrf.mxu0  ;;  %v2473_v1 = vpop.f32.mrf.mxu1  ;;  %v3038_v36 = vadd.f32 %v4655_v41, %v4653_v40 }
 0x437   :  { %4658 = vpow2.f32 %v2918_v31  ;;  %v7258_v5 = vadd.f32 %v6847_v22, %v2384_v46  ;;  %v7260_v61 = vadd.f32 -1e+30, %v2384_v46  ;;  %v7262_v11 = vadd.f32 -1e+30, %v2473_v1 }
 0x439   :  { %8138 = vst [vmem:[#allocation51_spill] sm:$0xff] %v7258_v5  ;;  %v3304_v3 = vmax.f32 %v7235_v26, %v7260_v61  ;;  %v2798_v28 = vmax.f32 %v7258_v5, %v7262_v11 }
 0x43a   :  { %8139 = vst [vmem:[#allocation52_spill] sm:$0xff] %v7260_v61 }
 0x43b   :  { %v7268_v37 = vpop.xlane.xlu2 %2757  ;;  %2799 = vmax.xlane.f32.xlu1 %v2798_v28  ;;  %3039 = vadd.xlane.f32.xlu2 %v3038_v36 }
 0x43c   :  { %8140 = vst [vmem:[#allocation53_spill] sm:$0xff] %v7268_v37  ;;  %v4657_v29 = vpop.eup %4656  ;;  %v2848_v31 = vsub.f32 %v6910_v0, %v7268_v37  ;;  %v2849_v40 = vsub.f32 %v6914_v62, %v7268_v37 }
 0x43d   :  { %v4659_v39 = vpop.eup %4658 }
 0x43e   :  { %v2386_v46 = vpop.f32.mrf.mxu0  ;;  %v2475_v57 = vpop.f32.mrf.mxu1  ;;  %v3041_v5 = vadd.f32 %v4659_v39, %v4657_v29  ;;  %v2920_v28 = vmul.f32 1.442695, %v2848_v31  ;;  %v2922_v61 = vmul.f32 1.442695, %v2849_v40 }
 0x43f   :  { %v7275_v41 = vadd.f32 %v6847_v22, %v2386_v46  ;;  %v7277_v26 = vadd.f32 -1e+30, %v2386_v46  ;;  %v7279_v1 = vadd.f32 -1e+30, %v2475_v57 }
 0x440   :  { %4660 = vpow2.f32 %v2920_v28 }
 0x441   :  { %8141 = vst [vmem:[#allocation54_spill] sm:$0xff] %v7275_v41  ;;  %v2801_v0 = vmax.f32 %v7275_v41, %v7279_v1  ;;  %4662 = vpow2.f32 %v2922_v61 }
 0x443   :  { %v7285_v30 = vpop.xlane.xlu0 %2760  ;;  %3042 = vadd.xlane.f32.xlu1 %v3041_v5  ;;  %2802 = vmax.xlane.f32.xlu2 %v2801_v0 }
 0x444   :  { %8142 = vst [vmem:[#allocation55_spill] sm:$0xff] %v7285_v30  ;;  %v2850_v37 = vsub.f32 %v6934_v38, %v7285_v30  ;;  %v2851_v57 = vsub.f32 %v6931_v18, %v7285_v30 }
 0x446   :  { %v2924_v29 = vmul.f32 1.442695, %v2850_v37  ;;  %v2926_v39 = vmul.f32 1.442695, %v2851_v57  ;;  %v2389_v46 = vpop.f32.mrf.mxu0  ;;  %v2478_v31 = vpop.f32.mrf.mxu1 }
 0x447   :  { %v7292_v36 = vadd.f32 %v6847_v22, %v2389_v46  ;;  %v7294_v40 = vadd.f32 -1e+30, %v2389_v46  ;;  %v7296_v41 = vadd.f32 -1e+30, %v2478_v31  ;;  %v4661_v37 = vpop.eup %4660 }
 0x448   :  { %4664 = vpow2.f32 %v2924_v29  ;;  %v4663_v61 = vpop.eup %4662 }
 0x449   :  { %8143 = vst [vmem:[#allocation56_spill] sm:$0xff] %v7292_v36  ;;  %4666 = vpow2.f32 %v2926_v39  ;;  %v7299_v38 = vmax.f32 %v3304_v3, %v7294_v40  ;;  %v2804_v5 = vmax.f32 %v7292_v36, %v7296_v41  ;;  %v3044_v17 = vadd.f32 %v4663_v61, %v4661_v37 }
 0x44a   :  { %8144 = vst [vmem:[#allocation57_spill] sm:$0xff] %v7294_v40 }
 0x44b   :  { %2805 = vmax.xlane.f32.xlu0 %v2804_v5 }
 0x44e   :  { %v4665_v28 = vpop.eup %4664  ;;  %v7303_v57 = vpop.xlane.xlu1 %2763 }
 0x44f   :  { %v4667_v0 = vpop.eup %4666  ;;  %8145 = vst [vmem:[#allocation58_spill] sm:$0xff] %v7303_v57  ;;  %v7305_v30 = vpop.f32.mrf.mxu0  ;;  %v2852_v46 = vsub.f32 %v6954_v60, %v7303_v57  ;;  %v2853_v29 = vsub.f32 %v6958_v48, %v7303_v57 }
 0x450   :  { %v7313_v3 = vadd.f32 %v6847_v22, %v7305_v30  ;;  %v2480_v39 = vpop.f32.mrf.mxu1  ;;  %v3047_v5 = vadd.f32 %v4667_v0, %v4665_v28 }
 0x451   :  { %v7315_v31 = vadd.f32 -1e+30, %v2480_v39  ;;  %v2928_v36 = vmul.f32 1.442695, %v2852_v46  ;;  %v2930_v40 = vmul.f32 1.442695, %v2853_v29 }
 0x452   :  { %8146 = vst [vmem:[#allocation59_spill] sm:$0xff] %v7313_v3  ;;  %3048 = vadd.xlane.f32.xlu2 %v3047_v5 }
 0x453   :  { %v2807_v56 = vmax.f32 %v7313_v3, %v7315_v31  ;;  %4668 = vpow2.f32 %v2928_v36  ;;  %3045 = vadd.xlane.f32.xlu0 %v3044_v17 }
 0x454   :  { %4670 = vpow2.f32 %v2930_v40 }
 0x455   :  { %2808 = vmax.xlane.f32.xlu1 %v2807_v56 }
 0x456   :  { %v7319_v57 = vpop.xlane.xlu2 %2766 }
 0x457   :  { %v2394_v60 = vpop.f32.mrf.mxu0  ;;  %8147 = vst [vmem:[#allocation60_spill] sm:$0xff] %v7319_v57  ;;  %v2854_v28 = vsub.f32 %v6996_v33, %v7319_v57  ;;  %v2855_v37 = vsub.f32 %v6993_v14, %v7319_v57 }
 0x458   :  { %v7322_v23 = vadd.f32 %v6847_v22, %v2394_v60  ;;  %v2483_v39 = vpop.f32.mrf.mxu1  ;;  %v7363_v34 = vadd.f32 -1e+30, %v2394_v60 }
 0x459   :  { %v7328_v61 = vadd.f32 -1e+30, %v2483_v39  ;;  %v4669_v0 = vpop.eup %4668  ;;  %v2932_v36 = vmul.f32 1.442695, %v2854_v28  ;;  %v2934_v17 = vmul.f32 1.442695, %v2855_v37 }
 0x45a   :  { %8148 = vst [vmem:[#allocation61_spill] sm:$0xff] %v7322_v23  ;;  %v4671_v40 = vpop.eup %4670  ;;  %v3308_v60 = vmax.f32 %v7299_v38, %v7363_v34 }
 0x45b   :  { %v2810_v56 = vmax.f32 %v7322_v23, %v7328_v61  ;;  %4672 = vpow2.f32 %v2932_v36  ;;  %v3050_v46 = vadd.f32 %v4671_v40, %v4669_v0 }
 0x45c   :  { %4674 = vpow2.f32 %v2934_v17 }
 0x45d   :  { %2811 = vmax.xlane.f32.xlu2 %v2810_v56  ;;  %3051 = vadd.xlane.f32.xlu0 %v3050_v46 }
 0x45e   :  { %v7332_v5 = vpop.xlane.xlu0 %2769 }
 0x45f   :  { %v2396_v29 = vpop.f32.mrf.mxu0  ;;  %8149 = vst [vmem:[#allocation62_spill] sm:$0xff] %v7332_v5  ;;  %v2856_v28 = vsub.f32 %v7019_v32, %v7332_v5  ;;  %v2857_v37 = vsub.f32 %v7023_v35, %v7332_v5 }
 0x460   :  { %v7335_v33 = vadd.f32 %v6847_v22, %v2396_v29  ;;  %v2485_v39 = vpop.f32.mrf.mxu1 }
 0x461   :  { %v7341_v57 = vadd.f32 -1e+30, %v2485_v39  ;;  %v4673_v36 = vpop.eup %4672  ;;  %v2936_v0 = vmul.f32 1.442695, %v2856_v28  ;;  %v2938_v17 = vmul.f32 1.442695, %v2857_v37 }
 0x462   :  { %8150 = vst [vmem:[#allocation63_spill] sm:$0xff] %v7335_v33  ;;  %v4675_v40 = vpop.eup %4674 }
 0x463   :  { %v2813_v56 = vmax.f32 %v7335_v33, %v7341_v57  ;;  %4676 = vpow2.f32 %v2936_v0  ;;  %v3053_v46 = vadd.f32 %v4675_v40, %v4673_v36 }
 0x464   :  { %4678 = vpow2.f32 %v2938_v17 }
 0x465   :  { %2814 = vmax.xlane.f32.xlu0 %v2813_v56  ;;  %3054 = vadd.xlane.f32.xlu2 %v3053_v46 }
 0x466   :  { %v7345_v23 = vpop.xlane.xlu1 %2772 }
 0x467   :  { %8151 = vst [vmem:[#allocation64_spill] sm:$0xff] %v7345_v23  ;;  %v2399_v32 = vpop.f32.mrf.mxu0  ;;  %v2858_v5 = vsub.f32 %v7061_v16, %v7345_v23  ;;  %v2859_v39 = vsub.f32 %v7065_v43, %v7345_v23 }
 0x468   :  { %v7352_v28 = vadd.f32 %v6847_v22, %v2399_v32  ;;  %v2488_v37 = vpop.f32.mrf.mxu1 }
 0x469   :  { %v7354_v3 = vadd.f32 -1e+30, %v2488_v37  ;;  %v4677_v0 = vpop.eup %4676  ;;  %v2940_v36 = vmul.f32 1.442695, %v2858_v5  ;;  %v2942_v17 = vmul.f32 1.442695, %v2859_v39 }
 0x46a   :  { %8152 = vst [vmem:[#allocation65_spill] sm:$0xff] %v7352_v28  ;;  %v4679_v40 = vpop.eup %4678 }
 0x46b   :  { %v2816_v56 = vmax.f32 %v7352_v28, %v7354_v3  ;;  %4680 = vpow2.f32 %v2940_v36  ;;  %v3056_v46 = vadd.f32 %v4679_v40, %v4677_v0 }
 0x46c   :  { %4682 = vpow2.f32 %v2942_v17  ;;  %v7371_v17 = vadd.f32 -1e+30, %v2399_v32 }
 0x46d   :  { %2817 = vmax.xlane.f32.xlu1 %v2816_v56  ;;  %3057 = vadd.xlane.f32.xlu2 %v3056_v46 }
 0x46e   :  { %v7358_v23 = vpop.xlane.xlu2 %2775  ;;  %8155 = vst [vmem:[#allocation68_spill] sm:$0xff] %v7371_v17  ;;  %v3310_v25 = vmax.f32 %v3308_v60, %v7371_v17 }
 0x46f   :  { %v2401_v16 = vpop.f32.mrf.mxu0  ;;  %8153 = vst [vmem:[#allocation66_spill] sm:$0xff] %v7358_v23  ;;  %v2860_v39 = vsub.f32 %v7089_v24, %v7358_v23  ;;  %v2861_v0 = vsub.f32 %v7093_v13, %v7358_v23  ;;  %v7378_v24 = vadd.f32 -1e+30, %v7305_v30 }
 0x470   :  { %v7361_v33 = vadd.f32 %v6847_v22, %v2401_v16  ;;  %v2490_v37 = vpop.f32.mrf.mxu1 }
 0x471   :  { %v7365_v5 = vadd.f32 -1e+30, %v2490_v37  ;;  %v4681_v28 = vpop.eup %4680  ;;  %v2944_v46 = vmul.f32 1.442695, %v2860_v39  ;;  %v2946_v37 = vmul.f32 1.442695, %v2861_v0 }
 0x472   :  { %8154 = vst [vmem:[#allocation67_spill] sm:$0xff] %v7361_v33  ;;  %v4683_v36 = vpop.eup %4682 }
 0x473   :  { %v2819_v40 = vmax.f32 %v7361_v33, %v7365_v5  ;;  %v3059_v56 = vadd.f32 %v4683_v36, %v4681_v28  ;;  %v7392_v36 = vadd.f32 -1e+30, %v2396_v29  ;;  %4684 = vpow2.f32 %v2944_v46 }
 0x474   :  { %4686 = vpow2.f32 %v2946_v37  ;;  %v7401_v33 = vadd.f32 -1e+30, %v2401_v16 }
 0x475   :  { %3060 = vadd.xlane.f32.xlu1 %v3059_v56  ;;  %2820 = vmax.xlane.f32.xlu2 %v2819_v40 }
 0x476   :  { %v7381_v23 = vpop.xlane.xlu0 %2778  ;;  %8160 = vst [vmem:[#allocation72_spill] sm:$0xff] %v7401_v33 }
 0x477   :  { %8156 = vst [vmem:[#allocation69_spill] sm:$0xff] %v7381_v23  ;;  %v2404_v32 = vpop.f32.mrf.mxu0  ;;  %v2862_v45 = vsub.f32 %v7123_v21, %v7381_v23  ;;  %v2863_v28 = vsub.f32 %v7127_v27, %v7381_v23  ;;  %v8159_v21 = vmax.f32 %v7253_v49, %v7277_v26 }
 0x478   :  { %v7388_v38 = vadd.f32 %v6847_v22, %v2404_v32  ;;  %v7390_v39 = vadd.f32 -1e+30, %v2404_v32  ;;  %v2493_v0 = vpop.f32.mrf.mxu1 }
 0x479   :  { %v7394_v30 = vadd.f32 -1e+30, %v2493_v0  ;;  %v2948_v40 = vmul.f32 1.442695, %v2862_v45  ;;  %v2950_v56 = vmul.f32 1.442695, %v2863_v28  ;;  %v3307_v23 = vmax.f32 %v8159_v21, %v7378_v24  ;;  %v4685_v46 = vpop.eup %4684 }
 0x47a   :  { %8157 = vst [vmem:[#allocation70_spill] sm:$0xff] %v7388_v38  ;;  %v3312_v60 = vmax.f32 %v3310_v25, %v7390_v39  ;;  %v4687_v28 = vpop.eup %4686 }
 0x47b   :  { %8158 = vst [vmem:[#allocation71_spill] sm:$0xff] %v7390_v39  ;;  %v2822_v32 = vmax.f32 %v7388_v38, %v7394_v30  ;;  %4688 = vpow2.f32 %v2948_v40  ;;  %v3309_v29 = vmax.f32 %v3307_v23, %v7392_v36 }
 0x47c   :  { %4690 = vpow2.f32 %v2950_v56 }
 0x47d   :  { %2823 = vmax.xlane.f32.xlu0 %v2822_v32  ;;  %v3311_v45 = vmax.f32 %v3309_v29, %v7401_v33  ;;  %v3062_v33 = vadd.f32 %v4687_v28, %v4685_v46 }
 0x47e   :  { %v7407_v37 = vpop.xlane.xlu1 %2781 }
 0x47f   :  { %8161 = vst [vmem:[#allocation73_spill] sm:$0xff] %v7407_v37  ;;  %v2406_v25 = vpop.f32.mrf.mxu0  ;;  %v2864_v49 = vsub.f32 %v7142_v2, %v7407_v37  ;;  %v2865_v16 = vsub.f32 %v7146_v6, %v7407_v37 }
 0x480   :  { %v7414_v0 = vadd.f32 %v6847_v22, %v2406_v25  ;;  %v7416_v40 = vadd.f32 -1e+30, %v2406_v25  ;;  %v2495_v23 = vpop.f32.mrf.mxu1 }
 0x481   :  { %v7418_v56 = vadd.f32 -1e+30, %v2495_v23  ;;  %v4689_v21 = vpop.eup %4688  ;;  %v2952_v32 = vmul.f32 1.442695, %v2864_v49  ;;  %v2954_v29 = vmul.f32 1.442695, %v2865_v16 }
 0x482   :  { %8162 = vst [vmem:[#allocation74_spill] sm:$0xff] %v7414_v0  ;;  %v3313_v38 = vmax.f32 %v3311_v45, %v7416_v40  ;;  %v4691_v39 = vpop.eup %4690 }
 0x483   :  { %v2825_v2 = vmax.f32 %v7414_v0, %v7418_v56  ;;  %4692 = vpow2.f32 %v2952_v32  ;;  %v3065_v37 = vadd.f32 %v4691_v39, %v4689_v21 }
 0x484   :  { %4694 = vpow2.f32 %v2954_v29 }
 0x485   :  { %2826 = vmax.xlane.f32.xlu1 %v2825_v2  ;;  %3063 = vadd.xlane.f32.xlu0 %v3062_v33 }
 0x486   :  { %3066 = vadd.xlane.f32.xlu2 %v3065_v37  ;;  %v7423_v17 = vpop.xlane.xlu2 %2784 }
 0x487   :  { %v2409_v25 = vpop.f32.mrf.mxu0  ;;  %8163 = vst [vmem:[#allocation75_spill] sm:$0xff] %v7423_v17  ;;  %v2866_v46 = vsub.f32 %v7168_v55, %v7423_v17  ;;  %v2867_v33 = vsub.f32 %v7172_v63, %v7423_v17 }
 0x488   :  { %v7426_v23 = vadd.f32 %v6847_v22, %v2409_v25  ;;  %v7428_v49 = vadd.f32 -1e+30, %v2409_v25  ;;  %v2498_v45 = vpop.f32.mrf.mxu1 }
 0x489   :  { %v7430_v16 = vadd.f32 -1e+30, %v2498_v45  ;;  %v4693_v28 = vpop.eup %4692  ;;  %v2956_v29 = vmul.f32 1.442695, %v2866_v46  ;;  %v2958_v2 = vmul.f32 1.442695, %v2867_v33 }
 0x48a   :  { %8164 = vst [vmem:[#allocation76_spill] sm:$0xff] %v7426_v23  ;;  %v3314_v39 = vmax.f32 %v3312_v60, %v7428_v49  ;;  %v4695_v37 = vpop.eup %4694 }
 0x48b   :  { %v2828_v21 = vmax.f32 %v7426_v23, %v7430_v16  ;;  %v3068_v32 = vadd.f32 %v4695_v37, %v4693_v28  ;;  %4696 = vpow2.f32 %v2956_v29 }
 0x48c   :  { %4698 = vpow2.f32 %v2958_v2 }
 0x48d   :  { %2829 = vmax.xlane.f32.xlu0 %v2828_v21  ;;  %3069 = vadd.xlane.f32.xlu1 %v3068_v32 }
 0x48f   :  { %v2411_v25 = vpop.f32.mrf.mxu0 }
 0x490   :  { %v7440_v45 = vadd.f32 %v6847_v22, %v2411_v25  ;;  %v7442_v55 = vadd.f32 -1e+30, %v2411_v25  ;;  %v2500_v0 = vpop.f32.mrf.mxu1 }
 0x491   :  { %v7444_v60 = vadd.f32 -1e+30, %v2500_v0  ;;  %v4697_v46 = vpop.eup %4696 }
 0x492   :  { %8165 = vst [vmem:[#allocation77_spill] sm:$0xff] %v7440_v45  ;;  %v3315_v17 = vmax.f32 %v3313_v38, %v7442_v55  ;;  %v4699_v37 = vpop.eup %4698 }
 0x493   :  { %8166 = vst [vmem:[#allocation78_spill] sm:$0xff] %v7442_v55  ;;  %v2831_v28 = vmax.f32 %v7440_v45, %v7444_v60  ;;  %v3071_v29 = vadd.f32 %v4699_v37, %v4697_v46 }
 0x495   :  { %2832 = vmax.xlane.f32.xlu0 %v2831_v28 }
 0x497   :  { %v2414_v33 = vpop.f32.mrf.mxu0 }
 0x498   :  { %v7450_v21 = vadd.f32 %v6847_v22, %v2414_v33  ;;  %v7452_v32 = vadd.f32 -1e+30, %v2414_v33  ;;  %v2503_v25 = vpop.f32.mrf.mxu1  ;;  %v3326_v33 = vmax.f32 %v6871_v42, %v6896_v10 }
 0x499   :  { %v7454_v23 = vadd.f32 -1e+30, %v2503_v25  ;;  %v3325_v25 = vmax.f32 %v6855_v44, %v6883_v51 }
 0x49a   :  { %8167 = vst [vmem:[#allocation79_spill] sm:$0xff] %v7450_v21  ;;  %v3316_v0 = vmax.f32 %v3314_v39, %v7452_v32  ;;  %v3328_v39 = vmax.f32 %v3326_v33, %v6931_v18 }
 0x49b   :  { %8168 = vst [vmem:[#allocation80_spill] sm:$0xff] %v7452_v32  ;;  %v2834_v38 = vmax.f32 %v7450_v21, %v7454_v23  ;;  %v3327_v21 = vmax.f32 %v3325_v25, %v6914_v62 }
 0x49c   :  { %8169 = vst [vmem:[#allocation81_spill] sm:$0xff] %v7454_v23  ;;  %v3330_v37 = vmax.f32 %v3328_v39, %v6993_v14 }
 0x49d   :  { %2835 = vmax.xlane.f32.xlu2 %v2834_v38  ;;  %3072 = vadd.xlane.f32.xlu0 %v3071_v29  ;;  %v3329_v38 = vmax.f32 %v3327_v21, %v6958_v48 }
 0x49e   :  { %v3332_v22 = vmax.f32 %v3330_v37, %v7065_v43 }
 0x49f   :  { %v7459_v2 = vpop.f32.mrf.mxu0 }
 0x4a0   :  { %8170 = vst [vmem:[#allocation82_spill] sm:$0xff] %v7459_v2  ;;  %v7462_v28 = vadd.f32 -1e+30, %v7459_v2  ;;  %v3331_v2 = vmax.f32 %v3329_v38, %v7023_v35  ;;  %v3334_v55 = vmax.f32 %v3332_v22, %v7127_v27 }
 0x4a2   :  { %v3317_v45 = vmax.f32 %v3315_v17, %v7462_v28  ;;  %v3333_v10 = vmax.f32 %v3331_v2, %v7093_v13  ;;  %v3336_v33 = vmax.f32 %v3334_v55, %v7172_v63 }
 0x4a4   :  { %v3318_v46 = vmax.f32 %v3316_v0, %v3317_v45  ;;  %v3335_v25 = vmax.f32 %v3333_v10, %v7146_v6  ;;  %v3338_v0 = vmax.f32 %v3336_v33, %v7209_v47 }
 0x4a6   :  { %v3319_v29 = vrot.slane %v3318_v46, 4  ;;  %v3337_v21 = vmax.f32 %v3335_v25, %v7190_v53  ;;  %v3340_v37 = vmax.f32 %v3338_v0, %v7244_v9  ;;  %v2505_v25 = vpop.f32.mrf.mxu1 }
 0x4a8   :  { %v3320_v32 = vmax.f32 %v3318_v46, %v3319_v29  ;;  %v3339_v38 = vmax.f32 %v3337_v21, %v7226_v4  ;;  %v3342_v46 = vmax.f32 %v3340_v37, %v7279_v1 }
 0x4aa   :  { %v3321_v17 = vrot.slane %v3320_v32, 2  ;;  %v3341_v22 = vmax.f32 %v3339_v38, %v7262_v11  ;;  %v3344_v55 = vmax.f32 %v3342_v46, %v7315_v31  ;;  %v7502_v38 = vadd.f32 -1e+30, %v2505_v25  ;;  %v7512_v25 = vpop.xlane.xlu0 %2787 }
 0x4ab   :  { %8171 = vst [vmem:[#allocation83_spill] sm:$0xff] %v7512_v25 }
 0x4ac   :  { %v3322_v45 = vmax.f32 %v3320_v32, %v3321_v17  ;;  %v3343_v10 = vmax.f32 %v3341_v22, %v7296_v41  ;;  %v3346_v32 = vmax.f32 %v3344_v55, %v7341_v57 }
 0x4ae   :  { %v3323_v39 = vrot.slane %v3322_v45, 1  ;;  %v3345_v29 = vmax.f32 %v3343_v10, %v7328_v61  ;;  %v3348_v0 = vmax.f32 %v3346_v32, %v7365_v5 }
 0x4b0   :  { %v7485_v2 = vmax.f32 %v3322_v45, %v3323_v39  ;;  %v3347_v21 = vmax.f32 %v3345_v29, %v7354_v3  ;;  %v3350_v39 = vmax.f32 %v3348_v0, %v7418_v56 }
 0x4b2   :  { %v3362_v17 = vsub.f32 %v6849_v52, %v7485_v2  ;;  %v3364_v33 = vsub.f32 %v6976_v20, %v7485_v2  ;;  %v3366_v45 = vsub.f32 %v6902_v54, %v7485_v2  ;;  %v3368_v37 = vsub.f32 %v6963_v8, %v7485_v2 }
 0x4b3   :  { %v3349_v52 = vmax.f32 %v3347_v21, %v7394_v30  ;;  %v3352_v20 = vmax.f32 %v3350_v39, %v7444_v60  ;;  %v3370_v55 = vsub.f32 %v6912_v15, %v7485_v2  ;;  %v3372_v32 = vsub.f32 %v6978_v12, %v7485_v2 }
 0x4b4   :  { %v3426_v46 = vmul.f32 1.442695, %v3362_v17  ;;  %v3430_v22 = vmul.f32 1.442695, %v3364_v33  ;;  %v3434_v10 = vmul.f32 1.442695, %v3366_v45  ;;  %v3374_v33 = vsub.f32 %v6956_v19, %v7485_v2 }
 0x4b5   :  { %v3351_v54 = vmax.f32 %v3349_v52, %v7430_v16  ;;  %v3438_v8 = vmul.f32 1.442695, %v3368_v37  ;;  %v3354_v29 = vmax.f32 %v3352_v20, %v7502_v38  ;;  %v3442_v15 = vmul.f32 1.442695, %v3370_v55  ;;  %v7521_v52 = vpop.xlane.xlu1 %2790 }
 0x4b6   :  { %4700 = vpow2.f32 %v3426_v46  ;;  %v3376_v0 = vsub.f32 %v6991_v58, %v7485_v2  ;;  %v3446_v45 = vmul.f32 1.442695, %v3372_v32  ;;  %v2868_v39 = vsub.f32 %v7186_v50, %v7512_v25  ;;  %8172 = vst [vmem:[#allocation84_spill] sm:$0xff] %v7521_v52  ;;  %v8173_v32 = vld [vmem:[#allocation42_spill] sm:$0xff] }
 0x4b7   :  { %4702 = vpow2.f32 %v3430_v22  ;;  %v3353_v17 = vmax.f32 %v3351_v54, %v7454_v23  ;;  %v3378_v46 = vsub.f32 %v7021_v7, %v7485_v2  ;;  %v3450_v19 = vmul.f32 1.442695, %v3374_v33  ;;  %v8174_v7 = vld [vmem:[#allocation26_spill] sm:$0xff] }
 0x4b8   :  { %4704 = vpow2.f32 %v3434_v10  ;;  %v2869_v22 = vsub.f32 %v7190_v53, %v7512_v25  ;;  %v3380_v55 = vsub.f32 %v7063_v59, %v7485_v2  ;;  %v3454_v10 = vmul.f32 1.442695, %v3376_v0  ;;  %v8175_v0 = vld [vmem:[#allocation33_spill] sm:$0xff] }
 0x4b9   :  { %4706 = vpow2.f32 %v3438_v8  ;;  %v3355_v21 = vmax.f32 %v3353_v17, %v3354_v29  ;;  %v2960_v50 = vmul.f32 1.442695, %v2868_v39  ;;  %v2870_v8 = vsub.f32 %v8173_v32, %v7521_v52 }
 0x4ba   :  { %4708 = vpow2.f32 %v3442_v15  ;;  %v3382_v33 = vsub.f32 %v8174_v7, %v7485_v2  ;;  %v3458_v15 = vmul.f32 1.442695, %v3378_v46  ;;  %v3384_v39 = vsub.f32 %v8175_v0, %v7485_v2 }
 0x4bb   :  { %4710 = vpow2.f32 %v3446_v45  ;;  %v3356_v54 = vrot.slane %v3355_v21, 4  ;;  %v3462_v23 = vmul.f32 1.442695, %v3380_v55 }
 0x4bc   :  { %v4701_v12 = vpop.eup %4700  ;;  %4712 = vpow2.f32 %v3450_v19 }
 0x4bd   :  { %v4703_v37 = vpop.eup %4702  ;;  %v3357_v25 = vmax.f32 %v3355_v21, %v3356_v54  ;;  %4714 = vpow2.f32 %v3454_v10  ;;  %v8177_v21 = vld [vmem:[#allocation37_spill] sm:$0xff]  ;;  %v3466_v54 = vmul.f32 1.442695, %v3382_v33 }
 0x4be   :  { %v3554_v20 = vadd.f32 %v4703_v37, %v4701_v12  ;;  %v4705_v58 = vpop.eup %4704  ;;  %v2962_v12 = vmul.f32 1.442695, %v2869_v22  ;;  %v2871_v37 = vsub.f32 %v7209_v47, %v7521_v52  ;;  %4716 = vpow2.f32 %v2960_v50  ;;  %v8179_v50 = vld [vmem:[#allocation43_spill] sm:$0xff] }
 0x4bf   :  { %v4707_v17 = vpop.eup %4706  ;;  %v3358_v32 = vrot.slane %v3357_v25, 2  ;;  %v3388_v22 = vsub.f32 %v8177_v21, %v7485_v2  ;;  %4718 = vpow2.f32 %v3458_v15  ;;  %v3470_v52 = vmul.f32 1.442695, %v3384_v39 }
 0x4c0   :  { %v3555_v29 = vadd.f32 %v4705_v58, %v3554_v20  ;;  %v4709_v45 = vpop.eup %4708  ;;  %v2964_v20 = vmul.f32 1.442695, %v2870_v8  ;;  %v8176_v58 = vld [vmem:[#allocation36_spill] sm:$0xff]  ;;  %4720 = vpow2.f32 %v2962_v12  ;;  %v3392_v8 = vsub.f32 %v8179_v50, %v7485_v2  ;;  %v8181_v12 = vld [vmem:[#allocation49_spill] sm:$0xff] }
 0x4c1   :  { %v3386_v7 = vsub.f32 %v8176_v58, %v7485_v2  ;;  %v4711_v46 = vpop.eup %4710  ;;  %4722 = vpow2.f32 %v3462_v23  ;;  %v3359_v58 = vmax.f32 %v3357_v25, %v3358_v32 }
 0x4c2   :  { %v3556_v59 = vadd.f32 %v4707_v17, %v3555_v29  ;;  %v2966_v29 = vmul.f32 1.442695, %v2871_v37  ;;  %v8178_v17 = vld [vmem:[#allocation40_spill] sm:$0xff]  ;;  %v4713_v55 = vpop.eup %4712  ;;  %4724 = vpow2.f32 %v2964_v20  ;;  %v3396_v37 = vsub.f32 %v8181_v12, %v7485_v2 }
 0x4c3   :  { %v3390_v0 = vsub.f32 %v8178_v17, %v7485_v2  ;;  %v3474_v21 = vmul.f32 1.442695, %v3386_v7  ;;  %v4715_v33 = vpop.eup %4714  ;;  %4726 = vpow2.f32 %v3466_v54  ;;  %v3478_v17 = vmul.f32 1.442695, %v3388_v22  ;;  %v8183_v54 = vld [vmem:[#allocation57_spill] sm:$0xff] }
 0x4c4   :  { %v3557_v19 = vadd.f32 %v4709_v45, %v3556_v59  ;;  %v8180_v59 = vld [vmem:[#allocation46_spill] sm:$0xff]  ;;  %4728 = vpow2.f32 %v2966_v29  ;;  %v3400_v20 = vsub.f32 %v7277_v26, %v7485_v2  ;;  %v3486_v7 = vmul.f32 1.442695, %v3392_v8 }
 0x4c5   :  { %v3394_v45 = vsub.f32 %v8180_v59, %v7485_v2  ;;  %v3482_v39 = vmul.f32 1.442695, %v3390_v0  ;;  %4730 = vpow2.f32 %v3470_v52  ;;  %v3402_v22 = vsub.f32 %v8183_v54, %v7485_v2  ;;  %v8185_v54 = vld [vmem:[#allocation72_spill] sm:$0xff] }
 0x4c6   :  { %v3558_v10 = vadd.f32 %v4711_v46, %v3557_v19  ;;  %v7549_v19 = vpop.eup %4716  ;;  %v8182_v46 = vld [vmem:[#allocation52_spill] sm:$0xff]  ;;  %4732 = vpow2.f32 %v3474_v21  ;;  %v3404_v0 = vsub.f32 %v7378_v24, %v7485_v2  ;;  %v3406_v26 = vsub.f32 %v7363_v34, %v7485_v2 }
 0x4c7   :  { %v3398_v23 = vsub.f32 %v8182_v46, %v7485_v2  ;;  %v4719_v32 = vpop.eup %4718  ;;  %v3490_v50 = vmul.f32 1.442695, %v3394_v45  ;;  %4734 = vpow2.f32 %v3478_v17  ;;  %v3408_v21 = vsub.f32 %v7392_v36, %v7485_v2  ;;  %v8184_v24 = vld [vmem:[#allocation68_spill] sm:$0xff] }
 0x4c8   :  { %v3559_v15 = vadd.f32 %v4713_v55, %v3558_v10  ;;  %v3360_v10 = vrot.slane %v3359_v58, 1  ;;  %v7555_v55 = vpop.eup %4720  ;;  %4736 = vpow2.f32 %v3482_v39  ;;  %v3502_v45 = vmul.f32 1.442695, %v3400_v20 }
 0x4c9   :  { %v4723_v59 = vpop.eup %4722  ;;  %v3498_v52 = vmul.f32 1.442695, %v3398_v23  ;;  %4738 = vpow2.f32 %v3486_v7  ;;  %v3506_v17 = vmul.f32 1.442695, %v3402_v22  ;;  %v3510_v23 = vmul.f32 1.442695, %v3404_v0 }
 0x4ca   :  { %v3560_v25 = vadd.f32 %v4715_v33, %v3559_v15  ;;  %v3494_v15 = vmul.f32 1.442695, %v3396_v37  ;;  %v7561_v33 = vpop.eup %4724  ;;  %v7567_v46 = vmax.f32 %v3359_v58, %v3360_v10  ;;  %v3410_v37 = vsub.f32 %v8184_v24, %v7485_v2 }
 0x4cb   :  { %v4727_v12 = vpop.eup %4726  ;;  %4740 = vpow2.f32 %v3490_v50  ;;  %v3514_v36 = vmul.f32 1.442695, %v3406_v26  ;;  %v3518_v7 = vmul.f32 1.442695, %v3408_v21  ;;  %v3416_v26 = vsub.f32 %v7416_v40, %v7485_v2  ;;  %v8187_v40 = vld [vmem:[#allocation24_spill] sm:$0xff] }
 0x4cc   :  { %v3561_v29 = vadd.f32 %v4719_v32, %v3560_v25  ;;  %v7569_v25 = vpop.eup %4728  ;;  %4742 = vpow2.f32 %v3494_v15  ;;  %v3363_v10 = vsub.f32 %v6855_v44, %v7567_v46  ;;  %v3365_v22 = vsub.f32 %v6871_v42, %v7567_v46 }
 0x4cd   :  { %v4731_v34 = vpop.eup %4730  ;;  %4744 = vpow2.f32 %v3498_v52  ;;  %v3522_v15 = vmul.f32 1.442695, %v3410_v37  ;;  %v3418_v21 = vsub.f32 %v7428_v49, %v7485_v2  ;;  %v3367_v42 = vsub.f32 %v6883_v51, %v7567_v46  ;;  %v8188_v49 = vld [vmem:[#allocation78_spill] sm:$0xff] }
 0x4ce   :  { %v3562_v8 = vadd.f32 %v4723_v59, %v3561_v29  ;;  %v4733_v39 = vpop.eup %4732  ;;  %v3412_v29 = vsub.f32 %v8185_v54, %v7485_v2  ;;  %4746 = vpow2.f32 %v3502_v45  ;;  %v8186_v59 = vld [vmem:[#allocation71_spill] sm:$0xff]  ;;  %v3432_v37 = vmul.f32 1.442695, %v3365_v22 }
 0x4cf   :  { %v4735_v58 = vpop.eup %4734  ;;  %v3414_v0 = vsub.f32 %v8186_v59, %v7485_v2  ;;  %4748 = vpow2.f32 %v3506_v17  ;;  %v3428_v17 = vmul.f32 1.442695, %v3363_v10  ;;  %v3534_v51 = vmul.f32 1.442695, %v3416_v26 }
 0x4d0   :  { %v3563_v32 = vadd.f32 %v4727_v12, %v3562_v8  ;;  %v4737_v50 = vpop.eup %4736  ;;  %4750 = vpow2.f32 %v3510_v23  ;;  %v3526_v24 = vmul.f32 1.442695, %v3412_v29  ;;  %v3369_v23 = vsub.f32 %v8187_v40, %v7567_v46 }
 0x4d1   :  { %v4739_v12 = vpop.eup %4738  ;;  %4752 = vpow2.f32 %v3514_v36  ;;  %v3420_v36 = vsub.f32 %v8188_v49, %v7485_v2  ;;  %v3371_v22 = vsub.f32 %v6914_v62, %v7567_v46  ;;  %v8191_v62 = vld [vmem:[#allocation23_spill] sm:$0xff]  ;;  %v3379_v49 = vsub.f32 %v7023_v35, %v7567_v46 }
 0x4d2   :  { %v3564_v20 = vadd.f32 %v4731_v34, %v3563_v32  ;;  %v4741_v52 = vpop.eup %4740  ;;  %4754 = vpow2.f32 %v3518_v7  ;;  %v3530_v34 = vmul.f32 1.442695, %v3414_v0  ;;  %v7593_v7 = vpop.xlane.xlu2 %2793  ;;  %v3424_v0 = vsub.f32 %v7462_v28, %v7485_v2 }
 0x4d3   :  { %v4743_v45 = vpop.eup %4742  ;;  %4756 = vpow2.f32 %v3522_v15  ;;  %v3538_v15 = vmul.f32 1.442695, %v3418_v21 }
 0x4d4   :  { %v3565_v8 = vadd.f32 %v4733_v39, %v3564_v20  ;;  %v4745_v32 = vpop.eup %4744  ;;  %v8189_v20 = vld [vmem:[#allocation80_spill] sm:$0xff]  ;;  %4758 = vpow2.f32 %v3428_v17  ;;  %v3440_v17 = vmul.f32 1.442695, %v3369_v23  ;;  %v3377_v23 = vsub.f32 %v6993_v14, %v7567_v46 }
 0x4d5   :  { %v4747_v54 = vpop.eup %4746  ;;  %4760 = vpow2.f32 %v3432_v37  ;;  %v3387_v14 = vsub.f32 %v7146_v6, %v7567_v46 }
 0x4d6   :  { %v3566_v44 = vadd.f32 %v4735_v58, %v3565_v8  ;;  %v3422_v58 = vsub.f32 %v8189_v20, %v7485_v2  ;;  %v4749_v29 = vpop.eup %4748  ;;  %4762 = vpow2.f32 %v3526_v24  ;;  %v3375_v24 = vsub.f32 %v6958_v48, %v7567_v46 }
 0x4d7   :  { %v4751_v59 = vpop.eup %4750  ;;  %4764 = vpow2.f32 %v3530_v34  ;;  %v3383_v48 = vsub.f32 %v7093_v13, %v7567_v46 }
 0x4d8   :  { %v3567_v39 = vadd.f32 %v4737_v50, %v3566_v44  ;;  %v3436_v50 = vmul.f32 1.442695, %v3367_v42  ;;  %v7599_v8 = vpop.eup %4752  ;;  %v3373_v44 = vsub.f32 %v6931_v18, %v7567_v46  ;;  %4766 = vpow2.f32 %v3534_v51 }
 0x4d9   :  { %v3542_v42 = vmul.f32 1.442695, %v3420_v36  ;;  %v3546_v40 = vmul.f32 1.442695, %v3422_v58  ;;  %v3550_v18 = vmul.f32 1.442695, %v3424_v0  ;;  %v3381_v58 = vsub.f32 %v7065_v43, %v7567_v46 }
 0x4da   :  { %v3568_v10 = vadd.f32 %v4739_v12, %v3567_v39  ;;  %v7603_v12 = vpop.eup %4754  ;;  %v8190_v39 = vld [vmem:[#allocation82_spill] sm:$0xff]  ;;  %4768 = vpow2.f32 %v3436_v50  ;;  %v3389_v43 = vsub.f32 %v7172_v63, %v7567_v46  ;;  %v3456_v0 = vmul.f32 1.442695, %v3377_v23 }
 0x4db   :  { %v7607_v37 = vadd.f32 %v8191_v62, %v8190_v39  ;;  %v7609_v28 = vpop.eup %4756  ;;  %4770 = vpow2.f32 %v3538_v15  ;;  %v3460_v15 = vmul.f32 1.442695, %v3379_v49  ;;  %v3464_v39 = vmul.f32 1.442695, %v3381_v58 }
 0x4dc   :  { %v3569_v26 = vadd.f32 %v4741_v52, %v3568_v10  ;;  %v3444_v52 = vmul.f32 1.442695, %v3371_v22  ;;  %v4759_v34 = vpop.eup %4758  ;;  %4772 = vpow2.f32 %v3440_v17  ;;  %v3385_v10 = vsub.f32 %v7127_v27, %v7567_v46 }
 0x4dd   :  { %v4761_v20 = vpop.eup %4760  ;;  %4774 = vpow2.f32 %v3542_v42  ;;  %v3452_v22 = vmul.f32 1.442695, %v3375_v24  ;;  %v2837_v6 = vmax.f32 %v7607_v37, %v7502_v38  ;;  %v3391_v17 = vsub.f32 %v7190_v53, %v7567_v46  ;;  %v7643_v42 = vpop.xlane.xlu1 %3033 }
 0x4de   :  { %v3570_v21 = vadd.f32 %v4743_v45, %v3569_v26  ;;  %v3448_v45 = vmul.f32 1.442695, %v3373_v44  ;;  %v7619_v51 = vpop.eup %4762  ;;  %4776 = vpow2.f32 %v3444_v52  ;;  %v3591_v13 = vadd.f32 %v4761_v20, %v4759_v34  ;;  %v7633_v26 = vpop.xlane.xlu2 %3036 }
 0x4df   :  { %v7627_v35 = vpop.eup %4764  ;;  %4778 = vpow2.f32 %v3546_v40  ;;  %v3468_v24 = vmul.f32 1.442695, %v3383_v48  ;;  %2838 = vmax.xlane.f32.xlu1 %v2837_v6  ;;  %v3472_v53 = vmul.f32 1.442695, %v3385_v10  ;;  %v3399_v49 = vsub.f32 %v7262_v11, %v7567_v46 }
 0x4e0   :  { %v3571_v36 = vadd.f32 %v4745_v32, %v3570_v21  ;;  %v7631_v50 = vpop.eup %4766  ;;  %4780 = vpow2.f32 %v3448_v45  ;;  %v3480_v20 = vmul.f32 1.442695, %v3389_v43  ;;  %v3401_v48 = vsub.f32 %v7279_v1, %v7567_v46 }
 0x4e1   :  { %v4769_v27 = vpop.eup %4768  ;;  %4782 = vpow2.f32 %v3550_v18 }
 0x4e2   :  { %v3572_v32 = vadd.f32 %v4747_v54, %v3571_v36  ;;  %v3074_v54 = vadd.f32 %v7555_v55, %v7549_v19  ;;  %v7639_v63 = vpop.eup %4770  ;;  %v3592_v62 = vadd.f32 %v4769_v27, %v3591_v13  ;;  %4784 = vpow2.f32 %v3452_v22 }
 0x4e3   :  { %v4773_v40 = vpop.eup %4772  ;;  %v3395_v55 = vsub.f32 %v7226_v4, %v7567_v46  ;;  %4786 = vpow2.f32 %v3456_v0  ;;  %v3405_v27 = vsub.f32 %v7315_v31, %v7567_v46 }
 0x4e4   :  { %v3573_v44 = vadd.f32 %v4749_v29, %v3572_v32  ;;  %v3393_v29 = vsub.f32 %v7209_v47, %v7567_v46  ;;  %3075 = vadd.xlane.f32.xlu2 %v3074_v54  ;;  %v7647_v19 = vpop.eup %4774  ;;  %v3593_v52 = vadd.f32 %v4773_v40, %v3592_v62  ;;  %4788 = vpow2.f32 %v3460_v15 }
 0x4e5   :  { %v4777_v34 = vpop.eup %4776  ;;  %v3476_v47 = vmul.f32 1.442695, %v3387_v14  ;;  %4790 = vpow2.f32 %v3464_v39  ;;  %v3403_v14 = vsub.f32 %v7296_v41, %v7567_v46  ;;  %v3492_v15 = vmul.f32 1.442695, %v3395_v55  ;;  %v7670_v54 = vpop.xlane.xlu1 %2799 }
 0x4e6   :  { %v3574_v21 = vadd.f32 %v4751_v59, %v3573_v44  ;;  %v3397_v59 = vsub.f32 %v7244_v9, %v7567_v46  ;;  %v7654_v23 = vpop.eup %4778  ;;  %v3594_v36 = vadd.f32 %v4777_v34, %v3593_v52  ;;  %4792 = vpow2.f32 %v3468_v24 }
 0x4e7   :  { %v4781_v58 = vpop.eup %4780  ;;  %4794 = vpow2.f32 %v3472_v53  ;;  %v3488_v32 = vmul.f32 1.442695, %v3393_v29  ;;  %v3500_v40 = vmul.f32 1.442695, %v3399_v49  ;;  %v3411_v53 = vsub.f32 %v7354_v3, %v7567_v46  ;;  %v7684_v49 = vpop.xlane.xlu0 %2796 }
 0x4e8   :  { %v3575_v18 = vadd.f32 %v7599_v8, %v3574_v21  ;;  %v3484_v8 = vmul.f32 1.442695, %v3391_v17  ;;  %v7661_v10 = vpop.eup %4782  ;;  %v3595_v22 = vadd.f32 %v4781_v58, %v3594_v36  ;;  %4796 = vpow2.f32 %v3476_v47  ;;  %v7672_v17 = vpop.xlane.xlu2 %3039 }
 0x4e9   :  { %v4785_v0 = vpop.eup %4784  ;;  %4798 = vpow2.f32 %v3480_v20  ;;  %v3496_v44 = vmul.f32 1.442695, %v3397_v59  ;;  %v3504_v21 = vmul.f32 1.442695, %v3401_v48  ;;  %v3512_v34 = vmul.f32 1.442695, %v3405_v27 }
 0x4ea   :  { %v3576_v45 = vadd.f32 %v7603_v12, %v3575_v18  ;;  %v3077_v12 = vadd.f32 %v7569_v25, %v7561_v33  ;;  %v4787_v13 = vpop.eup %4786  ;;  %v3596_v6 = vadd.f32 %v4785_v0, %v3595_v22  ;;  %4800 = vpow2.f32 %v3484_v8  ;;  %v8192_v59 = vld [vmem:[#allocation45_spill] sm:$0xff]  ;;  %v8193_v0 = vld [vmem:[#allocation48_spill] sm:$0xff] }
 0x4eb   :  { %v4789_v39 = vpop.eup %4788  ;;  %v3409_v25 = vsub.f32 %v7341_v57, %v7567_v46  ;;  %4802 = vpow2.f32 %v3488_v32  ;;  %v2872_v47 = vsub.f32 %v8192_v59, %v7593_v7  ;;  %v3524_v22 = vmul.f32 1.442695, %v3411_v53 }
 0x4ec   :  { %v3577_v43 = vadd.f32 %v7609_v28, %v3576_v45  ;;  %v3407_v28 = vsub.f32 %v7328_v61, %v7567_v46  ;;  %3078 = vadd.xlane.f32.xlu1 %v3077_v12  ;;  %v4791_v33 = vpop.eup %4790  ;;  %v3597_v29 = vadd.f32 %v4787_v13, %v3596_v6  ;;  %4804 = vpow2.f32 %v3492_v15 }
 0x4ed   :  { %v4793_v24 = vpop.eup %4792  ;;  %4806 = vpow2.f32 %v3496_v44  ;;  %v3520_v48 = vmul.f32 1.442695, %v3409_v25  ;;  %v2968_v12 = vmul.f32 1.442695, %v2872_v47  ;;  %v2875_v13 = vsub.f32 %v7244_v9, %v7684_v49 }
 0x4ee   :  { %v3578_v62 = vadd.f32 %v7619_v51, %v3577_v43  ;;  %v3508_v51 = vmul.f32 1.442695, %v3403_v14  ;;  %v4795_v52 = vpop.eup %4794  ;;  %v3598_v18 = vadd.f32 %v4789_v39, %v3597_v29  ;;  %4808 = vpow2.f32 %v3500_v40  ;;  %v8194_v39 = vld [vmem:[#allocation51_spill] sm:$0xff] }
 0x4ef   :  { %v4797_v20 = vpop.eup %4796  ;;  %v3516_v58 = vmul.f32 1.442695, %v3407_v28  ;;  %4810 = vpow2.f32 %v3504_v21  ;;  %v2874_v43 = vsub.f32 %v8193_v0, %v7684_v49  ;;  %v3043_v28 = vpop.xlane.xlu1 %3042 }
 0x4f0   :  { %v3579_v55 = vadd.f32 %v7627_v35, %v3578_v62  ;;  %v2873_v35 = vsub.f32 %v7226_v4, %v7593_v7  ;;  %v4799_v45 = vpop.eup %4798  ;;  %v3599_v8 = vadd.f32 %v4791_v33, %v3598_v18  ;;  %4812 = vpow2.f32 %v3508_v51  ;;  %v7697_v40 = vpop.xlane.xlu2 %2802 }
 0x4f1   :  { %v4801_v14 = vpop.eup %4800  ;;  %4814 = vpow2.f32 %v3512_v34  ;;  %v2876_v62 = vsub.f32 %v8194_v39, %v7670_v54  ;;  %v2972_v9 = vmul.f32 1.442695, %v2874_v43  ;;  %v3415_v39 = vsub.f32 %v7394_v30, %v7567_v46 }
 0x4f2   :  { %v3580_v36 = vadd.f32 %v7631_v50, %v3579_v55  ;;  %v4803_v15 = vpop.eup %4802  ;;  %v3600_v50 = vadd.f32 %v4793_v24, %v3599_v8  ;;  %4816 = vpow2.f32 %v3516_v58  ;;  %v2970_v44 = vmul.f32 1.442695, %v2873_v35  ;;  %v7706_v55 = vpop.xlane.xlu0 %2805  ;;  %v8196_v58 = vld [vmem:[#allocation56_spill] sm:$0xff] }
 0x4f3   :  { %v4805_v4 = vpop.eup %4804  ;;  %4818 = vpow2.f32 %v3520_v48  ;;  %v2974_v24 = vmul.f32 1.442695, %v2875_v13  ;;  %v2976_v34 = vmul.f32 1.442695, %v2876_v62  ;;  %v2880_v35 = vsub.f32 %v8196_v58, %v7706_v55 }
 0x4f4   :  { %v3581_v32 = vadd.f32 %v7639_v63, %v3580_v36  ;;  %v4807_v6 = vpop.eup %4806  ;;  %v3601_v63 = vadd.f32 %v4795_v52, %v3600_v50  ;;  %4820 = vpow2.f32 %v3524_v22  ;;  %v3413_v8 = vsub.f32 %v7365_v5, %v7567_v46  ;;  %v8197_v50 = vld [vmem:[#allocation59_spill] sm:$0xff] }
 0x4f5   :  { %v7699_v33 = vpop.eup %4808  ;;  %4822 = vpow2.f32 %v2968_v12 }
 0x4f6   :  { %v3582_v27 = vadd.f32 %v7647_v19, %v3581_v32  ;;  %v2877_v19 = vsub.f32 %v7262_v11, %v7670_v54  ;;  %v7704_v21 = vpop.eup %4810  ;;  %v3602_v29 = vadd.f32 %v4797_v20, %v3601_v63  ;;  %4824 = vpow2.f32 %v2970_v44  ;;  %v8195_v11 = vld [vmem:[#allocation54_spill] sm:$0xff] }
 0x4f7   :  { %v7708_v53 = vpop.eup %4812  ;;  %4826 = vlog2.f32 %v7643_v42  ;;  %v2878_v18 = vsub.f32 %v8195_v11, %v7697_v40  ;;  %v2879_v20 = vsub.f32 %v7279_v1, %v7697_v40  ;;  %v2881_v42 = vsub.f32 %v7296_v41, %v7706_v55  ;;  %v7733_v22 = vpop.xlane.xlu1 %2808 }
 0x4f8   :  { %v3583_v25 = vadd.f32 %v7654_v23, %v3582_v27  ;;  %v7713_v52 = vpop.eup %4814  ;;  %v3603_v23 = vadd.f32 %v4799_v45, %v3602_v29  ;;  %4828 = vpow2.f32 %v2972_v9  ;;  %v2978_v47 = vmul.f32 1.442695, %v2877_v19 }
 0x4f9   :  { %v7718_v59 = vpop.eup %4816  ;;  %4830 = vpow2.f32 %v2974_v24  ;;  %v2980_v1 = vmul.f32 1.442695, %v2878_v18  ;;  %v2982_v43 = vmul.f32 1.442695, %v2879_v20  ;;  %v2882_v12 = vsub.f32 %v8197_v50, %v7733_v22  ;;  %v8198_v24 = vld [vmem:[#allocation41_spill] sm:$0xff] }
 0x4fa   :  { %v7711_v51 = vadd.f32 %v7661_v10, %v3583_v25  ;;  %v7722_v36 = vpop.eup %4818  ;;  %v3604_v10 = vadd.f32 %v4801_v14, %v3603_v23  ;;  %4832 = vlog2.f32 %v7633_v26  ;;  %v3049_v14 = vpop.xlane.xlu2 %3048  ;;  %v2883_v26 = vsub.f32 %v7315_v31, %v7733_v22 }
 0x4fb   :  { %v7726_v45 = vpop.eup %4820  ;;  %4834 = vpow2.f32 %v2976_v34  ;;  %v3046_v44 = vpop.xlane.xlu0 %3045  ;;  %v2986_v25 = vmul.f32 1.442695, %v2881_v42  ;;  %v3417_v19 = vsub.f32 %v7418_v56, %v7567_v46  ;;  %v2988_v31 = vmul.f32 1.442695, %v2882_v12 }
 0x4fc   :  { %v4823_v48 = vpop.eup %4822  ;;  %v3605_v32 = vadd.f32 %v4803_v15, %v3604_v10  ;;  %4836 = vpow2.f32 %v2978_v47  ;;  %v2984_v15 = vmul.f32 1.442695, %v2880_v35  ;;  %v2990_v34 = vmul.f32 1.442695, %v2883_v26 }
 0x4fd   :  { %v4825_v0 = vpop.eup %4824  ;;  %4838 = vlog2.f32 %v7672_v17  ;;  %v3419_v18 = vsub.f32 %v7430_v16, %v7567_v46  ;;  %v3528_v10 = vmul.f32 1.442695, %v3413_v8  ;;  %v8200_v8 = vld [vmem:[#allocation61_spill] sm:$0xff] }
 0x4fe   :  { %v4827_v41 = vpop.eup %4826  ;;  %v3606_v13 = vadd.f32 %v4805_v4, %v3605_v32  ;;  %v3080_v27 = vadd.f32 %v4825_v0, %v4823_v48  ;;  %4840 = vlog2.f32 %v3043_v28  ;;  %v8199_v48 = vld [vmem:[#allocation44_spill] sm:$0xff] }
 0x4ff   :  { %v4829_v63 = vpop.eup %4828  ;;  %v3129_v62 = vmul.f32 0.6931472, %v4827_v41  ;;  %4842 = vpow2.f32 %v2980_v1 }
 0x500   :  { %v4831_v9 = vpop.eup %4830  ;;  %v3607_v29 = vadd.f32 %v4807_v6, %v3606_v13  ;;  %3081 = vadd.xlane.f32.xlu0 %v3080_v27  ;;  %4844 = vpow2.f32 %v2982_v43  ;;  %v3421_v6 = vsub.f32 %v7444_v60, %v7567_v46 }
 0x501   :  { %v4833_v4 = vpop.eup %4832  ;;  %v3192_v17 = vadd.f32 %v3129_v62, %v8198_v24  ;;  %v3083_v23 = vadd.f32 %v4831_v9, %v4829_v63  ;;  %4846 = vpow2.f32 %v2984_v15  ;;  %v8201_v62 = vld [vmem:[#allocation47_spill] sm:$0xff] }
 0x502   :  { %v4835_v11 = vpop.eup %4834  ;;  %v3608_v28 = vadd.f32 %v7699_v33, %v3607_v29  ;;  %v3131_v47 = vmul.f32 0.6931472, %v4833_v4  ;;  %4848 = vpow2.f32 %v2986_v25  ;;  %v7753_v0 = vpop.xlane.xlu2 %2811 }
 0x503   :  { %v4837_v20 = vpop.eup %4836  ;;  %v3763_v58 = vsel %vm3762_vm14, %v3192_v17, 0.0  ;;  %3084 = vadd.xlane.f32.xlu2 %v3083_v23  ;;  %4850 = vpow2.f32 %v2988_v31  ;;  %v7755_v33 = vpop.xlane.xlu1 %2817  ;;  %v2884_v12 = vsub.f32 %v8200_v8, %v7753_v0  ;;  %v2885_v26 = vsub.f32 %v7328_v61, %v7753_v0  ;;  %v8202_v61 = vld [vmem:[#allocation50_spill] sm:$0xff] }
 0x504   :  { %v4839_v35 = vpop.eup %4838  ;;  %v3609_v42 = vadd.f32 %v7704_v21, %v3608_v28  ;;  %v3193_v32 = vadd.f32 %v3131_v47, %v8199_v48  ;;  %v3086_v1 = vadd.f32 %v4837_v20, %v4835_v11  ;;  %4852 = vpow2.f32 %v2990_v34  ;;  %v3052_v15 = vpop.xlane.xlu0 %3051 }
 0x505   :  { %v4841_v43 = vpop.eup %4840  ;;  %v3133_v50 = vmul.f32 0.6931472, %v4839_v35  ;;  %4854 = vlog2.f32 %v3046_v44  ;;  %v2992_v9 = vmul.f32 1.442695, %v2884_v12  ;;  %v2994_v29 = vmul.f32 1.442695, %v2885_v26 }
 0x506   :  { %v4843_v41 = vpop.eup %4842  ;;  %v3610_v21 = vadd.f32 %v7708_v53, %v3609_v42  ;;  %v3731_v13 = vmul.f32 0.0, %v3193_v32  ;;  %v3135_v27 = vmul.f32 0.6931472, %v4841_v43  ;;  %3087 = vadd.xlane.f32.xlu1 %v3086_v1  ;;  %4856 = vlog2.f32 %v3049_v14  ;;  %v8203_v44 = vld [vmem:[#allocation65_spill] sm:$0xff] }
 0x507   :  { %v4845_v63 = vpop.eup %4844  ;;  %v3194_v25 = vadd.f32 %v3133_v50, %v8201_v62  ;;  %4858 = vlog2.f32 %v3052_v15  ;;  %v2888_v28 = vsub.f32 %v8203_v44, %v7755_v33  ;;  %v2889_v48 = vsub.f32 %v7354_v3, %v7755_v33 }
 0x508   :  { %v4847_v31 = vpop.eup %4846  ;;  %v3611_v4 = vadd.f32 %v7713_v52, %v3610_v21  ;;  %v3764_v24 = vsel %vm3762_vm14, %v3731_v13, 0.0  ;;  %v3195_v17 = vadd.f32 %v3135_v27, %v8202_v61  ;;  %v3089_v23 = vadd.f32 %v4845_v63, %v4843_v41  ;;  %v8204_v63 = vld [vmem:[#allocation53_spill] sm:$0xff] }
 0x509   :  { %v4849_v53 = vpop.eup %4848  ;;  %v3765_v34 = vadd.f32 %v3764_v24, %v3763_v58  ;;  %v3732_v11 = vmul.f32 0.0, %v3194_v25  ;;  %4860 = vpow2.f32 %v2992_v9  ;;  %v3000_v58 = vmul.f32 1.442695, %v2888_v28  ;;  %v8205_v25 = vld [vmem:[#allocation63_spill] sm:$0xff] }
 0x50a   :  { %v4851_v47 = vpop.eup %4850  ;;  %v3612_v14 = vadd.f32 %v7718_v59, %v3611_v4  ;;  %v3733_v20 = vmul.f32 0.0, %v3195_v17  ;;  %3090 = vadd.xlane.f32.xlu0 %v3089_v23  ;;  %v3092_v35 = vadd.f32 %v4849_v53, %v4847_v31  ;;  %4862 = vpow2.f32 %v2994_v29  ;;  %v3055_v59 = vpop.xlane.xlu2 %3054  ;;  %v8206_v31 = vld [vmem:[#allocation55_spill] sm:$0xff] }
 0x50b   :  { %v4853_v52 = vpop.eup %4852  ;;  %v3766_v42 = vsel %vm3762_vm14, %v3732_v11, 0.0  ;;  %4864 = vpow2.f32 %v3528_v10  ;;  %v3061_v8 = vpop.xlane.xlu1 %3060  ;;  %v3002_v21 = vmul.f32 1.442695, %v2889_v48  ;;  %v3532_v3 = vmul.f32 1.442695, %v3415_v39 }
 0x50c   :  { %v4855_v32 = vpop.eup %4854  ;;  %v3767_v1 = vadd.f32 %v3766_v42, %v3765_v34  ;;  %v3768_v43 = vsel %vm3762_vm14, %v3733_v20, 0.0  ;;  %3093 = vadd.xlane.f32.xlu2 %v3092_v35  ;;  %v3095_v50 = vadd.f32 %v4853_v52, %v4851_v47  ;;  %v3613_v26 = vadd.f32 %v7722_v36, %v3612_v14  ;;  %v7777_v10 = vpop.xlane.xlu0 %2814  ;;  %v8208_v20 = vld [vmem:[#allocation81_spill] sm:$0xff] }
 0x50d   :  { %v4857_v12 = vpop.eup %4856  ;;  %v3137_v41 = vmul.f32 0.6931472, %v4855_v32  ;;  %4866 = vlog2.f32 %v3055_v59  ;;  %v2886_v9 = vsub.f32 %v8205_v25, %v7777_v10  ;;  %v2887_v36 = vsub.f32 %v7341_v57, %v7777_v10  ;;  %v8207_v57 = vld [vmem:[#allocation58_spill] sm:$0xff] }
 0x50e   :  { %v3769_v13 = vadd.f32 %v3768_v43, %v3767_v1  ;;  %v3139_v27 = vmul.f32 0.6931472, %v4857_v12  ;;  %3096 = vadd.xlane.f32.xlu1 %v3095_v50  ;;  %4868 = vpow2.f32 %v3000_v58  ;;  %v4859_v15 = vpop.eup %4858  ;;  %v3536_v39 = vmul.f32 1.442695, %v3417_v19 }
 0x50f   :  { %v3196_v62 = vadd.f32 %v3137_v41, %v8204_v63  ;;  %4870 = vpow2.f32 %v3002_v21  ;;  %v4861_v29 = vpop.eup %4860  ;;  %v3141_v24 = vmul.f32 0.6931472, %v4859_v15  ;;  %v3614_v17 = vadd.f32 %v7726_v45, %v3613_v26 }
 0x510   :  { %v3197_v4 = vadd.f32 %v3139_v27, %v8206_v31  ;;  %4872 = vlog2.f32 %v3061_v8  ;;  %v4863_v61 = vpop.eup %4862  ;;  %v2996_v53 = vmul.f32 1.442695, %v2886_v9  ;;  %v2998_v34 = vmul.f32 1.442695, %v2887_v36  ;;  %v8209_v8 = vld [vmem:[#allocation74_spill] sm:$0xff] }
 0x511   :  { %v3734_v23 = vmul.f32 0.0, %v3196_v62  ;;  %v4865_v11 = vpop.eup %4864  ;;  %4874 = vpow2.f32 %v3532_v3  ;;  %v3198_v28 = vadd.f32 %v3141_v24, %v8207_v57  ;;  %v3098_v47 = vadd.f32 %v4863_v61, %v4861_v29  ;;  %v8211_v62 = vld [vmem:[#allocation70_spill] sm:$0xff] }
 0x512   :  { %v3735_v44 = vmul.f32 0.0, %v3197_v4  ;;  %v3423_v19 = vsub.f32 %v8208_v20, %v7567_v46  ;;  %v3540_v35 = vmul.f32 1.442695, %v3419_v18  ;;  %4876 = vpow2.f32 %v2996_v53  ;;  %v3058_v32 = vpop.xlane.xlu2 %3057 }
 0x513   :  { %v4867_v14 = vpop.eup %4866  ;;  %v3770_v52 = vsel %vm3762_vm14, %v3734_v23, 0.0  ;;  %4878 = vpow2.f32 %v3536_v39  ;;  %v3736_v58 = vmul.f32 0.0, %v3198_v28  ;;  %3099 = vadd.xlane.f32.xlu0 %v3098_v47  ;;  %v7797_v1 = vpop.xlane.xlu1 %2826  ;;  %v3615_v50 = vadd.f32 %v4865_v11, %v3614_v17  ;;  %v8212_v23 = vld [vmem:[#allocation64_spill] sm:$0xff] }
 0x514   :  { %v4869_v45 = vpop.eup %4868  ;;  %v3771_v42 = vadd.f32 %v3770_v52, %v3769_v13  ;;  %v3772_v48 = vsel %vm3762_vm14, %v3735_v44, 0.0  ;;  %4880 = vpow2.f32 %v2998_v34  ;;  %v3143_v59 = vmul.f32 0.6931472, %v4867_v14  ;;  %v7802_v21 = vpop.xlane.xlu0 %2823  ;;  %v8210_v13 = vld [vmem:[#allocation60_spill] sm:$0xff]  ;;  %v8213_v52 = vld [vmem:[#allocation67_spill] sm:$0xff] }
 0x515   :  { %v4871_v43 = vpop.eup %4870  ;;  %v2894_v18 = vsub.f32 %v8209_v8, %v7797_v1  ;;  %v3774_v41 = vsel %vm3762_vm14, %v3736_v58, 0.0  ;;  %4882 = vlog2.f32 %v3058_v32  ;;  %v2895_v3 = vsub.f32 %v7418_v56, %v7797_v1  ;;  %v8214_v8 = vld [vmem:[#allocation62_spill] sm:$0xff] }
 0x516   :  { %v4873_v12 = vpop.eup %4872  ;;  %v3773_v26 = vadd.f32 %v3772_v48, %v3771_v42  ;;  %v3199_v27 = vadd.f32 %v3143_v59, %v8210_v13  ;;  %v3104_v63 = vadd.f32 %v4871_v43, %v4869_v45  ;;  %v2892_v25 = vsub.f32 %v8211_v62, %v7802_v21 }
 0x517   :  { %v3147_v15 = vmul.f32 0.6931472, %v4873_v12  ;;  %v4875_v9 = vpop.eup %4874  ;;  %v3544_v36 = vmul.f32 1.442695, %v3421_v6  ;;  %v2893_v39 = vsub.f32 %v7394_v30, %v7802_v21  ;;  %v3012_v31 = vmul.f32 1.442695, %v2894_v18 }
 0x518   :  { %v3775_v29 = vadd.f32 %v3774_v41, %v3773_v26  ;;  %v4877_v4 = vpop.eup %4876  ;;  %4884 = vpow2.f32 %v3540_v35  ;;  %v3616_v56 = vadd.f32 %v4875_v9, %v3615_v50  ;;  %v3737_v24 = vmul.f32 0.0, %v3199_v27  ;;  %3105 = vadd.xlane.f32.xlu1 %v3104_v63 }
 0x519   :  { %v3008_v61 = vmul.f32 1.442695, %v2892_v25  ;;  %v4879_v17 = vpop.eup %4878  ;;  %v3201_v53 = vadd.f32 %v3147_v15, %v8212_v23  ;;  %v3010_v34 = vmul.f32 1.442695, %v2893_v39  ;;  %4886 = vpow2.f32 %v3012_v31 }
 0x51a   :  { %v3014_v11 = vmul.f32 1.442695, %v2895_v3  ;;  %v4881_v44 = vpop.eup %4880  ;;  %v3776_v6 = vsel %vm3762_vm14, %v3737_v24, 0.0  ;;  %v3425_v30 = vsub.f32 %v7502_v38, %v7567_v46  ;;  %v7818_v14 = vpop.xlane.xlu2 %2820  ;;  %v3548_v58 = vmul.f32 1.442695, %v3423_v19 }
 0x51b   :  { %4888 = vpow2.f32 %v3008_v61  ;;  %v4883_v57 = vpop.eup %4882  ;;  %v3777_v28 = vadd.f32 %v3776_v6, %v3775_v29  ;;  %v3101_v47 = vadd.f32 %v4881_v44, %v4877_v4  ;;  %v2890_v45 = vsub.f32 %v8213_v52, %v7818_v14  ;;  %v3070_v48 = vpop.xlane.xlu1 %3069 }
 0x51c   :  { %4890 = vpow2.f32 %v3010_v34  ;;  %v3145_v35 = vmul.f32 0.6931472, %v4883_v57  ;;  %v2891_v42 = vsub.f32 %v7365_v5, %v7818_v14  ;;  %v3617_v32 = vadd.f32 %v4879_v17, %v3616_v56  ;;  %v3064_v50 = vpop.xlane.xlu0 %3063  ;;  %v8216_v57 = vld [vmem:[#allocation66_spill] sm:$0xff] }
 0x51d   :  { %4892 = vpow2.f32 %v3544_v36  ;;  %3102 = vadd.xlane.f32.xlu2 %v3101_v47  ;;  %v3739_v43 = vmul.f32 0.0, %v3201_v53  ;;  %v3004_v12 = vmul.f32 1.442695, %v2890_v45  ;;  %v3552_v5 = vmul.f32 1.442695, %v3425_v30  ;;  %v8215_v53 = vld [vmem:[#allocation76_spill] sm:$0xff] }
 0x51e   :  { %4894 = vpow2.f32 %v3014_v11  ;;  %v4885_v59 = vpop.eup %4884  ;;  %v3200_v18 = vadd.f32 %v3145_v35, %v8214_v8  ;;  %v3006_v26 = vmul.f32 1.442695, %v2891_v42  ;;  %v3585_v45 = vrot.slane %v7711_v51, 4 }
 0x51f   :  { %4896 = vlog2.f32 %v3064_v50  ;;  %v4887_v41 = vpop.eup %4886  ;;  %v3618_v15 = vadd.f32 %v4885_v59, %v3617_v32  ;;  %v3780_v62 = vsel %vm3762_vm14, %v3739_v43, 0.0 }
 0x520   :  { %4898 = vlog2.f32 %v3070_v48  ;;  %v3738_v13 = vmul.f32 0.0, %v3200_v18  ;;  %v3586_v18 = vadd.f32 %v3585_v45, %v7711_v51 }
 0x521   :  { %v4889_v3 = vpop.eup %4888  ;;  %4900 = vpow2.f32 %v3004_v12 }
 0x522   :  { %v4891_v27 = vpop.eup %4890  ;;  %4902 = vpow2.f32 %v3006_v26  ;;  %v3778_v63 = vsel %vm3762_vm14, %v3738_v13, 0.0  ;;  %v3067_v29 = vpop.xlane.xlu2 %3066  ;;  %v8218_v26 = vld [vmem:[#allocation69_spill] sm:$0xff]  ;;  %v3587_v51 = vrot.slane %v3586_v18, 2 }
 0x523   :  { %v4893_v19 = vpop.eup %4892  ;;  %4904 = vpow2.f32 %v3548_v58  ;;  %v3110_v25 = vadd.f32 %v4891_v27, %v4889_v3  ;;  %v3779_v36 = vadd.f32 %v3778_v63, %v3777_v28  ;;  %v8217_v58 = vld [vmem:[#allocation73_spill] sm:$0xff] }
 0x524   :  { %v4895_v9 = vpop.eup %4894  ;;  %4906 = vlog2.f32 %v3067_v29  ;;  %v3619_v56 = vadd.f32 %v4893_v19, %v3618_v15  ;;  %v7827_v17 = vpop.xlane.xlu0 %2829  ;;  %v8219_v27 = vld [vmem:[#allocation77_spill] sm:$0xff] }
 0x525   :  { %v4897_v39 = vpop.eup %4896  ;;  %v3113_v31 = vadd.f32 %v4895_v9, %v4887_v41  ;;  %v3781_v24 = vadd.f32 %v3780_v62, %v3779_v36  ;;  %3111 = vadd.xlane.f32.xlu2 %v3110_v25  ;;  %4908 = vpow2.f32 %v3552_v5  ;;  %v2896_v34 = vsub.f32 %v8215_v53, %v7827_v17 }
 0x526   :  { %v4899_v4 = vpop.eup %4898  ;;  %v3149_v61 = vmul.f32 0.6931472, %v4897_v39  ;;  %v2897_v11 = vsub.f32 %v7430_v16, %v7827_v17 }
 0x527   :  { %v4901_v23 = vpop.eup %4900  ;;  %v3153_v44 = vmul.f32 0.6931472, %v4899_v4  ;;  %3114 = vadd.xlane.f32.xlu1 %v3113_v31  ;;  %v3016_v35 = vmul.f32 1.442695, %v2896_v34  ;;  %v3588_v34 = vadd.f32 %v3587_v51, %v3586_v18 }
 0x528   :  { %v4903_v6 = vpop.eup %4902  ;;  %v3202_v30 = vadd.f32 %v3149_v61, %v8216_v57  ;;  %v3018_v52 = vmul.f32 1.442695, %v2897_v11 }
 0x529   :  { %v4905_v28 = vpop.eup %4904  ;;  %v3107_v47 = vadd.f32 %v4903_v6, %v4901_v23  ;;  %v3204_v32 = vadd.f32 %v3153_v44, %v8217_v58  ;;  %4910 = vpow2.f32 %v3016_v35  ;;  %v8221_v58 = vld [vmem:[#allocation32_spill] sm:$0xff] }
 0x52a   :  { %v3620_v42 = vadd.f32 %v4905_v28, %v3619_v56  ;;  %v3740_v48 = vmul.f32 0.0, %v3202_v30  ;;  %v4907_v43 = vpop.eup %4906  ;;  %4912 = vpow2.f32 %v3018_v52  ;;  %v7845_v63 = vpop.xlane.xlu2 %2835 }
 0x52b   :  { %3108 = vadd.xlane.f32.xlu0 %v3107_v47  ;;  %v3151_v50 = vmul.f32 0.6931472, %v4907_v43  ;;  %v4909_v59 = vpop.eup %4908  ;;  %v3742_v3 = vmul.f32 0.0, %v3204_v32  ;;  %v3589_v47 = vrot.slane %v3588_v34, 1  ;;  %v8222_v32 = vld [vmem:[#allocation25_spill] sm:$0xff] }
 0x52c   :  { %v3782_v16 = vsel %vm3762_vm14, %v3740_v48, 0.0  ;;  %v3621_v12 = vadd.f32 %v4909_v59, %v3620_v42  ;;  %v7839_v13 = vpop.xlane.xlu0 %2832  ;;  %v3661_v43 = vmul.f32 %v8222_v32, %v8221_v58 }
 0x52d   :  { %v3783_v8 = vadd.f32 %v3782_v16, %v3781_v24  ;;  %v3203_v41 = vadd.f32 %v3151_v50, %v8218_v26  ;;  %v2898_v5 = vsub.f32 %v8219_v27, %v7839_v13  ;;  %v2899_v15 = vsub.f32 %v7444_v60, %v7839_v13  ;;  %v8220_v24 = vld [vmem:[#allocation79_spill] sm:$0xff] }
 0x52e   :  { %v3786_v39 = vsel %vm3762_vm14, %v3742_v3, 0.0  ;;  %v3622_v31 = vrot.slane %v3621_v12, 4  ;;  %v2900_v61 = vsub.f32 %v8220_v24, %v7845_v63  ;;  %v2901_v60 = vsub.f32 %v8208_v20, %v7845_v63 }
 0x52f   :  { %v3741_v19 = vmul.f32 0.0, %v3203_v41  ;;  %v4911_v62 = vpop.eup %4910  ;;  %v3020_v25 = vmul.f32 1.442695, %v2898_v5  ;;  %v3022_v9 = vmul.f32 1.442695, %v2899_v15  ;;  %v3590_v45 = vadd.f32 %v3589_v47, %v3588_v34  ;;  %v8224_v5 = vld [vmem:[#allocation27_spill] sm:$0xff] }
 0x530   :  { %v4913_v36 = vpop.eup %4912  ;;  %v3623_v23 = vadd.f32 %v3622_v31, %v3621_v12  ;;  %v3024_v44 = vmul.f32 1.442695, %v2900_v61  ;;  %v3026_v6 = vmul.f32 1.442695, %v2901_v60  ;;  %v5115_v41 = vmov 0.0   ;;  %v8225_v15 = vld [vmem:[#allocation39_spill] sm:$0xff] }
 0x531   :  { %v3784_v29 = vsel %vm3762_vm14, %v3741_v19, 0.0  ;;  %4914 = vpow2.f32 %v3020_v25  ;;  %v3116_v56 = vadd.f32 %v4913_v36, %v4911_v62  ;;  %v4377_v27 = vsel %vm2608_vm15, 1.0, %v5115_v41  ;;  %v8227_v36 = vld [vmem:[#allocation22_spill] sm:$0xff]  ;;  %v8229_v31 = vld [vmem:[#allocation35_spill] sm:$0xff] }
 0x532   :  { %v3785_v4 = vadd.f32 %v3784_v29, %v3783_v8  ;;  %4916 = vpow2.f32 %v3022_v9  ;;  %v3624_v11 = vrot.slane %v3623_v23, 2  ;;  %v3664_v19 = vmul.f32 %v8225_v15, %v8224_v5  ;;  %v8226_v9 = vld [vmem:[#allocation31_spill] sm:$0xff]  ;;  %v8233_v47 = vld [vmem:[#allocation38_spill] sm:$0xff] }
 0x533   :  { %3117 = vadd.xlane.f32.xlu0 %v3116_v56  ;;  %4918 = vpow2.f32 %v3024_v44  ;;  %v3660_v51 = vmul.f32 %v8227_v36, %v8226_v9  ;;  %vm3967_vm15 = vcmask 0  }
 0x534   :  { %v7853_v53 = vadd.f32 %v3786_v39, %v3785_v4  ;;  %v3625_v57 = vadd.f32 %v3624_v11, %v3623_v23  ;;  %4920 = vpow2.f32 %v3026_v6  ;;  %v8230_v6 = vld [vmem:[#allocation29_spill] sm:$0xff] }
 0x535   :  { %4922 = vlog2.f32 %v3590_v45 }
 0x536   :  { %v3626_v35 = vrot.slane %v3625_v57, 1 }
 0x537   :  { %v4915_v30 = vpop.eup %4914 }
 0x538   :  { %v4917_v28 = vpop.eup %4916  ;;  %v3627_v42 = vadd.f32 %v3626_v35, %v3625_v57  ;;  %v8231_v57 = vld [vmem:[#allocation34_spill] sm:$0xff] }
 0x539   :  { %v3119_v52 = vadd.f32 %v4917_v28, %v4915_v30  ;;  %v4919_v20 = vpop.eup %4918  ;;  %v3662_v30 = vmul.f32 %v8231_v57, %v8230_v6  ;;  %v8232_v28 = vld [vmem:[#allocation28_spill] sm:$0xff] }
 0x53a   :  { %4924 = vlog2.f32 %v3627_v42  ;;  %v4921_v48 = vpop.eup %4920  ;;  %v3665_v35 = vmul.f32 %v8233_v47, %v8232_v28 }
 0x53b   :  { %3120 = vadd.xlane.f32.xlu2 %v3119_v52  ;;  %v4923_v16 = vpop.eup %4922  ;;  %v3122_v59 = vadd.f32 %v4921_v48, %v4919_v20 }
 0x53c   :  { %v3629_v8 = vmul.f32 0.6931472, %v4923_v16 }
 0x53d   :  { %3123 = vadd.xlane.f32.xlu1 %v3122_v59 }
 0x53e   :  { %v3632_v12 = vadd.f32 %v3629_v8, %v7485_v2 }
 0x540   :  { %v4925_v50 = vpop.eup %4924  ;;  %v3835_v62 = vmul.f32 %v4377_v27, %v3632_v12  ;;  %v8235_v27 = vld [vmem:[#allocation83_spill] sm:$0xff] }
 0x541   :  { %v3631_v18 = vmul.f32 0.6931472, %v4925_v50 }
 0x542   :  { %v3838_v29 = vsel %vm3837_vm4, %v3835_v62, 0.0 }
 0x543   :  { %3720 = vadd.xlane.f32.xlu2 %v3661_v43  ;;  %v3633_v26 = vadd.f32 %v3631_v18, %v7567_v46  ;;  %v8228_v46 = vld [vmem:[#allocation30_spill] sm:$0xff]  ;;  %v8234_v18 = vld [vmem:[#allocation75_spill] sm:$0xff] }
 0x544   :  { %v3663_v4 = vmul.f32 %v8229_v31, %v8228_v46 }
 0x545   :  { %v3836_v25 = vmul.f32 0.0, %v3633_v26  ;;  %3718 = vadd.xlane.f32.xlu1 %v3660_v51 }
 0x547   :  { %v3839_v39 = vsel %vm3837_vm4, %v3836_v25, 0.0  ;;  %v8236_v25 = vld [vmem:[#allocation84_spill] sm:$0xff] }
 0x548   :  { %v3840_v2 = vadd.f32 %v3839_v39, %v3838_v29 }
 0x54b   :  { %3726 = vadd.xlane.f32.xlu2 %v3664_v19 }
 0x54d   :  { %3724 = vadd.xlane.f32.xlu1 %v3663_v4 }
 0x552   :  { %v7867_v56 = vpop.xlane.xlu1 %2838 }
 0x553   :  { %3841 = vadd.xlane.f32.xlu2 %v3840_v2  ;;  %v2902_v24 = vsub.f32 %v7607_v37, %v7867_v56  ;;  %v2903_v61 = vsub.f32 %v7502_v38, %v7867_v56  ;;  %v3073_v37 = vpop.xlane.xlu0 %3072 }
 0x555   :  { %v3028_v60 = vmul.f32 1.442695, %v2902_v24  ;;  %v3030_v23 = vmul.f32 1.442695, %v2903_v61 }
 0x557   :  { %4926 = vpow2.f32 %v3028_v60  ;;  %v3076_v52 = vpop.xlane.xlu2 %3075 }
 0x558   :  { %4928 = vpow2.f32 %v3030_v23 }
 0x559   :  { %4930 = vlog2.f32 %v3073_v37 }
 0x55a   :  { %4932 = vlog2.f32 %v3076_v52 }
 0x55d   :  { %v4927_v34 = vpop.eup %4926 }
 0x55e   :  { %v4929_v11 = vpop.eup %4928 }
 0x55f   :  { %v3125_v44 = vadd.f32 %v4929_v11, %v4927_v34  ;;  %v3079_v38 = vpop.xlane.xlu1 %3078  ;;  %v4931_v58 = vpop.eup %4930 }
 0x560   :  { %4934 = vlog2.f32 %v3079_v38  ;;  %v4933_v43 = vpop.eup %4932  ;;  %v3155_v16 = vmul.f32 0.6931472, %v4931_v58 }
 0x561   :  { %3126 = vadd.xlane.f32.xlu0 %v3125_v44  ;;  %v3157_v8 = vmul.f32 0.6931472, %v4933_v43 }
 0x562   :  { %v3205_v12 = vadd.f32 %v3155_v16, %v8234_v18 }
 0x563   :  { %v3206_v5 = vadd.f32 %v3157_v8, %v8235_v27 }
 0x564   :  { %v3743_v62 = vmul.f32 0.0, %v3205_v12 }
 0x565   :  { %v3744_v39 = vmul.f32 0.0, %v3206_v5 }
 0x566   :  { %v4935_v59 = vpop.eup %4934  ;;  %v3788_v31 = vsel %vm3762_vm14, %v3743_v62, 0.0 }
 0x567   :  { %v3159_v26 = vmul.f32 0.6931472, %v4935_v59  ;;  %v3790_v34 = vsel %vm3762_vm14, %v3744_v39, 0.0 }
 0x569   :  { %3722 = vadd.xlane.f32.xlu0 %v3662_v30  ;;  %v3207_v9 = vadd.f32 %v3159_v26, %v8236_v25  ;;  %v3789_v30 = vadd.f32 %v3788_v31, %v7853_v53 }
 0x56b   :  { %v3745_v4 = vmul.f32 0.0, %v3207_v9  ;;  %v3791_v38 = vadd.f32 %v3790_v34, %v3789_v30 }
 0x56d   :  { %v3792_v28 = vsel %vm3762_vm14, %v3745_v4, 0.0 }
 0x571   :  { %3728 = vadd.xlane.f32.xlu0 %v3665_v35 }
 0x573   :  { %v3082_v45 = vpop.xlane.xlu0 %3081 }
 0x574   :  { %4936 = vlog2.f32 %v3082_v45 }
 0x576   :  { %v3085_v42 = vpop.xlane.xlu2 %3084 }
 0x577   :  { %4938 = vlog2.f32 %v3085_v42 }
 0x579   :  { %v3088_v20 = vpop.xlane.xlu1 %3087 }
 0x57a   :  { %4940 = vlog2.f32 %v3088_v20  ;;  %v4937_v3 = vpop.eup %4936 }
 0x57b   :  { %v3161_v36 = vmul.f32 0.6931472, %v4937_v3 }
 0x57d   :  { %v3091_v48 = vpop.xlane.xlu0 %3090  ;;  %v4939_v19 = vpop.eup %4938  ;;  %v3208_v24 = vadd.f32 %v3161_v36, %v7593_v7 }
 0x57e   :  { %4942 = vlog2.f32 %v3091_v48  ;;  %v3163_v2 = vmul.f32 0.6931472, %v4939_v19  ;;  %v3793_v48 = vadd.f32 %v3792_v28, %v3791_v38 }
 0x57f   :  { %v3094_v32 = vpop.xlane.xlu2 %3093  ;;  %v3746_v47 = vmul.f32 0.0, %v3208_v24 }
 0x580   :  { %4944 = vlog2.f32 %v3094_v32  ;;  %v4941_v29 = vpop.eup %4940  ;;  %v3209_v11 = vadd.f32 %v3163_v2, %v7684_v49 }
 0x581   :  { %v3097_v50 = vpop.xlane.xlu1 %3096  ;;  %v3165_v61 = vmul.f32 0.6931472, %v4941_v29  ;;  %v3794_v53 = vsel %vm3762_vm14, %v3746_v47, 0.0 }
 0x582   :  { %4946 = vlog2.f32 %v3097_v50  ;;  %v3747_v45 = vmul.f32 0.0, %v3209_v11  ;;  %v3795_v26 = vadd.f32 %v3794_v53, %v3793_v48 }
 0x583   :  { %v3210_v35 = vadd.f32 %v3165_v61, %v7670_v54 }
 0x584   :  { %v4943_v46 = vpop.eup %4942  ;;  %v3796_v50 = vsel %vm3762_vm14, %v3747_v45, 0.0 }
 0x585   :  { %v3167_v44 = vmul.f32 0.6931472, %v4943_v46  ;;  %v3748_v58 = vmul.f32 0.0, %v3210_v35  ;;  %v3797_v19 = vadd.f32 %v3796_v50, %v3795_v26 }
 0x586   :  { %v3100_v41 = vpop.xlane.xlu0 %3099  ;;  %v4945_v23 = vpop.eup %4944 }
 0x587   :  { %4948 = vlog2.f32 %v3100_v41  ;;  %v3169_v7 = vmul.f32 0.6931472, %v4945_v23  ;;  %v3211_v42 = vadd.f32 %v3167_v44, %v7697_v40  ;;  %v3798_v41 = vsel %vm3762_vm14, %v3748_v58, 0.0 }
 0x588   :  { %v4947_v57 = vpop.eup %4946 }
 0x589   :  { %v3171_v49 = vmul.f32 0.6931472, %v4947_v57  ;;  %v3212_v32 = vadd.f32 %v3169_v7, %v7706_v55  ;;  %v3749_v59 = vmul.f32 0.0, %v3211_v42 }
 0x58b   :  { %v3106_v51 = vpop.xlane.xlu1 %3105  ;;  %v3213_v8 = vadd.f32 %v3171_v49, %v7733_v22  ;;  %v3750_v3 = vmul.f32 0.0, %v3212_v32  ;;  %v3800_v62 = vsel %vm3762_vm14, %v3749_v59, 0.0 }
 0x58d   :  { %v4949_v52 = vpop.eup %4948  ;;  %v3751_v25 = vmul.f32 0.0, %v3213_v8  ;;  %v3802_v29 = vsel %vm3762_vm14, %v3750_v3, 0.0 }
 0x58e   :  { %v3173_v43 = vmul.f32 0.6931472, %v4949_v52 }
 0x58f   :  { %v3804_v4 = vsel %vm3762_vm14, %v3751_v25, 0.0 }
 0x590   :  { %v3103_v15 = vpop.xlane.xlu2 %3102  ;;  %v3214_v27 = vadd.f32 %v3173_v43, %v7753_v0 }
 0x591   :  { %4950 = vlog2.f32 %v3103_v15 }
 0x592   :  { %4952 = vlog2.f32 %v3106_v51  ;;  %v3799_v51 = vadd.f32 %v3798_v41, %v3797_v19  ;;  %v3752_v39 = vmul.f32 0.0, %v3214_v27 }
 0x594   :  { %v3801_v31 = vadd.f32 %v3800_v62, %v3799_v51  ;;  %v3806_v34 = vsel %vm3762_vm14, %v3752_v39, 0.0 }
 0x597   :  { %v4951_v20 = vpop.eup %4950 }
 0x598   :  { %v3112_v6 = vpop.xlane.xlu2 %3111  ;;  %v4953_v54 = vpop.eup %4952  ;;  %v3175_v18 = vmul.f32 0.6931472, %v4951_v20 }
 0x599   :  { %v3177_v55 = vmul.f32 0.6931472, %v4953_v54 }
 0x59a   :  { %v3115_v37 = vpop.xlane.xlu1 %3114  ;;  %v3215_v22 = vadd.f32 %v3175_v18, %v7777_v10  ;;  %v3803_v10 = vadd.f32 %v3802_v29, %v3801_v31 }
 0x59b   :  { %v3216_v2 = vadd.f32 %v3177_v55, %v7755_v33 }
 0x59c   :  { %v3753_v24 = vmul.f32 0.0, %v3215_v22  ;;  %v3805_v30 = vadd.f32 %v3804_v4, %v3803_v10 }
 0x59d   :  { %v3754_v11 = vmul.f32 0.0, %v3216_v2 }
 0x59e   :  { %v3109_v60 = vpop.xlane.xlu0 %3108  ;;  %v3808_v33 = vsel %vm3762_vm14, %v3753_v24, 0.0 }
 0x59f   :  { %4954 = vlog2.f32 %v3109_v60 }
 0x5a0   :  { %4956 = vlog2.f32 %v3112_v6 }
 0x5a1   :  { %4958 = vlog2.f32 %v3115_v37  ;;  %v3807_v37 = vadd.f32 %v3806_v34, %v3805_v30 }
 0x5a3   :  { %v3809_v42 = vadd.f32 %v3808_v33, %v3807_v37 }
 0x5a5   :  { %v4955_v12 = vpop.eup %4954 }
 0x5a6   :  { %v3118_v16 = vpop.xlane.xlu0 %3117  ;;  %v4957_v15 = vpop.eup %4956  ;;  %v3179_v9 = vmul.f32 0.6931472, %v4955_v12  ;;  %v8237_v12 = vld [vmem:[#allocation21_spill] sm:$0xff] }
 0x5a7   :  { %4960 = vlog2.f32 %v3118_v16  ;;  %v4959_v36 = vpop.eup %4958  ;;  %v3181_v0 = vmul.f32 0.6931472, %v4957_v15 }
 0x5a8   :  { %v3217_v61 = vadd.f32 %v3179_v9, %v7818_v14  ;;  %v3183_v60 = vmul.f32 0.6931472, %v4959_v36  ;;  %v3810_v14 = vsel %vm3762_vm14, %v3754_v11, 0.0 }
 0x5a9   :  { %v3218_v44 = vadd.f32 %v3181_v0, %v7802_v21  ;;  %v3811_v32 = vadd.f32 %v3810_v14, %v3809_v42 }
 0x5aa   :  { %v3755_v28 = vmul.f32 0.0, %v3217_v61  ;;  %v3219_v47 = vadd.f32 %v3183_v60, %v7797_v1 }
 0x5ab   :  { %v3756_v52 = vmul.f32 0.0, %v3218_v44 }
 0x5ac   :  { %v3812_v21 = vsel %vm3762_vm14, %v3755_v28, 0.0  ;;  %v3757_v20 = vmul.f32 0.0, %v3219_v47 }
 0x5ad   :  { %v4961_v46 = vpop.eup %4960  ;;  %v3814_v1 = vsel %vm3762_vm14, %v3756_v52, 0.0  ;;  %v3813_v54 = vadd.f32 %v3812_v21, %v3811_v32 }
 0x5ae   :  { %v3121_v40 = vpop.xlane.xlu2 %3120  ;;  %v3185_v6 = vmul.f32 0.6931472, %v4961_v46  ;;  %v3816_v50 = vsel %vm3762_vm14, %v3757_v20, 0.0 }
 0x5af   :  { %4962 = vlog2.f32 %v3121_v40  ;;  %v3815_v8 = vadd.f32 %v3814_v1, %v3813_v54 }
 0x5b0   :  { %v3124_v5 = vpop.xlane.xlu1 %3123  ;;  %v3220_v38 = vadd.f32 %v3185_v6, %v7827_v17 }
 0x5b1   :  { %4964 = vlog2.f32 %v3124_v5  ;;  %v3817_v27 = vadd.f32 %v3816_v50, %v3815_v8 }
 0x5b2   :  { %v3758_v43 = vmul.f32 0.0, %v3220_v38 }
 0x5b4   :  { %v3818_v40 = vsel %vm3762_vm14, %v3758_v43, 0.0 }
 0x5b5   :  { %v4963_v23 = vpop.eup %4962  ;;  %v3819_v15 = vadd.f32 %v3818_v40, %v3817_v27 }
 0x5b6   :  { %v3187_v35 = vmul.f32 0.6931472, %v4963_v23  ;;  %v3721_v53 = vpop.xlane.xlu2 %3720 }
 0x5b7   :  { %v4965_v57 = vpop.eup %4964  ;;  %v3878_v18 = vmul.f32 0.0, %v3721_v53 }
 0x5b8   :  { %v3719_v7 = vpop.xlane.xlu1 %3718  ;;  %v3189_v45 = vmul.f32 0.6931472, %v4965_v57  ;;  %v3221_v48 = vadd.f32 %v3187_v35, %v7839_v13  ;;  %v5116_v57 = vmov 16.0  }
 0x5b9   :  { %v3877_v49 = vmul.f32 0.0, %v3719_v7  ;;  %v3936_v19 = vsel %vm3762_vm14, %v3878_v18, 0.0 }
 0x5ba   :  { %v3222_v16 = vadd.f32 %v3189_v45, %v7845_v63  ;;  %v3759_v59 = vmul.f32 0.0, %v3221_v48 }
 0x5bb   :  { %v3934_v17 = vsel %vm3762_vm14, %v3877_v49, 0.0 }
 0x5bc   :  { %v3760_v13 = vmul.f32 0.0, %v3222_v16  ;;  %v3935_v26 = vadd.f32 %v3934_v17, %v8237_v12  ;;  %v3820_v55 = vsel %vm3762_vm14, %v3759_v59, 0.0 }
 0x5bd   :  { %v3821_v29 = vadd.f32 %v3820_v55, %v3819_v15 }
 0x5be   :  { %v3822_v22 = vsel %vm3762_vm14, %v3760_v13, 0.0  ;;  %v3727_v36 = vpop.xlane.xlu2 %3726  ;;  %v3937_v51 = vadd.f32 %v3936_v19, %v3935_v26 }
 0x5bf   :  { %v3881_v46 = vmul.f32 0.0, %v3727_v36  ;;  %v3823_v4 = vadd.f32 %v3822_v22, %v3821_v29 }
 0x5c0   :  { %v3725_v41 = vpop.xlane.xlu1 %3724 }
 0x5c1   :  { %v3880_v25 = vmul.f32 0.0, %v3725_v41  ;;  %v3942_v10 = vsel %vm3762_vm14, %v3881_v46, 0.0 }
 0x5c3   :  { %v3940_v31 = vsel %vm3762_vm14, %v3880_v25, 0.0 }
 0x5c6   :  { %v3842_v6 = vpop.xlane.xlu2 %3841 }
 0x5c7   :  { %v3843_v30 = vrot.slane %v3842_v6, 4 }
 0x5c9   :  { %v3844_v33 = vadd.f32 %v3843_v30, %v3842_v6 }
 0x5cb   :  { %v3845_v47 = vrot.slane %v3844_v33, 2 }
 0x5cd   :  { %v3846_v52 = vadd.f32 %v3845_v47, %v3844_v33 }
 0x5cf   :  { %v3847_v48 = vrot.slane %v3846_v52, 1 }
 0x5d1   :  { %v3848_v16 = vadd.f32 %v3847_v48, %v3846_v52 }
 0x5d4   :  { %v3127_v58 = vpop.xlane.xlu0 %3126 }
 0x5d5   :  { %4966 = vlog2.f32 %v3127_v58 }
 0x5d6   :  { %4968 = vrcp.f32 %v5116_v57 }
 0x5db   :  { %v4967_v3 = vpop.eup %4966 }
 0x5dc   :  { %v3191_v5 = vmul.f32 0.6931472, %v4967_v3  ;;  %v3723_v63 = vpop.xlane.xlu0 %3722  ;;  %v4969_v28 = vpop.eup %4968 }
 0x5dd   :  { %v3879_v62 = vmul.f32 0.0, %v3723_v63  ;;  %v3958_v7 = vmul.f32 16.0, %v4969_v28 }
 0x5de   :  { %v3223_v9 = vadd.f32 %v3191_v5, %v7867_v56 }
 0x5df   :  { %v3938_v39 = vsel %vm3762_vm14, %v3879_v62, 0.0  ;;  %v3959_v38 = vsub.f32 1.0, %v3958_v7 }
 0x5e0   :  { %v3761_v2 = vmul.f32 0.0, %v3223_v9  ;;  %v3939_v0 = vadd.f32 %v3938_v39, %v3937_v51 }
 0x5e1   :  { %v3960_v53 = vmul.f32 %v4969_v28, %v3959_v38 }
 0x5e2   :  { %v3941_v24 = vadd.f32 %v3940_v31, %v3939_v0  ;;  %v3824_v61 = vsel %vm3762_vm14, %v3761_v2, 0.0 }
 0x5e3   :  { %v3825_v60 = vadd.f32 %v3824_v61, %v3823_v4  ;;  %v3961_v54 = vadd.f32 %v4969_v28, %v3960_v53 }
 0x5e4   :  { %v3729_v23 = vpop.xlane.xlu0 %3728  ;;  %v3943_v56 = vadd.f32 %v3942_v10, %v3941_v24 }
 0x5e5   :  { %v3882_v34 = vmul.f32 0.0, %v3729_v23  ;;  %3826 = vadd.xlane.f32.xlu1 %v3825_v60 }
 0x5e7   :  { %v3944_v11 = vsel %vm3762_vm14, %v3882_v34, 0.0  ;;  %vm3962_vm14 = vweird.f32 %v4969_v28 }
 0x5e8   :  { %v3945_v44 = vadd.f32 %v3944_v11, %v3943_v56  ;;  %v3963_v59 = vsel %vm3962_vm14, %v4969_v28, %v3961_v54 }
 0x5ea   :  { %3946 = vadd.xlane.f32.xlu0 %v3945_v44 }
 0x658   :  { %v3827_v35 = vpop.xlane.xlu1 %3826 }
 0x659   :  { %v3828_v37 = vrot.slane %v3827_v35, 4 }
 0x65b   :  { %v3829_v14 = vadd.f32 %v3828_v37, %v3827_v35 }
 0x65d   :  { %v3830_v45 = vrot.slane %v3829_v14, 2  ;;  %v3947_v42 = vpop.xlane.xlu0 %3946 }
 0x65e   :  { %v3948_v49 = vrot.slane %v3947_v42, 4 }
 0x65f   :  { %v3831_v21 = vadd.f32 %v3830_v45, %v3829_v14 }
 0x660   :  { %v3949_v20 = vadd.f32 %v3948_v49, %v3947_v42 }
 0x661   :  { %v3832_v58 = vrot.slane %v3831_v21, 1 }
 0x662   :  { %v3950_v32 = vrot.slane %v3949_v20, 2 }
 0x663   :  { %v3833_v1 = vadd.f32 %v3832_v58, %v3831_v21 }
 0x664   :  { %v3951_v43 = vadd.f32 %v3950_v32, %v3949_v20 }
 0x665   :  { %4493 = vpush %v3833_v1 }
 0x666   :  { %4495 = vpush %v3848_v16  ;;  %v3952_v17 = vrot.slane %v3951_v43, 1 }
 0x668   :  { %v3953_v50 = vadd.f32 %v3952_v17, %v3951_v43 }
 0x66a   :  { %4497 = vpush %v3953_v50 }
 0x66b   :  { %4499 = vpush %v3963_v59 }
 0x696   :  { %s4494_s14 = spop %4493 }
 0x697   :  { %s4496_s15 = spop %4495 }
 0x698   :  { %s3850_s17 = sadd.f32 %s4496_s15, %s4494_s14 }
 0x69b   :  { %s4498_s16 = spop %4497 }
 0x69c   :  { %s3955_s18 = smul.f32 2.0, %s4498_s16  ;;  %s4500_s19 = spop %4499 }
 0x69e   :  { %s3956_s23 = ssub.f32 %s3850_s17, %s3955_s18 }
 0x6a0   :  { %s3965_s26 = smul.f32 %s4500_s19, %s3956_s23 }
 0x6a2   :  { %v3966_v8 = vstv %s3965_s26 }
 0x6a3   :  { %3968 = vst.msk [vmem:[#allocation11] sm:$0x1] %vm3967_vm15, %v3966_v8 }
 0x6a4   :  { %3979 = dma.vmem_to_hbm [thread:$0]  %s3975_s25, 16, %s3977_s22, [#allocation8]  }
 0x6a5   :  { %5104 = dma.done.wait [#allocation8], 16  }
 0x6a6   :  { %5105 = vsyncadd [#allocation8], 4294967280 }
 0x6a7   :  { %3984 = vsyncpa [#allocation7], 1 }
 0x6a8   :  { %3985 = vsyncpa [#allocation10], 1 }
 0x6a9   :  { %3986 = vsyncpa [#allocation8], 1 }
 0x6aa   :  { %3987 = vsyncmov [#allocation4] }
 0x6ad   :  { %s3988_s27 = vpop.sfrf %3987 }
 0x6ae   :  { %p4378_p0 = scmp.ne.s32.totalorder %s3988_s27, 0 }
 0x6b0   :  { %3992 = shalt.err (%p4378_p0)  }

</bundles_post_ra>
